<compile_context>
chip_gen: v7x
topology: tpu7x:2x2x1
jax: 0.10.0
libtpu: 0.0.40
codegen_flags: <defaults>
</compile_context>

<pallas_src>
import functools

import numpy as np

import jax
import jax.numpy as jnp
from jax import lax
from jax.experimental import pallas as pl
from jax.experimental.pallas import tpu as pltpu

# AtariA2C conv stack geometry: (out_channels, kernel, stride)
_CONV_CFG = ((32, 8, 4), (64, 4, 2), (64, 3, 1))
_HID = 512     # head hidden width
_LANE = 128    # channel dims padded to a full 128-lane group


def _out_size(h, k, s):
    return (h - k) // s + 1


# ----------------------------------------------------------------------------
# Fused forward kernel (one batch tile per grid step).
#   conv1 GEMM -> conv2 (im2col by static slices, 1 GEMM)
#   -> conv3 (== FC, 1 GEMM) -> fused head GEMM -> policy GEMM + value reduce.
# All intermediates stay in VMEM/vregs; only two lane-dense (B,128) blocks
# are stored.
# ----------------------------------------------------------------------------
def _make_kernel(geo, b_tile):
    OH1, OW1 = geo["oh1"], geo["ow1"]
    OH2, OW2 = geo["oh2"], geo["ow2"]
    K2, S2 = geo["k2"], geo["s2"]
    B = b_tile
    f32, bf16 = jnp.float32, jnp.bfloat16

    def kernel(p1_ref, w1_ref, b1_ref, w2_ref, b2_ref, w3_ref, b3_ref,
               wh1_ref, bh1_ref, wp2_ref, bp2_ref, wv2_ref, bv2_ref,
               pol_ref, val_ref):
        # conv1: one im2col GEMM for the whole tile.  Rows are ordered
        # (spatial, image) so downstream windows are contiguous row slices.
        h1 = jnp.dot(p1_ref[...], w1_ref[...], preferred_element_type=f32)
        h1 = jnp.maximum(h1 + b1_ref[...], 0.0)            # (OH1*OW1*B, 128) f32

        # conv2: dense im2col built from static, vreg-aligned slices of h1
        # (each piece is one (B,128) tile), then ONE GEMM with K = K2*K2*128.
        blocks = []
        for p in range(OH2):
            for q in range(OW2):
                pieces = []
                for i in range(K2):
                    for j in range(K2):
                        s = (S2 * p + i) * OW1 + (S2 * q + j)
                        pieces.append(h1[s * B:(s + 1) * B, :])
                blocks.append(jnp.concatenate(pieces, axis=1))   # (B, K2*K2*128)
        patches2 = jnp.concatenate(blocks, axis=0)               # (OH2*OW2*B, K2*K2*128)
        h2 = jnp.dot(patches2.astype(bf16), w2_ref[...],
                     preferred_element_type=f32)
        h2 = jnp.maximum(h2 + b2_ref[...], 0.0)                  # (OH2*OW2*B, 128) f32

        # conv3: 1x1 spatial output -> exactly a fully-connected layer on the
        # flattened (spatial2, channel) features.  One GEMM, K = OH2*OW2*128.
        flat = jnp.concatenate(
            [h2[o * B:(o + 1) * B, :] for o in range(OH2 * OW2)], axis=1)
        h3 = jnp.dot(flat.astype(bf16), w3_ref[...],
                     preferred_element_type=f32)
        h3 = jnp.maximum(h3 + b3_ref[...], 0.0)                  # (B, 128) f32

        # fused heads: one GEMM for both hidden layers (1024 lanes, lane dense).
        hh = jnp.dot(h3.astype(bf16), wh1_ref[...], preferred_element_type=f32)
        hh = jnp.maximum(hh + bh1_ref[...], 0.0)                 # (B, 1024) f32

        # policy: K=512 GEMM into a 128-lane-dense output (logits in cols <n_actions).
        pol = jnp.dot(hh[:, :_HID].astype(bf16), wp2_ref[...],
                      preferred_element_type=f32) + bp2_ref[...]
        pol_ref[...] = pol.astype(pol_ref.dtype)                 # (B, 128)

        # value: 512-wide VPU multiply + XLU lane reduction (no wasted MXU work),
        # broadcast across 128 lanes so the store is lane dense.
        v = jnp.sum(hh[:, _HID:] * wv2_ref[...], axis=-1, keepdims=True)
        v = v + bv2_ref[...]                                     # (B, 1)
        val_ref[...] = jnp.broadcast_to(v, (B, _LANE)).astype(val_ref.dtype)

    return kernel


# ----------------------------------------------------------------------------
# conv1 im2col in the wrapper: 4 slices + 1 stack + 1 transpose (reshape trick).
# Patch columns ordered (c, kh, kw) to match PyTorch conv-weight flattening.
# Returns per-image patches (N, OH*OW, C*k*k) with raw pixel values
# (the /256 scaling is folded into the conv1 GEMM weight).
# TODO(synk): build these in-kernel with strided DMA for production shapes.
# ----------------------------------------------------------------------------
def _im2col_conv1(x, k, s):
    N, C, H, W = x.shape
    assert k % s == 0 and H % s == 0 and W % s == 0, (k, s, H, W)
    OH, OW = _out_size(H, k, s), _out_size(W, k, s)
    r = k // s
    xf = x.astype(jnp.float32)
    xr = xf.reshape(N, C, H // s, s, W // s, s)          # h = s*A + bi, w = s*B + bj
    blocks = [xr[:, :, ai:ai + OH, :, aj:aj + OW, :]     # (N, C, OH, s, OW, s)
              for ai in range(r) for aj in range(r)]
    st = jnp.stack(blocks, axis=0).reshape(r, r, N, C, OH, s, OW, s)
    # (ai, aj, n, c, oh, bi, ow, bj) -> (n, oh, ow, c, ai, bi, aj, bj)
    pat = jnp.transpose(st, (2, 4, 6, 3, 0, 5, 1, 7))
    # column index = c*k*k + (s*ai+bi)*k + (s*aj+bj)  ==  (c, kh, kw) order
    return pat.reshape(N, OH * OW, C * k * k)


# ----------------------------------------------------------------------------
# Parameter init: PyTorch-layout params (for the pure-JAX reference) plus the
# batch-INDEPENDENT pre-packed kernel params (transposed / lane-padded to 128 /
# bf16-cast once at init; /256 folded into conv1's weight).
# ----------------------------------------------------------------------------
def init_params(key, input_shape, n_actions):
    C, H, W = input_shape
    (oc1, k1, s1), (oc2, k2, s2), (oc3, k3, s3) = _CONV_CFG
    oh1, ow1 = _out_size(H, k1, s1), _out_size(W, k1, s1)
    oh2, ow2 = _out_size(oh1, k2, s2), _out_size(ow1, k2, s2)
    oh3, ow3 = _out_size(oh2, k3, s3), _out_size(ow2, k3, s3)
    conv_out = oc3 * oh3 * ow3
    # TODO(synk): bake the NCHW-flatten permutation into wh1 for oh3/ow3 > 1.
    assert oh3 == 1 and ow3 == 1, "this packing assumes a 1x1 final conv output"
    assert n_actions <= _LANE

    keys = jax.random.split(key, 14)

    def nrm(k_, shape, scale=0.05):
        return (scale * jax.random.normal(k_, shape)).astype(jnp.float32)

    torch_params = {
        "conv1_w": nrm(keys[0], (oc1, C, k1, k1)),
        "conv1_b": nrm(keys[1], (oc1,)),
        "conv2_w": nrm(keys[2], (oc2, oc1, k2, k2)),
        "conv2_b": nrm(keys[3], (oc2,)),
        "conv3_w": nrm(keys[4], (oc3, oc2, k3, k3)),
        "conv3_b": nrm(keys[5], (oc3,)),
        "pol_w1": nrm(keys[6], (_HID, conv_out)),
        "pol_b1": nrm(keys[7], (_HID,)),
        "pol_w2": nrm(keys[8], (n_actions, _HID)),
        "pol_b2": nrm(keys[9], (n_actions,)),
        "val_w1": nrm(keys[10], (_HID, conv_out)),
        "val_b1": nrm(keys[11], (_HID,)),
        "val_w2": nrm(keys[12], (1, _HID)),
        "val_b2": nrm(keys[13], (1,)),
    }
    tp = torch_params
    f32, bf16 = jnp.float32, jnp.bfloat16
    L = _LANE

    def pad_bias(b):
        return jnp.zeros((1, L), f32).at[0, :b.shape[0]].set(b)

    # conv1 GEMM weight: rows (c, kh, kw), cols padded oc1 -> 128, /256 folded in.
    w1 = jnp.zeros((C * k1 * k1, L), f32)
    w1 = w1.at[:, :oc1].set(tp["conv1_w"].reshape(oc1, -1).T / 256.0)

    # conv2 GEMM weight: rows (kh, kw, c_in[padded to 128]), cols padded oc2 -> 128.
    w2t = jnp.transpose(tp["conv2_w"], (2, 3, 1, 0))            # (k2,k2,oc1,oc2)
    w2 = jnp.zeros((k2, k2, L, L), f32).at[:, :, :oc1, :oc2].set(w2t)
    w2 = w2.reshape(k2 * k2 * L, L)

    # conv3 == FC weight: rows (spatial2=(kh,kw), c_in[padded]), cols padded oc3 -> 128.
    w3t = jnp.transpose(tp["conv3_w"], (2, 3, 1, 0))            # (k3,k3,oc2,oc3)
    w3 = jnp.zeros((k3, k3, L, L), f32).at[:, :, :oc2, :oc3].set(w3t)
    w3 = w3.reshape(k3 * k3 * L, L)

    # fused first head layer: (128, 1024) = [policy 512 | value 512], padded rows zero.
    wh1 = jnp.zeros((L, 2 * _HID), f32)
    wh1 = wh1.at[:conv_out, :_HID].set(tp["pol_w1"].T)
    wh1 = wh1.at[:conv_out, _HID:].set(tp["val_w1"].T)
    bh1 = jnp.concatenate([tp["pol_b1"], tp["val_b1"]]).reshape(1, -1)

    # policy second layer: K=512, 128-lane-dense output (cols >= n_actions are zero).
    wp2 = jnp.zeros((_HID, L), f32).at[:, :n_actions].set(tp["pol_w2"].T)
    bp2 = jnp.zeros((1, L), f32).at[0, :n_actions].set(tp["pol_b2"])

    kernel_params = {
        "w1": w1.astype(bf16), "b1": pad_bias(tp["conv1_b"]),
        "w2": w2.astype(bf16), "b2": pad_bias(tp["conv2_b"]),
        "w3": w3.astype(bf16), "b3": pad_bias(tp["conv3_b"]),
        "wh1": wh1.astype(bf16), "bh1": bh1.astype(f32),
        "wp2": wp2.astype(bf16), "bp2": bp2,
        "wv2": tp["val_w2"].astype(f32),                 # (1, 512) for VPU value head
        "bv2": tp["val_b2"].reshape(1, 1).astype(f32),
    }
    return torch_params, kernel_params


# ----------------------------------------------------------------------------
# Forward pass (matches AtariA2C.forward).
# ----------------------------------------------------------------------------
def atari_a2c_forward(kernel_params, x, *, n_actions, b_tile=None):
    """x: (N, 4, H, W) uint8.  Returns (policy_logits (N, n_actions), value (N, 1))."""
    N, C, H, W = x.shape
    (_, k1, s1), (_, k2, s2), _ = _CONV_CFG
    oh1, ow1 = _out_size(H, k1, s1), _out_size(W, k1, s1)
    oh2, ow2 = _out_size(oh1, k2, s2), _out_size(ow1, k2, s2)
    S1, K1 = oh1 * ow1, C * k1 * k1

    if b_tile is None:
        b_tile = 8 if N % 8 == 0 else N
    assert N % b_tile == 0, (N, b_tile)
    assert b_tile == N or b_tile % 8 == 0, "batch tile must be 8-aligned"
    num_tiles = N // b_tile

    # Per-image im2col, then regroup rows to (tile, spatial, image) so every
    # conv2 window in the kernel is a contiguous, aligned row slice.  The patch
    # DMA is pipelined against compute by the batch-tile grid below.
    patches = _im2col_conv1(x, k1, s1)                              # (N, S1, K1)
    patches = (patches.reshape(num_tiles, b_tile, S1, K1)
               .transpose(0, 2, 1, 3)                               # (T, S1, b, K1)
               .reshape(num_tiles, S1 * b_tile, K1)
               .astype(jnp.bfloat16))

    kp = kernel_params
    weights = (kp["w1"], kp["b1"], kp["w2"], kp["b2"], kp["w3"], kp["b3"],
               kp["wh1"], kp["bh1"], kp["wp2"], kp["bp2"], kp["wv2"], kp["bv2"])

    geo = dict(oh1=oh1, ow1=ow1, oh2=oh2, ow2=ow2, k2=k2, s2=s2)
    kernel = _make_kernel(geo, b_tile)

    def full_spec(a):
        zeros = (0,) * a.ndim
        return pl.BlockSpec(a.shape, lambda i, z=zeros: z)

    in_specs = [pl.BlockSpec((None, S1 * b_tile, K1), lambda i: (i, 0, 0))]
    in_specs += [full_spec(w) for w in weights]
    out_specs = (pl.BlockSpec((b_tile, _LANE), lambda i: (i, 0)),
                 pl.BlockSpec((b_tile, _LANE), lambda i: (i, 0)))
    out_shape = (jax.ShapeDtypeStruct((N, _LANE), jnp.float32),
                 jax.ShapeDtypeStruct((N, _LANE), jnp.float32))

    pol, val = pl.pallas_call(
        kernel,
        grid=(num_tiles,),
        in_specs=in_specs,
        out_specs=out_specs,
        out_shape=out_shape,
        compiler_params=pltpu.CompilerParams(
            dimension_semantics=("parallel",)),   # shards tiles across v7x's 2 TCs
    )(patches, *weights)

    return pol[:, :n_actions], val[:, :1]


# ----------------------------------------------------------------------------
# Pure-JAX reference (PyTorch-layout params) for correctness checking.
# ----------------------------------------------------------------------------
def reference_forward(tp, x):
    fx = x.astype(jnp.float32) / 256.0

    def conv_relu(h, w, b, stride):
        out = lax.conv_general_dilated(
            h, w, window_strides=(stride, stride), padding="VALID",
            dimension_numbers=("NCHW", "OIHW", "NCHW"))
        return jax.nn.relu(out + b[None, :, None, None])

    h = conv_relu(fx, tp["conv1_w"], tp["conv1_b"], _CONV_CFG[0][2])
    h = conv_relu(h, tp["conv2_w"], tp["conv2_b"], _CONV_CFG[1][2])
    h = conv_relu(h, tp["conv3_w"], tp["conv3_b"], _CONV_CFG[2][2])
    flat = h.reshape(h.shape[0], -1)
    ph = jax.nn.relu(flat @ tp["pol_w1"].T + tp["pol_b1"])
    policy = ph @ tp["pol_w2"].T + tp["pol_b2"]
    vh = jax.nn.relu(flat @ tp["val_w1"].T + tp["val_b1"])
    value = vh @ tp["val_w2"].T + tp["val_b2"]
    return policy, value


if __name__ == "__main__":
    # Small shapes consistent with the module: 4 stacked frames, 36x36 spatial
    # -> conv stack yields 64*1*1 = 64 features.  batch=16 gives two batch
    # tiles so the grid / parallel-semantics path is exercised.
    batch = 16
    input_shape = (4, 36, 36)
    n_actions = 6

    key = jax.random.PRNGKey(0)
    pkey, xkey = jax.random.split(key)
    torch_params, kernel_params = init_params(pkey, input_shape, n_actions)

    x = jax.random.randint(xkey, (batch,) + input_shape, 0, 256, dtype=jnp.int32)
    x = x.astype(jnp.uint8)

    fwd = jax.jit(functools.partial(atari_a2c_forward, n_actions=n_actions))
    policy, value = fwd(kernel_params, x)
    policy = jax.block_until_ready(policy)
    value = jax.block_until_ready(value)

    assert policy.shape == (batch, n_actions), policy.shape
    assert value.shape == (batch, 1), value.shape
    assert np.all(np.isfinite(np.asarray(policy)))
    assert np.all(np.isfinite(np.asarray(value)))

    # numerical sanity check vs. pure-JAX f32 reference (bf16 MXU operands in
    # the kernel -> expect percent-level agreement, not bit-exactness).
    ref_policy, ref_value = reference_forward(torch_params, x)
    np.testing.assert_allclose(np.asarray(policy), np.asarray(ref_policy),
                               rtol=5e-2, atol=5e-2)
    np.testing.assert_allclose(np.asarray(value), np.asarray(ref_value),
                               rtol=5e-2, atol=5e-2)

    print("KERNEL_OK")
</pallas_src>

<mosaic_0001>
module attributes {stable_mosaic.version = 11 : i64} {
  func.func @kernel(%arg0: i32, %arg1: memref<1x512x256xbf16, #tpu.memory_space<vmem>>, %arg2: memref<256x128xbf16, #tpu.memory_space<vmem>>, %arg3: memref<1x128xf32, #tpu.memory_space<vmem>>, %arg4: memref<2048x128xbf16, #tpu.memory_space<vmem>>, %arg5: memref<1x128xf32, #tpu.memory_space<vmem>>, %arg6: memref<1152x128xbf16, #tpu.memory_space<vmem>>, %arg7: memref<1x128xf32, #tpu.memory_space<vmem>>, %arg8: memref<128x1024xbf16, #tpu.memory_space<vmem>>, %arg9: memref<1x1024xf32, #tpu.memory_space<vmem>>, %arg10: memref<512x128xbf16, #tpu.memory_space<vmem>>, %arg11: memref<1x128xf32, #tpu.memory_space<vmem>>, %arg12: memref<1x512xf32, #tpu.memory_space<vmem>>, %arg13: memref<1x1xf32, #tpu.memory_space<vmem>>, %arg14: memref<8x128xf32, #tpu.memory_space<vmem>>, %arg15: memref<8x128xf32, #tpu.memory_space<vmem>>) attributes {dimension_semantics = [#tpu.dimension_semantics<parallel>], iteration_bounds = array<i64: 2>, scalar_prefetch = 0 : i64, scratch_operands = 0 : i64, tpu.core_type = #tpu.core_type<tc>, window_params = [{transform_indices = @transform_0, window_bounds = array<i64: 1, 512, 256>}, {pipeline_mode = #tpu.pipeline_mode<synchronous>, transform_indices = @transform_1, window_bounds = array<i64: 256, 128>}, {pipeline_mode = #tpu.pipeline_mode<synchronous>, transform_indices = @transform_2, window_bounds = array<i64: 1, 128>}, {pipeline_mode = #tpu.pipeline_mode<synchronous>, transform_indices = @transform_3, window_bounds = array<i64: 2048, 128>}, {pipeline_mode = #tpu.pipeline_mode<synchronous>, transform_indices = @transform_4, window_bounds = array<i64: 1, 128>}, {pipeline_mode = #tpu.pipeline_mode<synchronous>, transform_indices = @transform_5, window_bounds = array<i64: 1152, 128>}, {pipeline_mode = #tpu.pipeline_mode<synchronous>, transform_indices = @transform_6, window_bounds = array<i64: 1, 128>}, {pipeline_mode = #tpu.pipeline_mode<synchronous>, transform_indices = @transform_7, window_bounds = array<i64: 128, 1024>}, {pipeline_mode = #tpu.pipeline_mode<synchronous>, transform_indices = @transform_8, window_bounds = array<i64: 1, 1024>}, {pipeline_mode = #tpu.pipeline_mode<synchronous>, transform_indices = @transform_9, window_bounds = array<i64: 512, 128>}, {pipeline_mode = #tpu.pipeline_mode<synchronous>, transform_indices = @transform_10, window_bounds = array<i64: 1, 128>}, {pipeline_mode = #tpu.pipeline_mode<synchronous>, transform_indices = @transform_11, window_bounds = array<i64: 1, 512>}, {pipeline_mode = #tpu.pipeline_mode<synchronous>, transform_indices = @transform_12, window_bounds = array<i64: 1, 1>}, {transform_indices = @transform_13, window_bounds = array<i64: 8, 128>}, {transform_indices = @transform_14, window_bounds = array<i64: 8, 128>}]} {
    %c0 = arith.constant 0 : index
    %c0_0 = arith.constant 0 : index
    %c0_1 = arith.constant 0 : index
    %0 = vector.load %arg1[%c0, %c0_0, %c0_1] : memref<1x512x256xbf16, #tpu.memory_space<vmem>>, vector<1x512x256xbf16>
    %1 = vector.shape_cast %0 : vector<1x512x256xbf16> to vector<512x256xbf16>
    %c0_2 = arith.constant 0 : index
    %c0_3 = arith.constant 0 : index
    %2 = vector.load %arg2[%c0_2, %c0_3] : memref<256x128xbf16, #tpu.memory_space<vmem>>, vector<256x128xbf16>
    %cst = arith.constant dense<0.000000e+00> : vector<512x128xf32>
    %3 = tpu.matmul %1, %2, %cst {dimension_numbers = #tpu.dot_dimension_numbers<[1], [0], [0], [1], [0, 0, 1, 1], [], []>} : vector<512x256xbf16>, vector<256x128xbf16>, vector<512x128xf32> -> vector<512x128xf32>
    %c0_4 = arith.constant 0 : index
    %c0_5 = arith.constant 0 : index
    %4 = vector.load %arg3[%c0_4, %c0_5] : memref<1x128xf32, #tpu.memory_space<vmem>>, vector<1x128xf32>
    %5 = vector.broadcast %4 : vector<1x128xf32> to vector<512x128xf32>
    %6 = arith.addf %3, %5 : vector<512x128xf32>
    %cst_6 = arith.constant 0.000000e+00 : f32
    %7 = vector.broadcast %cst_6 : f32 to vector<512x128xf32>
    %8 = arith.maximumf %6, %7 : vector<512x128xf32>
    %9 = vector.extract_strided_slice %8 {offsets = [0, 0], sizes = [8, 128], strides = [1, 1]} : vector<512x128xf32> to vector<8x128xf32>
    %10 = vector.extract_strided_slice %8 {offsets = [8, 0], sizes = [8, 128], strides = [1, 1]} : vector<512x128xf32> to vector<8x128xf32>
    %11 = vector.extract_strided_slice %8 {offsets = [16, 0], sizes = [8, 128], strides = [1, 1]} : vector<512x128xf32> to vector<8x128xf32>
    %12 = vector.extract_strided_slice %8 {offsets = [24, 0], sizes = [8, 128], strides = [1, 1]} : vector<512x128xf32> to vector<8x128xf32>
    %13 = vector.extract_strided_slice %8 {offsets = [64, 0], sizes = [8, 128], strides = [1, 1]} : vector<512x128xf32> to vector<8x128xf32>
    %14 = vector.extract_strided_slice %8 {offsets = [72, 0], sizes = [8, 128], strides = [1, 1]} : vector<512x128xf32> to vector<8x128xf32>
    %15 = vector.extract_strided_slice %8 {offsets = [80, 0], sizes = [8, 128], strides = [1, 1]} : vector<512x128xf32> to vector<8x128xf32>
    %16 = vector.extract_strided_slice %8 {offsets = [88, 0], sizes = [8, 128], strides = [1, 1]} : vector<512x128xf32> to vector<8x128xf32>
    %17 = vector.extract_strided_slice %8 {offsets = [128, 0], sizes = [8, 128], strides = [1, 1]} : vector<512x128xf32> to vector<8x128xf32>
    %18 = vector.extract_strided_slice %8 {offsets = [136, 0], sizes = [8, 128], strides = [1, 1]} : vector<512x128xf32> to vector<8x128xf32>
    %19 = vector.extract_strided_slice %8 {offsets = [144, 0], sizes = [8, 128], strides = [1, 1]} : vector<512x128xf32> to vector<8x128xf32>
    %20 = vector.extract_strided_slice %8 {offsets = [152, 0], sizes = [8, 128], strides = [1, 1]} : vector<512x128xf32> to vector<8x128xf32>
    %21 = vector.extract_strided_slice %8 {offsets = [192, 0], sizes = [8, 128], strides = [1, 1]} : vector<512x128xf32> to vector<8x128xf32>
    %22 = vector.extract_strided_slice %8 {offsets = [200, 0], sizes = [8, 128], strides = [1, 1]} : vector<512x128xf32> to vector<8x128xf32>
    %23 = vector.extract_strided_slice %8 {offsets = [208, 0], sizes = [8, 128], strides = [1, 1]} : vector<512x128xf32> to vector<8x128xf32>
    %24 = vector.extract_strided_slice %8 {offsets = [216, 0], sizes = [8, 128], strides = [1, 1]} : vector<512x128xf32> to vector<8x128xf32>
    %25 = tpu.concatenate %9, %10, %11, %12, %13, %14, %15, %16, %17, %18, %19, %20, %21, %22, %23, %24 in 1 : vector<8x128xf32>, vector<8x128xf32>, vector<8x128xf32>, vector<8x128xf32>, vector<8x128xf32>, vector<8x128xf32>, vector<8x128xf32>, vector<8x128xf32>, vector<8x128xf32>, vector<8x128xf32>, vector<8x128xf32>, vector<8x128xf32>, vector<8x128xf32>, vector<8x128xf32>, vector<8x128xf32>, vector<8x128xf32> -> vector<8x2048xf32>
    %26 = vector.extract_strided_slice %8 {offsets = [16, 0], sizes = [8, 128], strides = [1, 1]} : vector<512x128xf32> to vector<8x128xf32>
    %27 = vector.extract_strided_slice %8 {offsets = [24, 0], sizes = [8, 128], strides = [1, 1]} : vector<512x128xf32> to vector<8x128xf32>
    %28 = vector.extract_strided_slice %8 {offsets = [32, 0], sizes = [8, 128], strides = [1, 1]} : vector<512x128xf32> to vector<8x128xf32>
    %29 = vector.extract_strided_slice %8 {offsets = [40, 0], sizes = [8, 128], strides = [1, 1]} : vector<512x128xf32> to vector<8x128xf32>
    %30 = vector.extract_strided_slice %8 {offsets = [80, 0], sizes = [8, 128], strides = [1, 1]} : vector<512x128xf32> to vector<8x128xf32>
    %31 = vector.extract_strided_slice %8 {offsets = [88, 0], sizes = [8, 128], strides = [1, 1]} : vector<512x128xf32> to vector<8x128xf32>
    %32 = vector.extract_strided_slice %8 {offsets = [96, 0], sizes = [8, 128], strides = [1, 1]} : vector<512x128xf32> to vector<8x128xf32>
    %33 = vector.extract_strided_slice %8 {offsets = [104, 0], sizes = [8, 128], strides = [1, 1]} : vector<512x128xf32> to vector<8x128xf32>
    %34 = vector.extract_strided_slice %8 {offsets = [144, 0], sizes = [8, 128], strides = [1, 1]} : vector<512x128xf32> to vector<8x128xf32>
    %35 = vector.extract_strided_slice %8 {offsets = [152, 0], sizes = [8, 128], strides = [1, 1]} : vector<512x128xf32> to vector<8x128xf32>
    %36 = vector.extract_strided_slice %8 {offsets = [160, 0], sizes = [8, 128], strides = [1, 1]} : vector<512x128xf32> to vector<8x128xf32>
    %37 = vector.extract_strided_slice %8 {offsets = [168, 0], sizes = [8, 128], strides = [1, 1]} : vector<512x128xf32> to vector<8x128xf32>
    %38 = vector.extract_strided_slice %8 {offsets = [208, 0], sizes = [8, 128], strides = [1, 1]} : vector<512x128xf32> to vector<8x128xf32>
    %39 = vector.extract_strided_slice %8 {offsets = [216, 0], sizes = [8, 128], strides = [1, 1]} : vector<512x128xf32> to vector<8x128xf32>
    %40 = vector.extract_strided_slice %8 {offsets = [224, 0], sizes = [8, 128], strides = [1, 1]} : vector<512x128xf32> to vector<8x128xf32>
    %41 = vector.extract_strided_slice %8 {offsets = [232, 0], sizes = [8, 128], strides = [1, 1]} : vector<512x128xf32> to vector<8x128xf32>
    %42 = tpu.concatenate %26, %27, %28, %29, %30, %31, %32, %33, %34, %35, %36, %37, %38, %39, %40, %41 in 1 : vector<8x128xf32>, vector<8x128xf32>, vector<8x128xf32>, vector<8x128xf32>, vector<8x128xf32>, vector<8x128xf32>, vector<8x128xf32>, vector<8x128xf32>, vector<8x128xf32>, vector<8x128xf32>, vector<8x128xf32>, vector<8x128xf32>, vector<8x128xf32>, vector<8x128xf32>, vector<8x128xf32>, vector<8x128xf32> -> vector<8x2048xf32>
    %43 = vector.extract_strided_slice %8 {offsets = [32, 0], sizes = [8, 128], strides = [1, 1]} : vector<512x128xf32> to vector<8x128xf32>
    %44 = vector.extract_strided_slice %8 {offsets = [40, 0], sizes = [8, 128], strides = [1, 1]} : vector<512x128xf32> to vector<8x128xf32>
    %45 = vector.extract_strided_slice %8 {offsets = [48, 0], sizes = [8, 128], strides = [1, 1]} : vector<512x128xf32> to vector<8x128xf32>
    %46 = vector.extract_strided_slice %8 {offsets = [56, 0], sizes = [8, 128], strides = [1, 1]} : vector<512x128xf32> to vector<8x128xf32>
    %47 = vector.extract_strided_slice %8 {offsets = [96, 0], sizes = [8, 128], strides = [1, 1]} : vector<512x128xf32> to vector<8x128xf32>
    %48 = vector.extract_strided_slice %8 {offsets = [104, 0], sizes = [8, 128], strides = [1, 1]} : vector<512x128xf32> to vector<8x128xf32>
    %49 = vector.extract_strided_slice %8 {offsets = [112, 0], sizes = [8, 128], strides = [1, 1]} : vector<512x128xf32> to vector<8x128xf32>
    %50 = vector.extract_strided_slice %8 {offsets = [120, 0], sizes = [8, 128], strides = [1, 1]} : vector<512x128xf32> to vector<8x128xf32>
    %51 = vector.extract_strided_slice %8 {offsets = [160, 0], sizes = [8, 128], strides = [1, 1]} : vector<512x128xf32> to vector<8x128xf32>
    %52 = vector.extract_strided_slice %8 {offsets = [168, 0], sizes = [8, 128], strides = [1, 1]} : vector<512x128xf32> to vector<8x128xf32>
    %53 = vector.extract_strided_slice %8 {offsets = [176, 0], sizes = [8, 128], strides = [1, 1]} : vector<512x128xf32> to vector<8x128xf32>
    %54 = vector.extract_strided_slice %8 {offsets = [184, 0], sizes = [8, 128], strides = [1, 1]} : vector<512x128xf32> to vector<8x128xf32>
    %55 = vector.extract_strided_slice %8 {offsets = [224, 0], sizes = [8, 128], strides = [1, 1]} : vector<512x128xf32> to vector<8x128xf32>
    %56 = vector.extract_strided_slice %8 {offsets = [232, 0], sizes = [8, 128], strides = [1, 1]} : vector<512x128xf32> to vector<8x128xf32>
    %57 = vector.extract_strided_slice %8 {offsets = [240, 0], sizes = [8, 128], strides = [1, 1]} : vector<512x128xf32> to vector<8x128xf32>
    %58 = vector.extract_strided_slice %8 {offsets = [248, 0], sizes = [8, 128], strides = [1, 1]} : vector<512x128xf32> to vector<8x128xf32>
    %59 = tpu.concatenate %43, %44, %45, %46, %47, %48, %49, %50, %51, %52, %53, %54, %55, %56, %57, %58 in 1 : vector<8x128xf32>, vector<8x128xf32>, vector<8x128xf32>, vector<8x128xf32>, vector<8x128xf32>, vector<8x128xf32>, vector<8x128xf32>, vector<8x128xf32>, vector<8x128xf32>, vector<8x128xf32>, vector<8x128xf32>, vector<8x128xf32>, vector<8x128xf32>, vector<8x128xf32>, vector<8x128xf32>, vector<8x128xf32> -> vector<8x2048xf32>
    %60 = vector.extract_strided_slice %8 {offsets = [128, 0], sizes = [8, 128], strides = [1, 1]} : vector<512x128xf32> to vector<8x128xf32>
    %61 = vector.extract_strided_slice %8 {offsets = [136, 0], sizes = [8, 128], strides = [1, 1]} : vector<512x128xf32> to vector<8x128xf32>
    %62 = vector.extract_strided_slice %8 {offsets = [144, 0], sizes = [8, 128], strides = [1, 1]} : vector<512x128xf32> to vector<8x128xf32>
    %63 = vector.extract_strided_slice %8 {offsets = [152, 0], sizes = [8, 128], strides = [1, 1]} : vector<512x128xf32> to vector<8x128xf32>
    %64 = vector.extract_strided_slice %8 {offsets = [192, 0], sizes = [8, 128], strides = [1, 1]} : vector<512x128xf32> to vector<8x128xf32>
    %65 = vector.extract_strided_slice %8 {offsets = [200, 0], sizes = [8, 128], strides = [1, 1]} : vector<512x128xf32> to vector<8x128xf32>
    %66 = vector.extract_strided_slice %8 {offsets = [208, 0], sizes = [8, 128], strides = [1, 1]} : vector<512x128xf32> to vector<8x128xf32>
    %67 = vector.extract_strided_slice %8 {offsets = [216, 0], sizes = [8, 128], strides = [1, 1]} : vector<512x128xf32> to vector<8x128xf32>
    %68 = vector.extract_strided_slice %8 {offsets = [256, 0], sizes = [8, 128], strides = [1, 1]} : vector<512x128xf32> to vector<8x128xf32>
    %69 = vector.extract_strided_slice %8 {offsets = [264, 0], sizes = [8, 128], strides = [1, 1]} : vector<512x128xf32> to vector<8x128xf32>
    %70 = vector.extract_strided_slice %8 {offsets = [272, 0], sizes = [8, 128], strides = [1, 1]} : vector<512x128xf32> to vector<8x128xf32>
    %71 = vector.extract_strided_slice %8 {offsets = [280, 0], sizes = [8, 128], strides = [1, 1]} : vector<512x128xf32> to vector<8x128xf32>
    %72 = vector.extract_strided_slice %8 {offsets = [320, 0], sizes = [8, 128], strides = [1, 1]} : vector<512x128xf32> to vector<8x128xf32>
    %73 = vector.extract_strided_slice %8 {offsets = [328, 0], sizes = [8, 128], strides = [1, 1]} : vector<512x128xf32> to vector<8x128xf32>
    %74 = vector.extract_strided_slice %8 {offsets = [336, 0], sizes = [8, 128], strides = [1, 1]} : vector<512x128xf32> to vector<8x128xf32>
    %75 = vector.extract_strided_slice %8 {offsets = [344, 0], sizes = [8, 128], strides = [1, 1]} : vector<512x128xf32> to vector<8x128xf32>
    %76 = tpu.concatenate %60, %61, %62, %63, %64, %65, %66, %67, %68, %69, %70, %71, %72, %73, %74, %75 in 1 : vector<8x128xf32>, vector<8x128xf32>, vector<8x128xf32>, vector<8x128xf32>, vector<8x128xf32>, vector<8x128xf32>, vector<8x128xf32>, vector<8x128xf32>, vector<8x128xf32>, vector<8x128xf32>, vector<8x128xf32>, vector<8x128xf32>, vector<8x128xf32>, vector<8x128xf32>, vector<8x128xf32>, vector<8x128xf32> -> vector<8x2048xf32>
    %77 = vector.extract_strided_slice %8 {offsets = [144, 0], sizes = [8, 128], strides = [1, 1]} : vector<512x128xf32> to vector<8x128xf32>
    %78 = vector.extract_strided_slice %8 {offsets = [152, 0], sizes = [8, 128], strides = [1, 1]} : vector<512x128xf32> to vector<8x128xf32>
    %79 = vector.extract_strided_slice %8 {offsets = [160, 0], sizes = [8, 128], strides = [1, 1]} : vector<512x128xf32> to vector<8x128xf32>
    %80 = vector.extract_strided_slice %8 {offsets = [168, 0], sizes = [8, 128], strides = [1, 1]} : vector<512x128xf32> to vector<8x128xf32>
    %81 = vector.extract_strided_slice %8 {offsets = [208, 0], sizes = [8, 128], strides = [1, 1]} : vector<512x128xf32> to vector<8x128xf32>
    %82 = vector.extract_strided_slice %8 {offsets = [216, 0], sizes = [8, 128], strides = [1, 1]} : vector<512x128xf32> to vector<8x128xf32>
    %83 = vector.extract_strided_slice %8 {offsets = [224, 0], sizes = [8, 128], strides = [1, 1]} : vector<512x128xf32> to vector<8x128xf32>
    %84 = vector.extract_strided_slice %8 {offsets = [232, 0], sizes = [8, 128], strides = [1, 1]} : vector<512x128xf32> to vector<8x128xf32>
    %85 = vector.extract_strided_slice %8 {offsets = [272, 0], sizes = [8, 128], strides = [1, 1]} : vector<512x128xf32> to vector<8x128xf32>
    %86 = vector.extract_strided_slice %8 {offsets = [280, 0], sizes = [8, 128], strides = [1, 1]} : vector<512x128xf32> to vector<8x128xf32>
    %87 = vector.extract_strided_slice %8 {offsets = [288, 0], sizes = [8, 128], strides = [1, 1]} : vector<512x128xf32> to vector<8x128xf32>
    %88 = vector.extract_strided_slice %8 {offsets = [296, 0], sizes = [8, 128], strides = [1, 1]} : vector<512x128xf32> to vector<8x128xf32>
    %89 = vector.extract_strided_slice %8 {offsets = [336, 0], sizes = [8, 128], strides = [1, 1]} : vector<512x128xf32> to vector<8x128xf32>
    %90 = vector.extract_strided_slice %8 {offsets = [344, 0], sizes = [8, 128], strides = [1, 1]} : vector<512x128xf32> to vector<8x128xf32>
    %91 = vector.extract_strided_slice %8 {offsets = [352, 0], sizes = [8, 128], strides = [1, 1]} : vector<512x128xf32> to vector<8x128xf32>
    %92 = vector.extract_strided_slice %8 {offsets = [360, 0], sizes = [8, 128], strides = [1, 1]} : vector<512x128xf32> to vector<8x128xf32>
    %93 = tpu.concatenate %77, %78, %79, %80, %81, %82, %83, %84, %85, %86, %87, %88, %89, %90, %91, %92 in 1 : vector<8x128xf32>, vector<8x128xf32>, vector<8x128xf32>, vector<8x128xf32>, vector<8x128xf32>, vector<8x128xf32>, vector<8x128xf32>, vector<8x128xf32>, vector<8x128xf32>, vector<8x128xf32>, vector<8x128xf32>, vector<8x128xf32>, vector<8x128xf32>, vector<8x128xf32>, vector<8x128xf32>, vector<8x128xf32> -> vector<8x2048xf32>
    %94 = vector.extract_strided_slice %8 {offsets = [160, 0], sizes = [8, 128], strides = [1, 1]} : vector<512x128xf32> to vector<8x128xf32>
    %95 = vector.extract_strided_slice %8 {offsets = [168, 0], sizes = [8, 128], strides = [1, 1]} : vector<512x128xf32> to vector<8x128xf32>
    %96 = vector.extract_strided_slice %8 {offsets = [176, 0], sizes = [8, 128], strides = [1, 1]} : vector<512x128xf32> to vector<8x128xf32>
    %97 = vector.extract_strided_slice %8 {offsets = [184, 0], sizes = [8, 128], strides = [1, 1]} : vector<512x128xf32> to vector<8x128xf32>
    %98 = vector.extract_strided_slice %8 {offsets = [224, 0], sizes = [8, 128], strides = [1, 1]} : vector<512x128xf32> to vector<8x128xf32>
    %99 = vector.extract_strided_slice %8 {offsets = [232, 0], sizes = [8, 128], strides = [1, 1]} : vector<512x128xf32> to vector<8x128xf32>
    %100 = vector.extract_strided_slice %8 {offsets = [240, 0], sizes = [8, 128], strides = [1, 1]} : vector<512x128xf32> to vector<8x128xf32>
    %101 = vector.extract_strided_slice %8 {offsets = [248, 0], sizes = [8, 128], strides = [1, 1]} : vector<512x128xf32> to vector<8x128xf32>
    %102 = vector.extract_strided_slice %8 {offsets = [288, 0], sizes = [8, 128], strides = [1, 1]} : vector<512x128xf32> to vector<8x128xf32>
    %103 = vector.extract_strided_slice %8 {offsets = [296, 0], sizes = [8, 128], strides = [1, 1]} : vector<512x128xf32> to vector<8x128xf32>
    %104 = vector.extract_strided_slice %8 {offsets = [304, 0], sizes = [8, 128], strides = [1, 1]} : vector<512x128xf32> to vector<8x128xf32>
    %105 = vector.extract_strided_slice %8 {offsets = [312, 0], sizes = [8, 128], strides = [1, 1]} : vector<512x128xf32> to vector<8x128xf32>
    %106 = vector.extract_strided_slice %8 {offsets = [352, 0], sizes = [8, 128], strides = [1, 1]} : vector<512x128xf32> to vector<8x128xf32>
    %107 = vector.extract_strided_slice %8 {offsets = [360, 0], sizes = [8, 128], strides = [1, 1]} : vector<512x128xf32> to vector<8x128xf32>
    %108 = vector.extract_strided_slice %8 {offsets = [368, 0], sizes = [8, 128], strides = [1, 1]} : vector<512x128xf32> to vector<8x128xf32>
    %109 = vector.extract_strided_slice %8 {offsets = [376, 0], sizes = [8, 128], strides = [1, 1]} : vector<512x128xf32> to vector<8x128xf32>
    %110 = tpu.concatenate %94, %95, %96, %97, %98, %99, %100, %101, %102, %103, %104, %105, %106, %107, %108, %109 in 1 : vector<8x128xf32>, vector<8x128xf32>, vector<8x128xf32>, vector<8x128xf32>, vector<8x128xf32>, vector<8x128xf32>, vector<8x128xf32>, vector<8x128xf32>, vector<8x128xf32>, vector<8x128xf32>, vector<8x128xf32>, vector<8x128xf32>, vector<8x128xf32>, vector<8x128xf32>, vector<8x128xf32>, vector<8x128xf32> -> vector<8x2048xf32>
    %111 = vector.extract_strided_slice %8 {offsets = [256, 0], sizes = [8, 128], strides = [1, 1]} : vector<512x128xf32> to vector<8x128xf32>
    %112 = vector.extract_strided_slice %8 {offsets = [264, 0], sizes = [8, 128], strides = [1, 1]} : vector<512x128xf32> to vector<8x128xf32>
    %113 = vector.extract_strided_slice %8 {offsets = [272, 0], sizes = [8, 128], strides = [1, 1]} : vector<512x128xf32> to vector<8x128xf32>
    %114 = vector.extract_strided_slice %8 {offsets = [280, 0], sizes = [8, 128], strides = [1, 1]} : vector<512x128xf32> to vector<8x128xf32>
    %115 = vector.extract_strided_slice %8 {offsets = [320, 0], sizes = [8, 128], strides = [1, 1]} : vector<512x128xf32> to vector<8x128xf32>
    %116 = vector.extract_strided_slice %8 {offsets = [328, 0], sizes = [8, 128], strides = [1, 1]} : vector<512x128xf32> to vector<8x128xf32>
    %117 = vector.extract_strided_slice %8 {offsets = [336, 0], sizes = [8, 128], strides = [1, 1]} : vector<512x128xf32> to vector<8x128xf32>
    %118 = vector.extract_strided_slice %8 {offsets = [344, 0], sizes = [8, 128], strides = [1, 1]} : vector<512x128xf32> to vector<8x128xf32>
    %119 = vector.extract_strided_slice %8 {offsets = [384, 0], sizes = [8, 128], strides = [1, 1]} : vector<512x128xf32> to vector<8x128xf32>
    %120 = vector.extract_strided_slice %8 {offsets = [392, 0], sizes = [8, 128], strides = [1, 1]} : vector<512x128xf32> to vector<8x128xf32>
    %121 = vector.extract_strided_slice %8 {offsets = [400, 0], sizes = [8, 128], strides = [1, 1]} : vector<512x128xf32> to vector<8x128xf32>
    %122 = vector.extract_strided_slice %8 {offsets = [408, 0], sizes = [8, 128], strides = [1, 1]} : vector<512x128xf32> to vector<8x128xf32>
    %123 = vector.extract_strided_slice %8 {offsets = [448, 0], sizes = [8, 128], strides = [1, 1]} : vector<512x128xf32> to vector<8x128xf32>
    %124 = vector.extract_strided_slice %8 {offsets = [456, 0], sizes = [8, 128], strides = [1, 1]} : vector<512x128xf32> to vector<8x128xf32>
    %125 = vector.extract_strided_slice %8 {offsets = [464, 0], sizes = [8, 128], strides = [1, 1]} : vector<512x128xf32> to vector<8x128xf32>
    %126 = vector.extract_strided_slice %8 {offsets = [472, 0], sizes = [8, 128], strides = [1, 1]} : vector<512x128xf32> to vector<8x128xf32>
    %127 = tpu.concatenate %111, %112, %113, %114, %115, %116, %117, %118, %119, %120, %121, %122, %123, %124, %125, %126 in 1 : vector<8x128xf32>, vector<8x128xf32>, vector<8x128xf32>, vector<8x128xf32>, vector<8x128xf32>, vector<8x128xf32>, vector<8x128xf32>, vector<8x128xf32>, vector<8x128xf32>, vector<8x128xf32>, vector<8x128xf32>, vector<8x128xf32>, vector<8x128xf32>, vector<8x128xf32>, vector<8x128xf32>, vector<8x128xf32> -> vector<8x2048xf32>
    %128 = vector.extract_strided_slice %8 {offsets = [272, 0], sizes = [8, 128], strides = [1, 1]} : vector<512x128xf32> to vector<8x128xf32>
    %129 = vector.extract_strided_slice %8 {offsets = [280, 0], sizes = [8, 128], strides = [1, 1]} : vector<512x128xf32> to vector<8x128xf32>
    %130 = vector.extract_strided_slice %8 {offsets = [288, 0], sizes = [8, 128], strides = [1, 1]} : vector<512x128xf32> to vector<8x128xf32>
    %131 = vector.extract_strided_slice %8 {offsets = [296, 0], sizes = [8, 128], strides = [1, 1]} : vector<512x128xf32> to vector<8x128xf32>
    %132 = vector.extract_strided_slice %8 {offsets = [336, 0], sizes = [8, 128], strides = [1, 1]} : vector<512x128xf32> to vector<8x128xf32>
    %133 = vector.extract_strided_slice %8 {offsets = [344, 0], sizes = [8, 128], strides = [1, 1]} : vector<512x128xf32> to vector<8x128xf32>
    %134 = vector.extract_strided_slice %8 {offsets = [352, 0], sizes = [8, 128], strides = [1, 1]} : vector<512x128xf32> to vector<8x128xf32>
    %135 = vector.extract_strided_slice %8 {offsets = [360, 0], sizes = [8, 128], strides = [1, 1]} : vector<512x128xf32> to vector<8x128xf32>
    %136 = vector.extract_strided_slice %8 {offsets = [400, 0], sizes = [8, 128], strides = [1, 1]} : vector<512x128xf32> to vector<8x128xf32>
    %137 = vector.extract_strided_slice %8 {offsets = [408, 0], sizes = [8, 128], strides = [1, 1]} : vector<512x128xf32> to vector<8x128xf32>
    %138 = vector.extract_strided_slice %8 {offsets = [416, 0], sizes = [8, 128], strides = [1, 1]} : vector<512x128xf32> to vector<8x128xf32>
    %139 = vector.extract_strided_slice %8 {offsets = [424, 0], sizes = [8, 128], strides = [1, 1]} : vector<512x128xf32> to vector<8x128xf32>
    %140 = vector.extract_strided_slice %8 {offsets = [464, 0], sizes = [8, 128], strides = [1, 1]} : vector<512x128xf32> to vector<8x128xf32>
    %141 = vector.extract_strided_slice %8 {offsets = [472, 0], sizes = [8, 128], strides = [1, 1]} : vector<512x128xf32> to vector<8x128xf32>
    %142 = vector.extract_strided_slice %8 {offsets = [480, 0], sizes = [8, 128], strides = [1, 1]} : vector<512x128xf32> to vector<8x128xf32>
    %143 = vector.extract_strided_slice %8 {offsets = [488, 0], sizes = [8, 128], strides = [1, 1]} : vector<512x128xf32> to vector<8x128xf32>
    %144 = tpu.concatenate %128, %129, %130, %131, %132, %133, %134, %135, %136, %137, %138, %139, %140, %141, %142, %143 in 1 : vector<8x128xf32>, vector<8x128xf32>, vector<8x128xf32>, vector<8x128xf32>, vector<8x128xf32>, vector<8x128xf32>, vector<8x128xf32>, vector<8x128xf32>, vector<8x128xf32>, vector<8x128xf32>, vector<8x128xf32>, vector<8x128xf32>, vector<8x128xf32>, vector<8x128xf32>, vector<8x128xf32>, vector<8x128xf32> -> vector<8x2048xf32>
    %145 = vector.extract_strided_slice %8 {offsets = [288, 0], sizes = [8, 128], strides = [1, 1]} : vector<512x128xf32> to vector<8x128xf32>
    %146 = vector.extract_strided_slice %8 {offsets = [296, 0], sizes = [8, 128], strides = [1, 1]} : vector<512x128xf32> to vector<8x128xf32>
    %147 = vector.extract_strided_slice %8 {offsets = [304, 0], sizes = [8, 128], strides = [1, 1]} : vector<512x128xf32> to vector<8x128xf32>
    %148 = vector.extract_strided_slice %8 {offsets = [312, 0], sizes = [8, 128], strides = [1, 1]} : vector<512x128xf32> to vector<8x128xf32>
    %149 = vector.extract_strided_slice %8 {offsets = [352, 0], sizes = [8, 128], strides = [1, 1]} : vector<512x128xf32> to vector<8x128xf32>
    %150 = vector.extract_strided_slice %8 {offsets = [360, 0], sizes = [8, 128], strides = [1, 1]} : vector<512x128xf32> to vector<8x128xf32>
    %151 = vector.extract_strided_slice %8 {offsets = [368, 0], sizes = [8, 128], strides = [1, 1]} : vector<512x128xf32> to vector<8x128xf32>
    %152 = vector.extract_strided_slice %8 {offsets = [376, 0], sizes = [8, 128], strides = [1, 1]} : vector<512x128xf32> to vector<8x128xf32>
    %153 = vector.extract_strided_slice %8 {offsets = [416, 0], sizes = [8, 128], strides = [1, 1]} : vector<512x128xf32> to vector<8x128xf32>
    %154 = vector.extract_strided_slice %8 {offsets = [424, 0], sizes = [8, 128], strides = [1, 1]} : vector<512x128xf32> to vector<8x128xf32>
    %155 = vector.extract_strided_slice %8 {offsets = [432, 0], sizes = [8, 128], strides = [1, 1]} : vector<512x128xf32> to vector<8x128xf32>
    %156 = vector.extract_strided_slice %8 {offsets = [440, 0], sizes = [8, 128], strides = [1, 1]} : vector<512x128xf32> to vector<8x128xf32>
    %157 = vector.extract_strided_slice %8 {offsets = [480, 0], sizes = [8, 128], strides = [1, 1]} : vector<512x128xf32> to vector<8x128xf32>
    %158 = vector.extract_strided_slice %8 {offsets = [488, 0], sizes = [8, 128], strides = [1, 1]} : vector<512x128xf32> to vector<8x128xf32>
    %159 = vector.extract_strided_slice %8 {offsets = [496, 0], sizes = [8, 128], strides = [1, 1]} : vector<512x128xf32> to vector<8x128xf32>
    %160 = vector.extract_strided_slice %8 {offsets = [504, 0], sizes = [8, 128], strides = [1, 1]} : vector<512x128xf32> to vector<8x128xf32>
    %161 = tpu.concatenate %145, %146, %147, %148, %149, %150, %151, %152, %153, %154, %155, %156, %157, %158, %159, %160 in 1 : vector<8x128xf32>, vector<8x128xf32>, vector<8x128xf32>, vector<8x128xf32>, vector<8x128xf32>, vector<8x128xf32>, vector<8x128xf32>, vector<8x128xf32>, vector<8x128xf32>, vector<8x128xf32>, vector<8x128xf32>, vector<8x128xf32>, vector<8x128xf32>, vector<8x128xf32>, vector<8x128xf32>, vector<8x128xf32> -> vector<8x2048xf32>
    %162 = tpu.concatenate %25, %42, %59, %76, %93, %110, %127, %144, %161 in 0 : vector<8x2048xf32>, vector<8x2048xf32>, vector<8x2048xf32>, vector<8x2048xf32>, vector<8x2048xf32>, vector<8x2048xf32>, vector<8x2048xf32>, vector<8x2048xf32>, vector<8x2048xf32> -> vector<72x2048xf32>
    %163 = arith.truncf %162 : vector<72x2048xf32> to vector<72x2048xbf16>
    %c0_7 = arith.constant 0 : index
    %c0_8 = arith.constant 0 : index
    %164 = vector.load %arg4[%c0_7, %c0_8] : memref<2048x128xbf16, #tpu.memory_space<vmem>>, vector<2048x128xbf16>
    %cst_9 = arith.constant dense<0.000000e+00> : vector<72x128xf32>
    %165 = tpu.matmul %163, %164, %cst_9 {dimension_numbers = #tpu.dot_dimension_numbers<[1], [0], [0], [1], [0, 0, 1, 1], [], []>} : vector<72x2048xbf16>, vector<2048x128xbf16>, vector<72x128xf32> -> vector<72x128xf32>
    %c0_10 = arith.constant 0 : index
    %c0_11 = arith.constant 0 : index
    %166 = vector.load %arg5[%c0_10, %c0_11] : memref<1x128xf32, #tpu.memory_space<vmem>>, vector<1x128xf32>
    %167 = vector.broadcast %166 : vector<1x128xf32> to vector<72x128xf32>
    %168 = arith.addf %165, %167 : vector<72x128xf32>
    %cst_12 = arith.constant 0.000000e+00 : f32
    %169 = vector.broadcast %cst_12 : f32 to vector<72x128xf32>
    %170 = arith.maximumf %168, %169 : vector<72x128xf32>
    %171 = vector.extract_strided_slice %170 {offsets = [0, 0], sizes = [8, 128], strides = [1, 1]} : vector<72x128xf32> to vector<8x128xf32>
    %172 = vector.extract_strided_slice %170 {offsets = [8, 0], sizes = [8, 128], strides = [1, 1]} : vector<72x128xf32> to vector<8x128xf32>
    %173 = vector.extract_strided_slice %170 {offsets = [16, 0], sizes = [8, 128], strides = [1, 1]} : vector<72x128xf32> to vector<8x128xf32>
    %174 = vector.extract_strided_slice %170 {offsets = [24, 0], sizes = [8, 128], strides = [1, 1]} : vector<72x128xf32> to vector<8x128xf32>
    %175 = vector.extract_strided_slice %170 {offsets = [32, 0], sizes = [8, 128], strides = [1, 1]} : vector<72x128xf32> to vector<8x128xf32>
    %176 = vector.extract_strided_slice %170 {offsets = [40, 0], sizes = [8, 128], strides = [1, 1]} : vector<72x128xf32> to vector<8x128xf32>
    %177 = vector.extract_strided_slice %170 {offsets = [48, 0], sizes = [8, 128], strides = [1, 1]} : vector<72x128xf32> to vector<8x128xf32>
    %178 = vector.extract_strided_slice %170 {offsets = [56, 0], sizes = [8, 128], strides = [1, 1]} : vector<72x128xf32> to vector<8x128xf32>
    %179 = vector.extract_strided_slice %170 {offsets = [64, 0], sizes = [8, 128], strides = [1, 1]} : vector<72x128xf32> to vector<8x128xf32>
    %180 = tpu.concatenate %171, %172, %173, %174, %175, %176, %177, %178, %179 in 1 : vector<8x128xf32>, vector<8x128xf32>, vector<8x128xf32>, vector<8x128xf32>, vector<8x128xf32>, vector<8x128xf32>, vector<8x128xf32>, vector<8x128xf32>, vector<8x128xf32> -> vector<8x1152xf32>
    %181 = arith.truncf %180 : vector<8x1152xf32> to vector<8x1152xbf16>
    %c0_13 = arith.constant 0 : index
    %c0_14 = arith.constant 0 : index
    %182 = vector.load %arg6[%c0_13, %c0_14] : memref<1152x128xbf16, #tpu.memory_space<vmem>>, vector<1152x128xbf16>
    %cst_15 = arith.constant dense<0.000000e+00> : vector<8x128xf32>
    %183 = tpu.matmul %181, %182, %cst_15 {dimension_numbers = #tpu.dot_dimension_numbers<[1], [0], [0], [1], [0, 0, 1, 1], [], []>} : vector<8x1152xbf16>, vector<1152x128xbf16>, vector<8x128xf32> -> vector<8x128xf32>
    %c0_16 = arith.constant 0 : index
    %c0_17 = arith.constant 0 : index
    %184 = vector.load %arg7[%c0_16, %c0_17] : memref<1x128xf32, #tpu.memory_space<vmem>>, vector<1x128xf32>
    %185 = vector.broadcast %184 : vector<1x128xf32> to vector<8x128xf32>
    %186 = arith.addf %183, %185 : vector<8x128xf32>
    %cst_18 = arith.constant 0.000000e+00 : f32
    %187 = vector.broadcast %cst_18 : f32 to vector<8x128xf32>
    %188 = arith.maximumf %186, %187 : vector<8x128xf32>
    %189 = arith.truncf %188 : vector<8x128xf32> to vector<8x128xbf16>
    %c0_19 = arith.constant 0 : index
    %c0_20 = arith.constant 0 : index
    %190 = vector.load %arg8[%c0_19, %c0_20] : memref<128x1024xbf16, #tpu.memory_space<vmem>>, vector<128x1024xbf16>
    %cst_21 = arith.constant dense<0.000000e+00> : vector<8x1024xf32>
    %191 = tpu.matmul %189, %190, %cst_21 {dimension_numbers = #tpu.dot_dimension_numbers<[1], [0], [0], [1], [0, 0, 1, 1], [], []>} : vector<8x128xbf16>, vector<128x1024xbf16>, vector<8x1024xf32> -> vector<8x1024xf32>
    %c0_22 = arith.constant 0 : index
    %c0_23 = arith.constant 0 : index
    %192 = vector.load %arg9[%c0_22, %c0_23] : memref<1x1024xf32, #tpu.memory_space<vmem>>, vector<1x1024xf32>
    %193 = vector.broadcast %192 : vector<1x1024xf32> to vector<8x1024xf32>
    %194 = arith.addf %191, %193 : vector<8x1024xf32>
    %cst_24 = arith.constant 0.000000e+00 : f32
    %195 = vector.broadcast %cst_24 : f32 to vector<8x1024xf32>
    %196 = arith.maximumf %194, %195 : vector<8x1024xf32>
    %197 = vector.extract_strided_slice %196 {offsets = [0, 0], sizes = [8, 512], strides = [1, 1]} : vector<8x1024xf32> to vector<8x512xf32>
    %198 = arith.truncf %197 : vector<8x512xf32> to vector<8x512xbf16>
    %c0_25 = arith.constant 0 : index
    %c0_26 = arith.constant 0 : index
    %199 = vector.load %arg10[%c0_25, %c0_26] : memref<512x128xbf16, #tpu.memory_space<vmem>>, vector<512x128xbf16>
    %cst_27 = arith.constant dense<0.000000e+00> : vector<8x128xf32>
    %200 = tpu.matmul %198, %199, %cst_27 {dimension_numbers = #tpu.dot_dimension_numbers<[1], [0], [0], [1], [0, 0, 1, 1], [], []>} : vector<8x512xbf16>, vector<512x128xbf16>, vector<8x128xf32> -> vector<8x128xf32>
    %c0_28 = arith.constant 0 : index
    %c0_29 = arith.constant 0 : index
    %201 = vector.load %arg11[%c0_28, %c0_29] : memref<1x128xf32, #tpu.memory_space<vmem>>, vector<1x128xf32>
    %202 = vector.broadcast %201 : vector<1x128xf32> to vector<8x128xf32>
    %203 = arith.addf %200, %202 : vector<8x128xf32>
    %c0_30 = arith.constant 0 : index
    %c0_31 = arith.constant 0 : index
    %204 = vector.load %arg14[%c0_30, %c0_31] : memref<8x128xf32, #tpu.memory_space<vmem>>, vector<8x128xf32>
    tpu.vector_store %arg14[%c0_30, %c0_31], %203 {strides = array<i32>} : memref<8x128xf32, #tpu.memory_space<vmem>>, vector<8x128xf32>,
    %205 = vector.extract_strided_slice %196 {offsets = [0, 512], sizes = [8, 512], strides = [1, 1]} : vector<8x1024xf32> to vector<8x512xf32>
    %c0_32 = arith.constant 0 : index
    %c0_33 = arith.constant 0 : index
    %206 = vector.load %arg12[%c0_32, %c0_33] : memref<1x512xf32, #tpu.memory_space<vmem>>, vector<1x512xf32>
    %207 = vector.broadcast %206 : vector<1x512xf32> to vector<8x512xf32>
    %208 = arith.mulf %205, %207 : vector<8x512xf32>
    %cst_34 = arith.constant dense<0.000000e+00> : vector<8xf32>
    %209 = vector.multi_reduction <add>, %208, %cst_34 [1] : vector<8x512xf32> to vector<8xf32>
    %210 = vector.shape_cast %209 : vector<8xf32> to vector<8x1xf32>
    %c0_35 = arith.constant 0 : index
    %c0_36 = arith.constant 0 : index
    %211 = vector.load %arg13[%c0_35, %c0_36] : memref<1x1xf32, #tpu.memory_space<vmem>>, vector<1x1xf32>
    %212 = vector.broadcast %211 : vector<1x1xf32> to vector<8x1xf32>
    %213 = arith.addf %210, %212 : vector<8x1xf32>
    %214 = vector.shape_cast %213 : vector<8x1xf32> to vector<8x1xf32>
    %215 = vector.broadcast %214 : vector<8x1xf32> to vector<8x128xf32>
    %c0_37 = arith.constant 0 : index
    %c0_38 = arith.constant 0 : index
    %216 = vector.load %arg15[%c0_37, %c0_38] : memref<8x128xf32, #tpu.memory_space<vmem>>, vector<8x128xf32>
    tpu.vector_store %arg15[%c0_37, %c0_38], %215 {strides = array<i32>} : memref<8x128xf32, #tpu.memory_space<vmem>>, vector<8x128xf32>,
    return
  }
  func.func @transform_0(%arg0: i32) -> (i32, i32, i32) {
    %c0_i32 = arith.constant 0 : i32
    %c0_i32_0 = arith.constant 0 : i32
    %c0_i32_1 = arith.constant 0 : i32
    return %arg0, %c0_i32, %c0_i32_0 : i32, i32, i32
  }
  func.func @transform_1(%arg0: i32) -> (i32, i32) {
    %c0_i32 = arith.constant 0 : i32
    %c0_i32_0 = arith.constant 0 : i32
    %c0_i32_1 = arith.constant 0 : i32
    return %c0_i32, %c0_i32_0 : i32, i32
  }
  func.func @transform_2(%arg0: i32) -> (i32, i32) {
    %c0_i32 = arith.constant 0 : i32
    %c0_i32_0 = arith.constant 0 : i32
    %c0_i32_1 = arith.constant 0 : i32
    return %c0_i32, %c0_i32_0 : i32, i32
  }
  func.func @transform_3(%arg0: i32) -> (i32, i32) {
    %c0_i32 = arith.constant 0 : i32
    %c0_i32_0 = arith.constant 0 : i32
    %c0_i32_1 = arith.constant 0 : i32
    return %c0_i32, %c0_i32_0 : i32, i32
  }
  func.func @transform_4(%arg0: i32) -> (i32, i32) {
    %c0_i32 = arith.constant 0 : i32
    %c0_i32_0 = arith.constant 0 : i32
    %c0_i32_1 = arith.constant 0 : i32
    return %c0_i32, %c0_i32_0 : i32, i32
  }
  func.func @transform_5(%arg0: i32) -> (i32, i32) {
    %c0_i32 = arith.constant 0 : i32
    %c0_i32_0 = arith.constant 0 : i32
    %c0_i32_1 = arith.constant 0 : i32
    return %c0_i32, %c0_i32_0 : i32, i32
  }
  func.func @transform_6(%arg0: i32) -> (i32, i32) {
    %c0_i32 = arith.constant 0 : i32
    %c0_i32_0 = arith.constant 0 : i32
    %c0_i32_1 = arith.constant 0 : i32
    return %c0_i32, %c0_i32_0 : i32, i32
  }
  func.func @transform_7(%arg0: i32) -> (i32, i32) {
    %c0_i32 = arith.constant 0 : i32
    %c0_i32_0 = arith.constant 0 : i32
    %c0_i32_1 = arith.constant 0 : i32
    return %c0_i32, %c0_i32_0 : i32, i32
  }
  func.func @transform_8(%arg0: i32) -> (i32, i32) {
    %c0_i32 = arith.constant 0 : i32
    %c0_i32_0 = arith.constant 0 : i32
    %c0_i32_1 = arith.constant 0 : i32
    return %c0_i32, %c0_i32_0 : i32, i32
  }
  func.func @transform_9(%arg0: i32) -> (i32, i32) {
    %c0_i32 = arith.constant 0 : i32
    %c0_i32_0 = arith.constant 0 : i32
    %c0_i32_1 = arith.constant 0 : i32
    return %c0_i32, %c0_i32_0 : i32, i32
  }
  func.func @transform_10(%arg0: i32) -> (i32, i32) {
    %c0_i32 = arith.constant 0 : i32
    %c0_i32_0 = arith.constant 0 : i32
    %c0_i32_1 = arith.constant 0 : i32
    return %c0_i32, %c0_i32_0 : i32, i32
  }
  func.func @transform_11(%arg0: i32) -> (i32, i32) {
    %c0_i32 = arith.constant 0 : i32
    %c0_i32_0 = arith.constant 0 : i32
    %c0_i32_1 = arith.constant 0 : i32
    return %c0_i32, %c0_i32_0 : i32, i32
  }
  func.func @transform_12(%arg0: i32) -> (i32, i32) {
    %c0_i32 = arith.constant 0 : i32
    %c0_i32_0 = arith.constant 0 : i32
    %c0_i32_1 = arith.constant 0 : i32
    return %c0_i32, %c0_i32_0 : i32, i32
  }
  func.func @transform_13(%arg0: i32) -> (i32, i32) {
    %c0_i32 = arith.constant 0 : i32
    %c0_i32_0 = arith.constant 0 : i32
    return %arg0, %c0_i32 : i32, i32
  }
  func.func @transform_14(%arg0: i32) -> (i32, i32) {
    %c0_i32 = arith.constant 0 : i32
    %c0_i32_0 = arith.constant 0 : i32
    return %arg0, %c0_i32 : i32, i32
  }
}

</mosaic_0001>

<bundles_post_ra>
// kernel: atari_a2c_forward.1
= control target key start
LH: loop header
LB: loop body
LE: loop exit
PB: predicated region body
PF: predicated region fallthrough
CT: control target
= control target key end

     0   :  { %s6277_s15 = smov 0   ;;  %s7849_s0 = inlined_call_operand.vmem [shape: bf16[2,512,256], index: 0, kind: input, shape index: {}]   ;;  %s7850_s1 = inlined_call_operand.vmem [shape: bf16[256,128], index: 1, kind: input, shape index: {}]   ;;  %s7851_s2 = inlined_call_operand.vmem [shape: f32[1,128], index: 2, kind: input, shape index: {}]   ;;  %s7852_s3 = inlined_call_operand.vmem [shape: bf16[2048,128], index: 3, kind: input, shape index: {}]   ;;  %s7853_s4 = inlined_call_operand.vmem [shape: f32[1,128], index: 4, kind: input, shape index: {}]   ;;  %s7854_s5 = inlined_call_operand.vmem [shape: bf16[1152,128], index: 5, kind: input, shape index: {}]   ;;  %s7855_s6 = inlined_call_operand.vmem [shape: f32[1,128], index: 6, kind: input, shape index: {}]   ;;  %s7856_s7 = inlined_call_operand.vmem [shape: bf16[128,1024], index: 7, kind: input, shape index: {}]   ;;  %s7857_s8 = inlined_call_operand.vmem [shape: f32[1,1024], index: 8, kind: input, shape index: {}]   ;;  %s7858_s9 = inlined_call_operand.vmem [shape: bf16[512,128], index: 9, kind: input, shape index: {}]   ;;  %s7859_s10 = inlined_call_operand.vmem [shape: f32[1,128], index: 10, kind: input, shape index: {}]   ;;  %s7860_s11 = inlined_call_operand.vmem [shape: f32[1,512], index: 11, kind: input, shape index: {}]   ;;  %s7861_s12 = inlined_call_operand.<no memory space> [shape: f32[1,1], index: 12, kind: input, shape index: {}]   ;;  %s7862_s13 = inlined_call_operand.vmem [shape: f32[16,128], index: 13, kind: output, shape index: {0}]   ;;  %s7863_s14 = inlined_call_operand.vmem [shape: f32[16,128], index: 14, kind: output, shape index: {1}]  }
   0x1   :  { %v20_v0 = vstv %s7861_s12 }
   0x2   :  { %21 = vst [vmem:[#allocation2] sm:$0x1] %v20_v0 }
   0x3 LB: > { %s4909_s16 = sadd.s32 4294967295, %s6194_s15   ;;  %p4913_p0 = scmp.ge.s32.totalorder %s6194_s15, 1  ;;  %s6194_s15 = sphi %s6277_s15, %s27_s15  }
   0x4   : > { %p417_p1 = scmp.lt.s32.totalorder %s6194_s15, 3 }
   0x6   : > { %p418_p2 = pnand %p4913_p0, %p417_p1 }
   0x7   : > { %v5843_v1 = vld [vmem:[%s7850_s1] sm:$0xff] (!%p418_p2)   ;;  %v6196_v2 = vmov (!%p418_p2), 0   ;;  %v5844_v3 = vld [vmem:[%s7850_s1 + $0x8] sm:$0xff] (!%p418_p2)   ;;  %p466_p3 = scmp.lt.s32.totalorder (!%p418_p2), %s4909_s16, 1  ;;  %v5845_v4 = vld [vmem:[%s7850_s1 + $0x10] sm:$0xff] (!%p418_p2)   ;;  %vm6198_vm0 = vmmov (!%p418_p2), 0  }
   0x8   : > { %421 = sbr.rel (%p418_p2) target bundleno = 1726 (0x6be), region = 72  ;;  %999 = vmatprep.subr.bf16.mxu0 (!%p418_p2), %v6196_v2  ;;  %5842 = vset.pattern.permute.xlu0 (!%p418_p2), %v6196_v2  ;;  %v5846_v5 = vld [vmem:[%s7850_s1 + $0x18] sm:$0xff] (!%p418_p2)   ;;  %v5847_v6 = vld [vmem:[%s7850_s1 + $0x20] sm:$0xff] (!%p418_p2)   ;;  %v5848_v8 = vld [vmem:[%s7850_s1 + $0x28] sm:$0xff] (!%p418_p2)  }
   0x9   : > { %1000 = vmatpush1.bf16.msra.mxu0 (!%p418_p2), %v5843_v1  ;;  %v5849_v9 = vld [vmem:[%s7850_s1 + $0x30] sm:$0xff] (!%p418_p2)   ;;  %v5850_v10 = vld [vmem:[%s7850_s1 + $0x38] sm:$0xff] (!%p418_p2)   ;;  %v5851_v11 = vld [vmem:[%s7850_s1 + $0x40] sm:$0xff] (!%p418_p2)  }
   0xa   : > { %1001 = vmatprep.subr.bf16.mxu0 (!%p418_p2), %v6196_v2  ;;  %v5852_v12 = vld [vmem:[%s7850_s1 + $0x48] sm:$0xff] (!%p418_p2)   ;;  %v5853_v13 = vld [vmem:[%s7850_s1 + $0x50] sm:$0xff] (!%p418_p2)   ;;  %v5854_v14 = vld [vmem:[%s7850_s1 + $0x58] sm:$0xff] (!%p418_p2)  }
   0xb   : > { %v5855_v15 = vld [vmem:[%s7850_s1 + $0x60] sm:$0xff] (!%p418_p2)   ;;  %v5856_v16 = vld [vmem:[%s7850_s1 + $0x68] sm:$0xff] (!%p418_p2)   ;;  %v5857_v17 = vld [vmem:[%s7850_s1 + $0x70] sm:$0xff] (!%p418_p2)  }
   0xc   : > { %v5858_v18 = vld [vmem:[%s7850_s1 + $0x78] sm:$0xff] (!%p418_p2)   ;;  %v5925_v31 = vld [vmem:[%s7852_s3 + $0x40] sm:$0xff] (!%p418_p2)   ;;  %v5927_v33 = vld [vmem:[%s7852_s3 + $0x48] sm:$0xff] (!%p418_p2)  }
   0xd   : > { %1002 = vmatpush1.bf16.msra.mxu0 (!%p418_p2), %v5844_v3  ;;  %v5926_v32 = vld [vmem:[%s7852_s3] sm:$0xff] (!%p418_p2)   ;;  %5302 = vmatprep.subr.bf16.mxu1 (!%p418_p2), %v5925_v31  ;;  %v5928_v35 = vld [vmem:[%s7852_s3 + $0x8] sm:$0xff] (!%p418_p2)   ;;  %v5929_v36 = vld [vmem:[%s7852_s3 + $0x50] sm:$0xff] (!%p418_p2)  }
   0xe   : > { %1003 = vmatprep.subr.bf16.mxu0 (!%p418_p2), %v6196_v2  ;;  %5303 = vmatpush3.bf16.msra.mxu1 (!%p418_p2), %v5926_v32  ;;  %v5930_v38 = vld [vmem:[%s7852_s3 + $0x10] sm:$0xff] (!%p418_p2)   ;;  %v5931_v39 = vld [vmem:[%s7852_s3 + $0x58] sm:$0xff] (!%p418_p2)   ;;  %v5935_v50 = vld [vmem:[%s7852_s3 + $0x60] sm:$0xff] (!%p418_p2)  }
   0xf   : > { %s7865_s16 = smov (!%p466_p3, %s4909_s16), 1  ;;  %5304 = vmatprep.subr.bf16.mxu1 %v5927_v33  ;;  %v5932_v40 = vld [vmem:[%s7852_s3 + $0x18] sm:$0xff]   ;;  %v5937_v52 = vld [vmem:[%s7852_s3 + $0x20] sm:$0xff]   ;;  %v5938_v53 = vld [vmem:[%s7852_s3 + $0x68] sm:$0xff]  }
  0x10   : > { %s5301_s24 = sshll.u32 %s7865_s16, 9  ;;  %v5939_v54 = vld [vmem:[%s7852_s3 + $0x28] sm:$0xff]   ;;  %v5942_v56 = vld [vmem:[%s7852_s3 + $0x70] sm:$0xff]   ;;  %v5945_v59 = vld [vmem:[%s7852_s3 + $0x78] sm:$0xff]   ;;  %s4916_s19 = sshll.u32 %s7865_s16, 3 }
  0x11   : > { %1004 = vmatpush1.bf16.msra.mxu0 %v5845_v4  ;;  %s6311_s29 = scalar_lea.vmem %s7849_s0, %s5301_s24  ;;  %v5944_v58 = vld [vmem:[%s7852_s3 + $0x30] sm:$0xff]   ;;  %v5946_v60 = vld [vmem:[%s7852_s3 + $0x38] sm:$0xff]   ;;  %v6468_v32 = vld [vmem:[%s7851_s2] ss:$0 sm:$0xff]  ;;  %s474_s21 = scalar_lea.vmem %s7862_s13, %s4916_s19 }
  0x12   : > { %1005 = vmatprep.subr.bf16.mxu0 %v6196_v2  ;;  %v5861_v7 = vld [vmem:[%s6311_s29 + $0x4] ss:$8 sps:$4 sm:$0xff]   ;;  %v5859_v19 = vld [vmem:[%s6311_s29] ss:$8 sps:$4 sm:$0xff]   ;;  %v5862_v20 = vld [vmem:[%s6311_s29 + $0x14] ss:$8 sps:$4 sm:$0xff]   ;;  %5305 = vmatpush3.bf16.msra.mxu1 %v5928_v35  ;;  %s478_s24 = scalar_lea.vmem %s7863_s14, %s4916_s19 }
  0x13   : > { %1031 = vmatprep.mubr.bf16.mxu0 %v5861_v7  ;;  %v5864_v21 = vld [vmem:[%s6311_s29 + $0x10] ss:$8 sps:$4 sm:$0xff]   ;;  %v5865_v22 = vld [vmem:[%s6311_s29 + $0x24] ss:$8 sps:$4 sm:$0xff]   ;;  %v5867_v23 = vld [vmem:[%s6311_s29 + $0x20] ss:$8 sps:$4 sm:$0xff]   ;;  %5306 = vmatprep.subr.bf16.mxu1 %v5929_v36 }
  0x14   : > { %v5868_v24 = vld [vmem:[%s6311_s29 + $0x34] ss:$8 sps:$4 sm:$0xff]   ;;  %v5870_v25 = vld [vmem:[%s6311_s29 + $0x30] ss:$8 sps:$4 sm:$0xff]   ;;  %v5871_v26 = vld [vmem:[%s6311_s29 + $0x44] ss:$8 sps:$4 sm:$0xff]  }
  0x15   : > { %1006 = vmatpush1.bf16.msra.mxu0 %v5846_v5  ;;  %v5873_v27 = vld [vmem:[%s6311_s29 + $0x40] ss:$8 sps:$4 sm:$0xff]   ;;  %v5874_v28 = vld [vmem:[%s6311_s29 + $0x54] ss:$8 sps:$4 sm:$0xff]   ;;  %v5876_v29 = vld [vmem:[%s6311_s29 + $0x50] ss:$8 sps:$4 sm:$0xff]  }
  0x16   : > { %1007 = vmatprep.subr.bf16.mxu0 %v6196_v2  ;;  %v5877_v30 = vld [vmem:[%s6311_s29 + $0x64] ss:$8 sps:$4 sm:$0xff]   ;;  %v5879_v34 = vld [vmem:[%s6311_s29 + $0x60] ss:$8 sps:$4 sm:$0xff]   ;;  %v5880_v37 = vld [vmem:[%s6311_s29 + $0x74] ss:$8 sps:$4 sm:$0xff]   ;;  %5307 = vmatpush3.bf16.msra.mxu1 %v5930_v38 }
  0x17   : > { %v5882_v41 = vld [vmem:[%s6311_s29 + $0x70] ss:$8 sps:$4 sm:$0xff]   ;;  %v5883_v42 = vld [vmem:[%s6311_s29 + $0x84] ss:$8 sps:$4 sm:$0xff]   ;;  %5308 = vmatprep.subr.bf16.mxu1 %v5931_v39  ;;  %v5885_v43 = vld [vmem:[%s6311_s29 + $0x80] ss:$8 sps:$4 sm:$0xff]  }
  0x18   : > { %v5886_v44 = vld [vmem:[%s6311_s29 + $0x94] ss:$8 sps:$4 sm:$0xff]   ;;  %v5888_v45 = vld [vmem:[%s6311_s29 + $0x90] ss:$8 sps:$4 sm:$0xff]   ;;  %v5889_v46 = vld [vmem:[%s6311_s29 + $0xa4] ss:$8 sps:$4 sm:$0xff]  }
  0x19   : > { %1008 = vmatpush1.bf16.msra.mxu0 %v5847_v6  ;;  %v5891_v47 = vld [vmem:[%s6311_s29 + $0xa0] ss:$8 sps:$4 sm:$0xff]   ;;  %v5892_v48 = vld [vmem:[%s6311_s29 + $0xb4] ss:$8 sps:$4 sm:$0xff]   ;;  %v5894_v49 = vld [vmem:[%s6311_s29 + $0xb0] ss:$8 sps:$4 sm:$0xff]  }
  0x1a   : > { %1009 = vmatprep.subr.bf16.mxu0 %v6196_v2  ;;  %5309 = vmatpush3.bf16.msra.mxu1 %v5932_v40  ;;  %v5895_v51 = vld [vmem:[%s6311_s29 + $0xc4] ss:$8 sps:$4 sm:$0xff]   ;;  %v5897_v55 = vld [vmem:[%s6311_s29 + $0xc0] ss:$8 sps:$4 sm:$0xff]   ;;  %v5898_v57 = vld [vmem:[%s6311_s29 + $0xd4] ss:$8 sps:$4 sm:$0xff]  }
  0x1b   : > { %5310 = vmatprep.subr.bf16.mxu1 %v5935_v50  ;;  %v5900_v61 = vld [vmem:[%s6311_s29 + $0xd0] ss:$8 sps:$4 sm:$0xff]   ;;  %v5901_v62 = vld [vmem:[%s6311_s29 + $0xe4] ss:$8 sps:$4 sm:$0xff]   ;;  %v5903_v63 = vld [vmem:[%s6311_s29 + $0xe0] ss:$8 sps:$4 sm:$0xff]  }
  0x1c   : > { %v5904_v0 = vld [vmem:[%s6311_s29 + $0xf4] ss:$8 sps:$4 sm:$0xff]   ;;  %v5906_v1 = vld [vmem:[%s6311_s29 + $0xf0] ss:$8 sps:$4 sm:$0xff]   ;;  %v5907_v3 = vld [vmem:[%s6311_s29 + $0x104] ss:$8 sps:$4 sm:$0xff]  }
  0x1d   : > { %1010 = vmatpush1.bf16.msra.mxu0 %v5848_v8  ;;  %v5909_v4 = vld [vmem:[%s6311_s29 + $0x100] ss:$8 sps:$4 sm:$0xff]   ;;  %v5910_v5 = vld [vmem:[%s6311_s29 + $0x114] ss:$8 sps:$4 sm:$0xff]   ;;  %v5912_v6 = vld [vmem:[%s6311_s29 + $0x110] ss:$8 sps:$4 sm:$0xff]  }
  0x1e   : > { %1011 = vmatprep.subr.bf16.mxu0 %v6196_v2  ;;  %5311 = vmatpush3.bf16.msra.mxu1 %v5937_v52  ;;  %v5913_v7 = vld [vmem:[%s6311_s29 + $0x124] ss:$8 sps:$4 sm:$0xff]   ;;  %v5915_v8 = vld [vmem:[%s6311_s29 + $0x120] ss:$8 sps:$4 sm:$0xff]  }
  0x1f   : > { %5312 = vmatprep.subr.bf16.mxu1 %v5938_v53  ;;  %v5969_v50 = vld [vmem:[%s6311_s29 + $0x1c4] ss:$8 sps:$4 sm:$0xff]   ;;  %v5972_v53 = vld [vmem:[%s6311_s29 + $0x1c0] ss:$8 sps:$4 sm:$0xff]  }
  0x21   : > { %1012 = vmatpush1.bf16.msra.mxu0 %v5849_v9  ;;  %v5916_v9 = vld [vmem:[%s6311_s29 + $0x134] ss:$8 sps:$4 sm:$0xff]  }
  0x22   : > { %1013 = vmatprep.subr.bf16.mxu0 %v6196_v2  ;;  %5313 = vmatpush3.bf16.msra.mxu1 %v5939_v54 }
  0x23   : > { %5314 = vmatprep.subr.bf16.mxu1 %v5942_v56 }
  0x25   : > { %1014 = vmatpush1.bf16.msra.mxu0 %v5850_v10  ;;  %v5918_v10 = vld [vmem:[%s6311_s29 + $0x130] ss:$8 sps:$4 sm:$0xff]  }
  0x26   : > { %1015 = vmatprep.subr.bf16.mxu0 %v6196_v2  ;;  %5315 = vmatpush3.bf16.msra.mxu1 %v5944_v58  ;;  %v5959_v58 = vld [vmem:[%s7852_s3 + $0x88] sm:$0xff]  }
  0x27   : > { %5316 = vmatprep.subr.bf16.mxu1 %v5945_v59  ;;  %v5963_v59 = vld [vmem:[%s7852_s3 + $0xd0] sm:$0xff]  }
  0x29   : > { %1016 = vmatpush1.bf16.msra.mxu0 %v5851_v11  ;;  %v5919_v11 = vld [vmem:[%s6311_s29 + $0x144] ss:$8 sps:$4 sm:$0xff]  }
  0x2a   : > { %1017 = vmatprep.subr.bf16.mxu0 %v6196_v2  ;;  %5317 = vmatpush3.bf16.msra.mxu1 %v5946_v60 }
  0x2d   : > { %1018 = vmatpush1.bf16.msra.mxu0 %v5852_v12  ;;  %v5921_v12 = vld [vmem:[%s6311_s29 + $0x140] ss:$8 sps:$4 sm:$0xff]  }
  0x2e   : > { %1019 = vmatprep.subr.bf16.mxu0 %v6196_v2 }
  0x31   : > { %1020 = vmatpush1.bf16.msra.mxu0 %v5853_v13  ;;  %v5922_v13 = vld [vmem:[%s6311_s29 + $0x154] ss:$8 sps:$4 sm:$0xff]  }
  0x32   : > { %1021 = vmatprep.subr.bf16.mxu0 %v6196_v2 }
  0x35   : > { %1022 = vmatpush1.bf16.msra.mxu0 %v5854_v14  ;;  %v5924_v14 = vld [vmem:[%s6311_s29 + $0x150] ss:$8 sps:$4 sm:$0xff]  }
  0x36   : > { %1023 = vmatprep.subr.bf16.mxu0 %v6196_v2 }
  0x39   : > { %1024 = vmatpush1.bf16.msra.mxu0 %v5855_v15  ;;  %v5933_v15 = vld [vmem:[%s6311_s29 + $0x164] ss:$8 sps:$4 sm:$0xff]  }
  0x3a   : > { %1025 = vmatprep.subr.bf16.mxu0 %v6196_v2 }
  0x3d   : > { %1026 = vmatpush1.bf16.msra.mxu0 %v5856_v16  ;;  %v5936_v16 = vld [vmem:[%s6311_s29 + $0x160] ss:$8 sps:$4 sm:$0xff]  }
  0x3e   : > { %1027 = vmatprep.subr.bf16.mxu0 %v6196_v2 }
  0x41   : > { %1028 = vmatpush1.bf16.msra.mxu0 %v5857_v17  ;;  %v5940_v17 = vld [vmem:[%s6311_s29 + $0x174] ss:$8 sps:$4 sm:$0xff]  }
  0x42   : > { %1029 = vmatprep.subr.bf16.mxu0 %v6196_v2 }
  0x45   : > { %1030 = vmatpush1.bf16.msra.mxu0 %v5858_v18  ;;  %v5943_v18 = vld [vmem:[%s6311_s29 + $0x170] ss:$8 sps:$4 sm:$0xff]  }
  0x48   : > { %1032 = vmatmul.mubr.bf16.vlgmr.msra.gmra.mrb[0].mxu0 %v5859_v19  ;;  %v5947_v19 = vld [vmem:[%s6311_s29 + $0x184] ss:$8 sps:$4 sm:$0xff]  }
  0x49   : > { %1039 = vmatprep.mubr.bf16.mxu0 %v5862_v20  ;;  %v5949_v20 = vld [vmem:[%s6311_s29 + $0x180] ss:$8 sps:$4 sm:$0xff]  }
  0x50   : > { %1040 = vmatmul.mubr.bf16.gmra.mrb[4].mxu0 %v5864_v21  ;;  %v5950_v21 = vld [vmem:[%s6311_s29 + $0x194] ss:$8 sps:$4 sm:$0xff]  }
  0x51   : > { %1047 = vmatprep.mubr.bf16.mxu0 %v5865_v22  ;;  %v5952_v22 = vld [vmem:[%s6311_s29 + $0x190] ss:$8 sps:$4 sm:$0xff]  }
  0x58   : > { %1048 = vmatmul.mubr.bf16.gmra.mrb[8].mxu0 %v5867_v23  ;;  %v5953_v23 = vld [vmem:[%s6311_s29 + $0x1a4] ss:$8 sps:$4 sm:$0xff]  }
  0x59   : > { %1055 = vmatprep.mubr.bf16.mxu0 %v5868_v24  ;;  %v5955_v24 = vld [vmem:[%s6311_s29 + $0x1a0] ss:$8 sps:$4 sm:$0xff]  }
  0x60   : > { %1056 = vmatmul.mubr.bf16.gmra.mrb[12].mxu0 %v5870_v25  ;;  %v5956_v25 = vld [vmem:[%s7852_s3 + $0xc0] sm:$0xff]  }
  0x61   : > { %1063 = vmatprep.mubr.bf16.mxu0 %v5871_v26  ;;  %5348 = vmatprep.subr.bf16.mxu1 %v5956_v25 }
  0x68   : > { %1064 = vmatmul.mubr.bf16.gmra.mrb[16].mxu0 %v5873_v27  ;;  %v5960_v27 = vld [vmem:[%s6311_s29 + $0x1b4] ss:$8 sps:$4 sm:$0xff]  }
  0x69   : > { %1071 = vmatprep.mubr.bf16.mxu0 %v5874_v28 }
  0x70   : > { %1072 = vmatmul.mubr.bf16.gmra.mrb[20].mxu0 %v5876_v29  ;;  %v5962_v29 = vld [vmem:[%s6311_s29 + $0x1b0] ss:$8 sps:$4 sm:$0xff]  }
  0x71   : > { %1079 = vmatprep.mubr.bf16.mxu0 %v5877_v30 }
  0x78   : > { %1080 = vmatmul.mubr.bf16.gmra.mrb[24].mxu0 %v5879_v34 }
  0x79   : > { %1087 = vmatprep.mubr.bf16.mxu0 %v5880_v37 }
  0x80   : > { %1088 = vmatmul.mubr.bf16.gmra.mrb[28].mxu0 %v5882_v41 }
  0x81   : > { %1095 = vmatprep.mubr.bf16.mxu0 %v5883_v42 }
  0x88   : > { %1096 = vmatmul.mubr.bf16.gmra.mrb[32].mxu0 %v5885_v43 }
  0x89   : > { %1103 = vmatprep.mubr.bf16.mxu0 %v5886_v44 }
  0x90   : > { %1104 = vmatmul.mubr.bf16.gmra.mrb[36].mxu0 %v5888_v45 }
  0x91   : > { %1111 = vmatprep.mubr.bf16.mxu0 %v5889_v46 }
  0x98   : > { %1112 = vmatmul.mubr.bf16.gmra.mrb[40].mxu0 %v5891_v47  ;;  %v5957_v47 = vld [vmem:[%s7852_s3 + $0x80] sm:$0xff]  }
  0x99   : > { %1119 = vmatprep.mubr.bf16.mxu0 %v5892_v48 }
  0xa0   : > { %1120 = vmatmul.mubr.bf16.gmra.mrb[44].mxu0 %v5894_v49  ;;  %v5958_v49 = vld [vmem:[%s7852_s3 + $0xc8] sm:$0xff]  }
  0xa1   : > { %1127 = vmatprep.mubr.bf16.mxu0 %v5895_v51 }
  0xa8   : > { %1128 = vmatmul.mubr.bf16.gmra.mrb[48].mxu0 %v5897_v55 }
  0xa9   : > { %1135 = vmatprep.mubr.bf16.mxu0 %v5898_v57 }
  0xb0   : > { %1136 = vmatmul.mubr.bf16.gmra.mrb[52].mxu0 %v5900_v61 }
  0xb1   : > { %1143 = vmatprep.mubr.bf16.mxu0 %v5901_v62 }
  0xb8   : > { %1144 = vmatmul.mubr.bf16.gmra.mrb[56].mxu0 %v5903_v63  ;;  %v5964_v63 = vld [vmem:[%s7852_s3 + $0x90] sm:$0xff]  }
  0xb9   : > { %1151 = vmatprep.mubr.bf16.mxu0 %v5904_v0 }
  0xc0   : > { %1152 = vmatmul.mubr.bf16.gmra.mrb[60].mxu0 %v5906_v1  ;;  %v5965_v1 = vld [vmem:[%s7852_s3 + $0xd8] sm:$0xff]  }
  0xc1   : > { %1159 = vmatprep.mubr.bf16.mxu0 %v5907_v3  ;;  %v5976_v3 = vld [vmem:[%s6311_s29 + $0x1d4] ss:$8 sps:$4 sm:$0xff]  }
  0xc8   : > { %1160 = vmatmul.mubr.bf16.gmra.mrb[64].mxu0 %v5909_v4 }
  0xc9   : > { %1167 = vmatprep.mubr.bf16.mxu0 %v5910_v5  ;;  %v5978_v5 = vld [vmem:[%s6311_s29 + $0x1d0] ss:$8 sps:$4 sm:$0xff]  }
  0xd0   : > { %1168 = vmatmul.mubr.bf16.gmra.mrb[68].mxu0 %v5912_v6 }
  0xd1   : > { %1175 = vmatprep.mubr.bf16.mxu0 %v5913_v7 }
  0xd8   : > { %1176 = vmatmul.mubr.bf16.gmra.mrb[72].mxu0 %v5915_v8  ;;  %v5966_v8 = vld [vmem:[%s7852_s3 + $0x98] sm:$0xff]  }
  0xd9   : > { %1183 = vmatprep.mubr.bf16.mxu0 %v5916_v9  ;;  %v5967_v9 = vld [vmem:[%s7852_s3 + $0xe0] sm:$0xff]  }
  0xe0   : > { %1184 = vmatmul.mubr.bf16.gmra.mrb[76].mxu0 %v5918_v10  ;;  %v5968_v10 = vld [vmem:[%s7852_s3 + $0xa0] sm:$0xff]  }
  0xe1   : > { %1191 = vmatprep.mubr.bf16.mxu0 %v5919_v11 }
  0xe8   : > { %1192 = vmatmul.mubr.bf16.gmra.mrb[80].mxu0 %v5921_v12  ;;  %v5971_v12 = vld [vmem:[%s7852_s3 + $0xe8] sm:$0xff]  }
  0xe9   : > { %1199 = vmatprep.mubr.bf16.mxu0 %v5922_v13  ;;  %v5982_v13 = vld [vmem:[%s6311_s29 + $0x1e4] ss:$8 sps:$4 sm:$0xff]  }
  0xf0   : > { %1200 = vmatmul.mubr.bf16.gmra.mrb[84].mxu0 %v5924_v14 }
  0xf1   : > { %1207 = vmatprep.mubr.bf16.mxu0 %v5933_v15  ;;  %v5985_v15 = vld [vmem:[%s6311_s29 + $0x1e0] ss:$8 sps:$4 sm:$0xff]  }
  0xf8   : > { %1208 = vmatmul.mubr.bf16.gmra.mrb[88].mxu0 %v5936_v16 }
  0xf9   : > { %1215 = vmatprep.mubr.bf16.mxu0 %v5940_v17 }
 0x100   : > { %1216 = vmatmul.mubr.bf16.gmra.mrb[92].mxu0 %v5943_v18  ;;  %v5973_v18 = vld [vmem:[%s7852_s3 + $0xa8] sm:$0xff]  }
 0x101   : > { %1223 = vmatprep.mubr.bf16.mxu0 %v5947_v19  ;;  %v5974_v19 = vld [vmem:[%s7852_s3 + $0xf0] sm:$0xff]  }
 0x108   : > { %1224 = vmatmul.mubr.bf16.gmra.mrb[96].mxu0 %v5949_v20 }
 0x109   : > { %1231 = vmatprep.mubr.bf16.mxu0 %v5950_v21  ;;  %v5975_v21 = vld [vmem:[%s7852_s3 + $0xb0] sm:$0xff]  }
 0x110   : > { %1232 = vmatmul.mubr.bf16.gmra.mrb[100].mxu0 %v5952_v22 }
 0x111   : > { %1239 = vmatprep.mubr.bf16.mxu0 %v5953_v23  ;;  %v5979_v23 = vld [vmem:[%s7852_s3 + $0xf8] sm:$0xff]  }
 0x118   : > { %1240 = vmatmul.mubr.bf16.gmra.mrb[104].mxu0 %v5955_v24 }
 0x119   : > { %1247 = vmatprep.mubr.bf16.mxu0 %v5960_v27 }
 0x11b   : > { %v1033_v26 = vpop.f32.mrb[0].mxu0 }
 0x11c   : > { %v1035_v28 = vpop.f32.mrb[1].mxu0  ;;  %v1034_v33 = vadd.f32 %v6468_v32, %v1033_v26 }
 0x11d   : > { %v1036_v30 = vpop.f32.mrb[2].mxu0 }
 0x11e   : > { %v1038_v31 = vpop.f32.mrb[3].mxu0  ;;  %v1037_v35 = vadd.f32 %v6468_v32, %v1036_v30  ;;  %v1288_v39 = vmax.f32 %v1034_v33, 0.0  ;;  %v5980_v33 = vld [vmem:[%s7852_s3 + $0xb8] sm:$0xff]  }
 0x120   : > { %1248 = vmatmul.mubr.bf16.gmra.mrb[108].mxu0 %v5962_v29  ;;  %v1289_v43 = vmax.f32 %v1037_v35, 0.0 }
 0x121   : > { %1255 = vmatprep.mubr.bf16.mxu0 %v5969_v50 }
 0x123   : > { %v1041_v34 = vpop.f32.mrb[4].mxu0 }
 0x124   : > { %v1042_v36 = vadd.f32 %v6468_v32, %v1041_v34  ;;  %v1043_v37 = vpop.f32.mrb[5].mxu0  ;;  %v5981_v34 = vld [vmem:[%s7852_s3 + $0x140] sm:$0xff]  }
 0x125   : > { %v1044_v38 = vpop.f32.mrb[6].mxu0 }
 0x126   : > { %v1290_v40 = vmax.f32 %v1042_v36, 0.0  ;;  %v1045_v41 = vadd.f32 %v6468_v32, %v1044_v38  ;;  %v1046_v42 = vpop.f32.mrb[7].mxu0 }
 0x128   : > { %v1352_v44 = vpack.c.bf16 %v1290_v40, %v1288_v39  ;;  %v1291_v45 = vmax.f32 %v1045_v41, 0.0  ;;  %1256 = vmatmul.mubr.bf16.gmra.mrb[112].mxu0 %v5972_v53 }
 0x129   : > { %1263 = vmatprep.mubr.bf16.mxu0 %v5976_v3 }
 0x12a   : > { %v1353_v46 = vpack.c.bf16 %v1291_v45, %v1289_v43 }
 0x12b   : > { %v1049_v48 = vpop.f32.mrb[8].mxu0 }
 0x12c   : > { %v6482_v51 = vadd.f32 %v6468_v32, %v1049_v48  ;;  %v1051_v52 = vpop.f32.mrb[9].mxu0  ;;  %2487 = vmatprep.mubr.bf16.mxu1 %v1353_v46 }
 0x12d   : > { %v1052_v54 = vpop.f32.mrb[10].mxu0  ;;  %2488 = vmatmul.mubr.bf16.vlgmr.msra.gmra.mrb[0].mxu1 %v1352_v44 }
 0x12e   : > { %v1292_v55 = vmax.f32 %v6482_v51, 0.0  ;;  %v6487_v56 = vadd.f32 %v6468_v32, %v1052_v54  ;;  %v1054_v57 = vpop.f32.mrb[11].mxu0  ;;  %5349 = vmatpush3.bf16.msra.mxu1 %v5957_v47 }
 0x12f   : > { %5350 = vmatprep.subr.bf16.mxu1 %v5958_v49 }
 0x130   : > { %v6497_v60 = vpack.c.bf16 %v1292_v55, %v1290_v40  ;;  %v1293_v61 = vmax.f32 %v6487_v56, 0.0  ;;  %1264 = vmatmul.mubr.bf16.gmra.mrb[116].mxu0 %v5978_v5 }
 0x131   : > { %1271 = vmatprep.mubr.bf16.mxu0 %v5982_v13 }
 0x132   : > { %v6502_v62 = vpack.c.bf16 %v1293_v61, %v1291_v45  ;;  %5351 = vmatpush3.bf16.msra.mxu1 %v5959_v58 }
 0x133   : > { %v6507_v0 = vpop.f32.mrb[12].mxu0  ;;  %5352 = vmatprep.subr.bf16.mxu1 %v5963_v59 }
 0x134   : > { %v1059_v4 = vpop.f32.mrb[13].mxu0 }
 0x135   : > { %v6514_v6 = vpop.f32.mrb[14].mxu0 }
 0x136   : > { %v1062_v7 = vpop.f32.mrb[15].mxu0  ;;  %5353 = vmatpush3.bf16.msra.mxu1 %v5964_v63 }
 0x137   : > { %5354 = vmatprep.subr.bf16.mxu1 %v5965_v1  ;;  %v1058_v7 = vadd.f32 %v6468_v32, %v6507_v0 }
 0x138   : > { %1272 = vmatmul.mubr.bf16.gmra.mrb[120].mxu0 %v5985_v15 }
 0x139   : > { %v1294_v51 = vmax.f32 %v1058_v7, 0.0 }
 0x13a   : > { %5355 = vmatpush3.bf16.msra.mxu1 %v5966_v8 }
 0x13b   : > { %v1065_v11 = vpop.f32.mrb[16].mxu0  ;;  %5356 = vmatprep.subr.bf16.mxu1 %v5967_v9 }
 0x13c   : > { %v1067_v14 = vpop.f32.mrb[17].mxu0  ;;  %v1066_v20 = vadd.f32 %v6468_v32, %v1065_v11 }
 0x13d   : > { %v1068_v16 = vpop.f32.mrb[18].mxu0 }
 0x13e   : > { %v1070_v17 = vpop.f32.mrb[19].mxu0  ;;  %5357 = vmatpush3.bf16.msra.mxu1 %v5968_v10  ;;  %v1069_v24 = vadd.f32 %v6468_v32, %v1068_v16  ;;  %v1296_v28 = vmax.f32 %v1066_v20, 0.0  ;;  %v1061_v10 = vadd.f32 %v6468_v32, %v6514_v6 }
 0x13f   : > { %5358 = vmatprep.subr.bf16.mxu1 %v5971_v12 }
 0x140   : > { %v1297_v35 = vmax.f32 %v1069_v24, 0.0  ;;  %v1295_v15 = vmax.f32 %v1061_v10, 0.0 }
 0x142   : > { %5359 = vmatpush3.bf16.msra.mxu1 %v5973_v18 }
 0x143   : > { %v1073_v22 = vpop.f32.mrb[20].mxu0  ;;  %5360 = vmatprep.subr.bf16.mxu1 %v5974_v19 }
 0x144   : > { %v1074_v25 = vadd.f32 %v6468_v32, %v1073_v22  ;;  %v1075_v26 = vpop.f32.mrb[21].mxu0  ;;  %v6005_v22 = vld [vmem:[%s6311_s29 + $0x1f4] ss:$8 sps:$4 sm:$0xff]  }
 0x145   : > { %v1076_v27 = vpop.f32.mrb[22].mxu0  ;;  %v6008_v26 = vld [vmem:[%s6311_s29 + $0x1f0] ss:$8 sps:$4 sm:$0xff]   ;;  %1279 = vmatprep.mubr.bf16.mxu0 %v6005_v22 }
 0x146   : > { %v1298_v29 = vmax.f32 %v1074_v25, 0.0  ;;  %v1077_v30 = vadd.f32 %v6468_v32, %v1076_v27  ;;  %v1078_v31 = vpop.f32.mrb[23].mxu0  ;;  %5361 = vmatpush3.bf16.msra.mxu1 %v5975_v21  ;;  %1280 = vmatmul.mubr.bf16.gmra.mrb[124].mxu0 %v6008_v26 }
 0x147   : > { %5362 = vmatprep.subr.bf16.mxu1 %v5979_v23 }
 0x148   : > { %v6552_v36 = vpack.c.bf16 %v1298_v29, %v1296_v28  ;;  %v1299_v37 = vmax.f32 %v1077_v30, 0.0 }
 0x14a   : > { %v6554_v38 = vpack.c.bf16 %v1299_v37, %v1297_v35  ;;  %5363 = vmatpush3.bf16.msra.mxu1 %v5980_v33 }
 0x14b   : > { %v1081_v39 = vpop.f32.mrb[24].mxu0  ;;  %5394 = vmatprep.subr.bf16.mxu1 %v5981_v34 }
 0x14c   : > { %v6557_v40 = vadd.f32 %v6468_v32, %v1081_v39  ;;  %v1083_v41 = vpop.f32.mrb[25].mxu0 }
 0x14d   : > { %v1084_v42 = vpop.f32.mrb[26].mxu0 }
 0x14e   : > { %v1300_v43 = vmax.f32 %v6557_v40, 0.0  ;;  %v6561_v44 = vadd.f32 %v6468_v32, %v1084_v42  ;;  %v1086_v45 = vpop.f32.mrb[27].mxu0 }
 0x150   : > { %v6565_v46 = vpack.c.bf16 %v1300_v43, %v1298_v29  ;;  %v1301_v47 = vmax.f32 %v6561_v44, 0.0 }
 0x152   : > { %v6570_v48 = vpack.c.bf16 %v1301_v47, %v1299_v37 }
 0x153   : > { %v6572_v49 = vpop.f32.mrb[28].mxu0 }
 0x154   : > { %v1091_v50 = vpop.f32.mrb[29].mxu0 }
 0x155   : > { %v6574_v52 = vpop.f32.mrb[30].mxu0 }
 0x156   : > { %v1094_v53 = vpop.f32.mrb[31].mxu0 }
 0x15b   : > { %v1097_v54 = vpop.f32.mrb[32].mxu0 }
 0x15c   : > { %v1098_v57 = vadd.f32 %v6468_v32, %v1097_v54  ;;  %v1099_v58 = vpop.f32.mrb[33].mxu0 }
 0x15d   : > { %v1100_v59 = vpop.f32.mrb[34].mxu0 }
 0x15e   : > { %v1304_v63 = vmax.f32 %v1098_v57, 0.0  ;;  %v1101_v1 = vadd.f32 %v6468_v32, %v1100_v59  ;;  %v1102_v3 = vpop.f32.mrb[35].mxu0 }
 0x160   : > { %v1368_v4 = vpack.c.bf16 %v1304_v63, %v1292_v55  ;;  %v1305_v5 = vmax.f32 %v1101_v1, 0.0 }
 0x162   : > { %v1369_v8 = vpack.c.bf16 %v1305_v5, %v1293_v61 }
 0x163   : > { %v1105_v9 = vpop.f32.mrb[36].mxu0 }
 0x164   : > { %v1106_v11 = vadd.f32 %v6468_v32, %v1105_v9  ;;  %v1107_v12 = vpop.f32.mrb[37].mxu0  ;;  %2495 = vmatprep.mubr.bf16.mxu1 %v1369_v8  ;;  %v1093_v8 = vadd.f32 %v6468_v32, %v6574_v52 }
 0x165   : > { %v1108_v13 = vpop.f32.mrb[38].mxu0  ;;  %2496 = vmatmul.mubr.bf16.gmra.mrb[4].mxu1 %v1368_v4  ;;  %v1090_v4 = vadd.f32 %v6468_v32, %v6572_v49 }
 0x166   : > { %v1306_v55 = vmax.f32 %v1106_v11, 0.0  ;;  %v1109_v14 = vadd.f32 %v6468_v32, %v1108_v13  ;;  %v1110_v0 = vpop.f32.mrb[39].mxu0 }
 0x167   : > { %v1302_v12 = vmax.f32 %v1090_v4, 0.0 }
 0x168   : > { %v6588_v56 = vpack.c.bf16 %v1306_v55, %v1304_v63  ;;  %v1307_v61 = vmax.f32 %v1109_v14, 0.0  ;;  %v6590_v16 = vpack.c.bf16 %v1306_v55, %v1294_v51  ;;  %v1303_v51 = vmax.f32 %v1093_v8, 0.0 }
 0x16a   : > { %v6592_v6 = vpack.c.bf16 %v1307_v61, %v1295_v15  ;;  %v6594_v17 = vpack.c.bf16 %v1307_v61, %v1305_v5 }
 0x16b   : > { %v1113_v18 = vpop.f32.mrb[40].mxu0 }
 0x16c   : > { %v1114_v19 = vadd.f32 %v6468_v32, %v1113_v18  ;;  %v1115_v20 = vpop.f32.mrb[41].mxu0 }
 0x16d   : > { %v1116_v21 = vpop.f32.mrb[42].mxu0 }
 0x16e   : > { %v6598_v23 = vmax.f32 %v1114_v19, 0.0  ;;  %v1117_v24 = vadd.f32 %v6468_v32, %v1116_v21  ;;  %v1118_v25 = vpop.f32.mrb[43].mxu0 }
 0x170   : > { %v6602_v27 = vmax.f32 %v1117_v24, 0.0  ;;  %v6605_v28 = vpack.c.bf16 %v6598_v23, %v1306_v55 }
 0x172   : > { %v6608_v29 = vpack.c.bf16 %v6602_v27, %v1307_v61 }
 0x173   : > { %v1121_v30 = vpop.f32.mrb[44].mxu0 }
 0x174   : > { %v6611_v31 = vadd.f32 %v6468_v32, %v1121_v30  ;;  %v1123_v33 = vpop.f32.mrb[45].mxu0  ;;  %2503 = vmatprep.mubr.bf16.mxu1 %v6608_v29 }
 0x175   : > { %v1124_v34 = vpop.f32.mrb[46].mxu0  ;;  %2504 = vmatmul.mubr.bf16.gmra.mrb[8].mxu1 %v6605_v28 }
 0x176   : > { %v1310_v35 = vmax.f32 %v6611_v31, 0.0  ;;  %v6617_v37 = vadd.f32 %v6468_v32, %v1124_v34  ;;  %v1126_v39 = vpop.f32.mrb[47].mxu0 }
 0x178   : > { %v6622_v41 = vpack.c.bf16 %v1310_v35, %v6598_v23  ;;  %v1311_v42 = vmax.f32 %v6617_v37, 0.0 }
 0x17a   : > { %v6628_v45 = vpack.c.bf16 %v1311_v42, %v6602_v27 }
 0x17b   : > { %v1129_v50 = vpop.f32.mrb[48].mxu0 }
 0x17c   : > { %v1130_v53 = vadd.f32 %v6468_v32, %v1129_v50  ;;  %v1131_v54 = vpop.f32.mrb[49].mxu0 }
 0x17d   : > { %v1132_v57 = vpop.f32.mrb[50].mxu0 }
 0x17e   : > { %v1312_v58 = vmax.f32 %v1130_v53, 0.0  ;;  %v1133_v59 = vadd.f32 %v6468_v32, %v1132_v57  ;;  %v1134_v63 = vpop.f32.mrb[51].mxu0 }
 0x180   : > { %v6634_v1 = vpack.c.bf16 %v1312_v58, %v1300_v43  ;;  %v1313_v3 = vmax.f32 %v1133_v59, 0.0 }
 0x182   : > { %v6640_v5 = vpack.c.bf16 %v1313_v3, %v1301_v47 }
 0x183   : > { %v1137_v7 = vpop.f32.mrb[52].mxu0 }
 0x184   : > { %v1138_v9 = vadd.f32 %v6468_v32, %v1137_v7  ;;  %v1139_v10 = vpop.f32.mrb[53].mxu0 }
 0x185   : > { %v1140_v11 = vpop.f32.mrb[54].mxu0 }
 0x186   : > { %v1314_v40 = vmax.f32 %v1138_v9, 0.0  ;;  %v1141_v43 = vadd.f32 %v6468_v32, %v1140_v11  ;;  %v1142_v13 = vpop.f32.mrb[55].mxu0 }
 0x188   : > { %v6646_v55 = vpack.c.bf16 %v1314_v40, %v1312_v58  ;;  %v1315_v49 = vmax.f32 %v1141_v43, 0.0  ;;  %v6648_v44 = vpack.c.bf16 %v1314_v40, %v1302_v12 }
 0x18a   : > { %v6650_v47 = vpack.c.bf16 %v1315_v49, %v1303_v51  ;;  %v6652_v14 = vpack.c.bf16 %v1315_v49, %v1313_v3 }
 0x18b   : > { %v1145_v52 = vpop.f32.mrb[56].mxu0 }
 0x18c   : > { %v1146_v0 = vadd.f32 %v6468_v32, %v1145_v52  ;;  %v1147_v15 = vpop.f32.mrb[57].mxu0 }
 0x18d   : > { %v1148_v61 = vpop.f32.mrb[58].mxu0 }
 0x18e   : > { %v6655_v18 = vmax.f32 %v1146_v0, 0.0  ;;  %v1149_v19 = vadd.f32 %v6468_v32, %v1148_v61  ;;  %v1150_v20 = vpop.f32.mrb[59].mxu0 }
 0x190   : > { %v6658_v21 = vmax.f32 %v1149_v19, 0.0  ;;  %v6661_v22 = vpack.c.bf16 %v6655_v18, %v1314_v40 }
 0x192   : > { %v6664_v24 = vpack.c.bf16 %v6658_v21, %v1315_v49 }
 0x193   : > { %v1153_v25 = vpop.f32.mrb[60].mxu0 }
 0x194   : > { %v6667_v26 = vadd.f32 %v6468_v32, %v1153_v25  ;;  %v1155_v30 = vpop.f32.mrb[61].mxu0 }
 0x195   : > { %v1156_v33 = vpop.f32.mrb[62].mxu0 }
 0x196   : > { %v1318_v34 = vmax.f32 %v6667_v26, 0.0  ;;  %v6671_v39 = vadd.f32 %v6468_v32, %v1156_v33  ;;  %v1158_v50 = vpop.f32.mrb[63].mxu0 }
 0x198   : > { %v6676_v53 = vpack.c.bf16 %v1318_v34, %v6655_v18  ;;  %v1319_v54 = vmax.f32 %v6671_v39, 0.0  ;;  %v5995_v39 = vld [vmem:[%s7852_s3 + $0x128] sm:$0xff]  }
 0x19a   : > { %v6682_v57 = vpack.c.bf16 %v1319_v54, %v6658_v21 }
 0x19b   : > { %v1161_v58 = vpop.f32.mrb[64].mxu0 }
 0x19c   : > { %v1162_v59 = vadd.f32 %v6468_v32, %v1161_v58  ;;  %v1163_v63 = vpop.f32.mrb[65].mxu0 }
 0x19d   : > { %v1164_v3 = vpop.f32.mrb[66].mxu0 }
 0x19e   : > { %v1320_v4 = vmax.f32 %v1162_v59, 0.0  ;;  %v1165_v7 = vadd.f32 %v6468_v32, %v1164_v3  ;;  %v1166_v8 = vpop.f32.mrb[67].mxu0 }
 0x1a0   : > { %v6687_v9 = vpack.c.bf16 %v1320_v4, %v6598_v23  ;;  %v1321_v10 = vmax.f32 %v1165_v7, 0.0 }
 0x1a2   : > { %v6690_v11 = vpack.c.bf16 %v1321_v10, %v6602_v27 }
 0x1a3   : > { %v1169_v12 = vpop.f32.mrb[68].mxu0 }
 0x1a4   : > { %v1170_v40 = vadd.f32 %v6468_v32, %v1169_v12  ;;  %v1171_v43 = vpop.f32.mrb[69].mxu0 }
 0x1a5   : > { %v1172_v13 = vpop.f32.mrb[70].mxu0 }
 0x1a6   : > { %v1322_v51 = vmax.f32 %v1170_v40, 0.0  ;;  %v1173_v49 = vadd.f32 %v6468_v32, %v1172_v13  ;;  %v1174_v52 = vpop.f32.mrb[71].mxu0 }
 0x1a7   : > { %v5986_v52 = vld [vmem:[%s7852_s3 + $0x148] sm:$0xff]  }
 0x1a8   : > { %v1323_v0 = vmax.f32 %v1173_v49, 0.0  ;;  %v1396_v15 = vpack.c.bf16 %v1322_v51, %v1320_v4  ;;  %v6696_v61 = vpack.c.bf16 %v1322_v51, %v1310_v35 }
 0x1aa   : > { %v1397_v23 = vpack.c.bf16 %v1323_v0, %v1321_v10  ;;  %v6700_v27 = vpack.c.bf16 %v1323_v0, %v1311_v42 }
 0x1ab   : > { %v1177_v19 = vpop.f32.mrb[72].mxu0 }
 0x1ac   : > { %v1178_v20 = vadd.f32 %v6468_v32, %v1177_v19  ;;  %v1179_v25 = vpop.f32.mrb[73].mxu0  ;;  %2511 = vmatprep.mubr.bf16.mxu1 %v1397_v23 }
 0x1ad   : > { %v1180_v30 = vpop.f32.mrb[74].mxu0  ;;  %2512 = vmatmul.mubr.bf16.gmra.mrb[12].mxu1 %v1396_v15  ;;  %v5987_v25 = vld [vmem:[%s7852_s3 + $0x108] sm:$0xff]  }
 0x1ae   : > { %v6703_v33 = vmax.f32 %v1178_v20, 0.0  ;;  %v1181_v50 = vadd.f32 %v6468_v32, %v1180_v30  ;;  %v1182_v58 = vpop.f32.mrb[75].mxu0  ;;  %v5988_v30 = vld [vmem:[%s7852_s3 + $0x150] sm:$0xff]  }
 0x1b0   : > { %v6706_v31 = vmax.f32 %v1181_v50, 0.0  ;;  %v6709_v35 = vpack.c.bf16 %v6703_v33, %v1322_v51  ;;  %v1408_v63 = vpack.c.bf16 %v6703_v33, %v6703_v33  ;;  %v5984_v51 = vld [vmem:[%s7852_s3 + $0x100] sm:$0xff]  }
 0x1b2   : > { %v1409_v37 = vpack.c.bf16 %v6706_v31, %v6706_v31  ;;  %v6714_v42 = vpack.c.bf16 %v6706_v31, %v1323_v0 }
 0x1b3   : > { %v1185_v59 = vpop.f32.mrb[76].mxu0 }
 0x1b4   : > { %v1186_v3 = vadd.f32 %v6468_v32, %v1185_v59  ;;  %v1187_v4 = vpop.f32.mrb[77].mxu0  ;;  %2519 = vmatprep.mubr.bf16.mxu1 %v1409_v37  ;;  %v5990_v59 = vld [vmem:[%s7852_s3 + $0x158] sm:$0xff]  }
 0x1b5   : > { %v1188_v7 = vpop.f32.mrb[78].mxu0  ;;  %2520 = vmatmul.mubr.bf16.gmra.mrb[16].mxu1 %v1408_v63 }
 0x1b6   : > { %v6719_v8 = vmax.f32 %v1186_v3, 0.0  ;;  %v1189_v10 = vadd.f32 %v6468_v32, %v1188_v7  ;;  %2559 = vmatprep.mubr.bf16.mxu1 %v6502_v62  ;;  %v1190_v12 = vpop.f32.mrb[79].mxu0  ;;  %v5991_v7 = vld [vmem:[%s7852_s3 + $0x118] sm:$0xff]  }
 0x1b7   : > { %v5992_v12 = vld [vmem:[%s7852_s3 + $0x160] sm:$0xff]  }
 0x1b8   : > { %v1390_v40 = vpack.c.bf16 %v6719_v8, %v6703_v33  ;;  %v6725_v43 = vmax.f32 %v1189_v10, 0.0  ;;  %v6063_v33 = vld [vmem:[%s7852_s3 + $0x370] sm:$0xff]  }
 0x1ba   : > { %v1391_v13 = vpack.c.bf16 %v6725_v43, %v6706_v31 }
 0x1bb   : > { %v1193_v49 = vpop.f32.mrb[80].mxu0 }
 0x1bc   : > { %v1194_v62 = vadd.f32 %v6468_v32, %v1193_v49  ;;  %v1195_v0 = vpop.f32.mrb[81].mxu0 }
 0x1bd   : > { %v1196_v15 = vpop.f32.mrb[82].mxu0  ;;  %2560 = vmatmul.mubr.bf16.vlgmr.msra.gmra.mrb[20].mxu1 %v6497_v60  ;;  %v5994_v0 = vld [vmem:[%s7852_s3 + $0x168] sm:$0xff]  }
 0x1be   : > { %v1328_v23 = vmax.f32 %v1194_v62, 0.0  ;;  %v1197_v19 = vadd.f32 %v6468_v32, %v1196_v15  ;;  %5395 = vmatpush3.bf16.msra.mxu1 %v5984_v51  ;;  %2567 = vmatprep.mubr.bf16.mxu1 %v6592_v6  ;;  %v1198_v20 = vpop.f32.mrb[83].mxu0  ;;  %v5989_v6 = vld [vmem:[%s7852_s3 + $0x110] sm:$0xff]  }
 0x1bf   : > { %5396 = vmatprep.subr.bf16.mxu1 %v5986_v52 }
 0x1c0   : > { %v6746_v50 = vpack.c.bf16 %v1328_v23, %v6655_v18  ;;  %v1329_v60 = vmax.f32 %v1197_v19, 0.0 }
 0x1c2   : > { %v6749_v58 = vpack.c.bf16 %v1329_v60, %v6658_v21  ;;  %5397 = vmatpush3.bf16.msra.mxu1 %v5987_v25  ;;  %v5996_v25 = vld [vmem:[%s7852_s3 + $0x170] sm:$0xff]  }
 0x1c3   : > { %v1201_v37 = vpop.f32.mrb[84].mxu0  ;;  %5398 = vmatprep.subr.bf16.mxu1 %v5988_v30 }
 0x1c4   : > { %v1202_v63 = vadd.f32 %v6468_v32, %v1201_v37  ;;  %v1203_v3 = vpop.f32.mrb[85].mxu0 }
 0x1c5   : > { %v1204_v18 = vpop.f32.mrb[86].mxu0  ;;  %2568 = vmatmul.mubr.bf16.gmra.mrb[24].mxu1 %v6590_v16 }
 0x1c6   : > { %v1330_v4 = vmax.f32 %v1202_v63, 0.0  ;;  %v1205_v21 = vadd.f32 %v6468_v32, %v1204_v18  ;;  %2575 = vmatprep.mubr.bf16.mxu1 %v6628_v45  ;;  %5399 = vmatpush3.bf16.msra.mxu1 %v5989_v6  ;;  %v1206_v10 = vpop.f32.mrb[87].mxu0  ;;  %v5993_v45 = vld [vmem:[%s7852_s3 + $0x120] sm:$0xff]   ;;  %v5997_v6 = vld [vmem:[%s7852_s3 + $0x130] sm:$0xff]  }
 0x1c7   : > { %5400 = vmatprep.subr.bf16.mxu1 %v5990_v59  ;;  %v5998_v59 = vld [vmem:[%s7852_s3 + $0x178] sm:$0xff]  }
 0x1c8   : > { %v1331_v51 = vmax.f32 %v1205_v21, 0.0  ;;  %v6767_v49 = vpack.c.bf16 %v1330_v4, %v1328_v23  ;;  %v6771_v16 = vpack.c.bf16 %v1330_v4, %v1318_v34  ;;  %v5999_v21 = vld [vmem:[%s7852_s3 + $0x138] sm:$0xff]  }
 0x1ca   : > { %5401 = vmatpush3.bf16.msra.mxu1 %v5991_v7  ;;  %v6776_v52 = vpack.c.bf16 %v1331_v51, %v1329_v60  ;;  %v6780_v62 = vpack.c.bf16 %v1331_v51, %v1319_v54  ;;  %v1411_v60 = vpack.c.bf16 %v6725_v43, %v6725_v43  ;;  %v6061_v43 = vld [vmem:[%s7852_s3 + $0x368] sm:$0xff]  }
 0x1cb   : > { %5402 = vmatprep.subr.bf16.mxu1 %v5992_v12  ;;  %v1209_v15 = vpop.f32.mrb[88].mxu0 }
 0x1cc   : > { %v1210_v26 = vadd.f32 %v6468_v32, %v1209_v15  ;;  %v1211_v34 = vpop.f32.mrb[89].mxu0 }
 0x1cd   : > { %2576 = vmatmul.mubr.bf16.gmra.mrb[28].mxu1 %v6622_v41  ;;  %v1212_v23 = vpop.f32.mrb[90].mxu0 }
 0x1ce   : > { %2583 = vmatprep.mubr.bf16.mxu1 %v6714_v42  ;;  %5403 = vmatpush3.bf16.msra.mxu1 %v5993_v45  ;;  %v6791_v54 = vmax.f32 %v1210_v26, 0.0  ;;  %v1213_v19 = vadd.f32 %v6468_v32, %v1212_v23  ;;  %v1214_v20 = vpop.f32.mrb[91].mxu0  ;;  %v1410_v26 = vpack.c.bf16 %v6719_v8, %v6719_v8 }
 0x1cf   : > { %5404 = vmatprep.subr.bf16.mxu1 %v5994_v0 }
 0x1d0   : > { %v6797_v30 = vmax.f32 %v1213_v19, 0.0  ;;  %v6800_v41 = vpack.c.bf16 %v6791_v54, %v1330_v4 }
 0x1d2   : > { %5405 = vmatpush3.bf16.msra.mxu1 %v5995_v39  ;;  %v6808_v37 = vpack.c.bf16 %v6797_v30, %v1331_v51  ;;  %v6000_v51 = vld [vmem:[%s7852_s3 + $0x1c0] sm:$0xff]  }
 0x1d3   : > { %5406 = vmatprep.subr.bf16.mxu1 %v5996_v25  ;;  %v1217_v63 = vpop.f32.mrb[92].mxu0  ;;  %v6001_v25 = vld [vmem:[%s7852_s3 + $0x180] sm:$0xff]  }
 0x1d4   : > { %v1218_v3 = vadd.f32 %v6468_v32, %v1217_v63  ;;  %v1219_v18 = vpop.f32.mrb[93].mxu0 }
 0x1d5   : > { %2584 = vmatmul.mubr.bf16.gmra.mrb[32].mxu1 %v6709_v35  ;;  %v1220_v4 = vpop.f32.mrb[94].mxu0 }
 0x1d6   : > { %2591 = vmatprep.mubr.bf16.mxu1 %v1411_v60  ;;  %5407 = vmatpush3.bf16.msra.mxu1 %v5997_v6  ;;  %v6818_v7 = vmax.f32 %v1218_v3, 0.0  ;;  %v1221_v10 = vadd.f32 %v6468_v32, %v1220_v4  ;;  %v1222_v12 = vpop.f32.mrb[95].mxu0  ;;  %v6002_v6 = vld [vmem:[%s7852_s3 + $0x1c8] sm:$0xff]  }
 0x1d7   : > { %5408 = vmatprep.subr.bf16.mxu1 %v5998_v59  ;;  %v6003_v4 = vld [vmem:[%s7852_s3 + $0x188] sm:$0xff]  }
 0x1d8   : > { %v1394_v45 = vpack.c.bf16 %v6818_v7, %v6791_v54  ;;  %v6826_v0 = vmax.f32 %v1221_v10, 0.0 }
 0x1da   : > { %5409 = vmatpush3.bf16.msra.mxu1 %v5999_v21  ;;  %v1395_v15 = vpack.c.bf16 %v6826_v0, %v6797_v30 }
 0x1db   : > { %5440 = vmatprep.subr.bf16.mxu1 %v6000_v51  ;;  %v1225_v34 = vpop.f32.mrb[96].mxu0 }
 0x1dc   : > { %v1227_v23 = vpop.f32.mrb[97].mxu0  ;;  %v1226_v20 = vadd.f32 %v6468_v32, %v1225_v34 }
 0x1dd   : > { %2592 = vmatmul.mubr.bf16.gmra.mrb[36].mxu1 %v1410_v26  ;;  %v1228_v39 = vpop.f32.mrb[98].mxu0  ;;  %v6004_v26 = vld [vmem:[%s7852_s3 + $0x1d0] sm:$0xff]  }
 0x1de   : > { %2631 = vmatprep.mubr.bf16.mxu1 %v6554_v38  ;;  %v1230_v19 = vpop.f32.mrb[99].mxu0  ;;  %v1229_v60 = vadd.f32 %v6468_v32, %v1228_v39  ;;  %v1336_v63 = vmax.f32 %v1226_v20, 0.0  ;;  %v6009_v39 = vld [vmem:[%s7852_s3 + $0x1d8] sm:$0xff]  }
 0x1e0   : > { %v1337_v21 = vmax.f32 %v1229_v60, 0.0 }
 0x1e3   : > { %v1233_v59 = vpop.f32.mrb[100].mxu0 }
 0x1e4   : > { %v1234_v3 = vadd.f32 %v6468_v32, %v1233_v59  ;;  %v1235_v18 = vpop.f32.mrb[101].mxu0 }
 0x1e5   : > { %2632 = vmatmul.mubr.bf16.vlgmr.msra.gmra.mrb[40].mxu1 %v6552_v36  ;;  %v1236_v38 = vpop.f32.mrb[102].mxu0  ;;  %v6011_v18 = vld [vmem:[%s7852_s3 + $0x1e0] sm:$0xff]  }
 0x1e6   : > { %5441 = vmatpush3.bf16.msra.mxu1 %v6001_v25  ;;  %2639 = vmatprep.mubr.bf16.mxu1 %v6640_v5  ;;  %v1338_v10 = vmax.f32 %v1234_v3, 0.0  ;;  %v1237_v12 = vadd.f32 %v6468_v32, %v1236_v38  ;;  %v1238_v51 = vpop.f32.mrb[103].mxu0  ;;  %v6007_v5 = vld [vmem:[%s7852_s3 + $0x190] sm:$0xff]  }
 0x1e7   : > { %5442 = vmatprep.subr.bf16.mxu1 %v6002_v6  ;;  %v6010_v6 = vld [vmem:[%s7852_s3 + $0x198] sm:$0xff]  }
 0x1e8   : > { %v6851_v34 = vpack.c.bf16 %v1338_v10, %v1336_v63  ;;  %v1339_v36 = vmax.f32 %v1237_v12, 0.0  ;;  %v6013_v12 = vld [vmem:[%s7852_s3 + $0x1e8] sm:$0xff]  }
 0x1ea   : > { %5443 = vmatpush3.bf16.msra.mxu1 %v6003_v4  ;;  %v6856_v23 = vpack.c.bf16 %v1339_v36, %v1337_v21  ;;  %v6012_v4 = vld [vmem:[%s7852_s3 + $0x1a0] sm:$0xff]  }
 0x1eb   : > { %5444 = vmatprep.subr.bf16.mxu1 %v6004_v26  ;;  %v1241_v19 = vpop.f32.mrb[104].mxu0 }
 0x1ec   : > { %v1242_v20 = vadd.f32 %v6468_v32, %v1241_v19  ;;  %v1243_v25 = vpop.f32.mrb[105].mxu0  ;;  %v1413_v19 = vpack.c.bf16 %v6797_v30, %v6797_v30 }
 0x1ed   : > { %2640 = vmatmul.mubr.bf16.gmra.mrb[44].mxu1 %v6634_v1  ;;  %v1244_v60 = vpop.f32.mrb[106].mxu0  ;;  %v6018_v25 = vld [vmem:[%s7852_s3 + $0x1b8] sm:$0xff]  }
 0x1ee   : > { %2647 = vmatprep.mubr.bf16.mxu1 %v6664_v24  ;;  %5445 = vmatpush3.bf16.msra.mxu1 %v6007_v5  ;;  %v6867_v59 = vmax.f32 %v1242_v20, 0.0  ;;  %v1245_v63 = vadd.f32 %v6468_v32, %v1244_v60  ;;  %v1246_v3 = vpop.f32.mrb[107].mxu0  ;;  %v6016_v20 = vld [vmem:[%s7852_s3 + $0x1b0] sm:$0xff]   ;;  %v6019_v60 = vld [vmem:[%s7852_s3 + $0x240] sm:$0xff]  }
 0x1ef   : > { %5446 = vmatprep.subr.bf16.mxu1 %v6009_v39  ;;  %v6015_v39 = vld [vmem:[%s7852_s3 + $0x1f0] sm:$0xff]  }
 0x1f0   : > { %v6874_v1 = vpack.c.bf16 %v6867_v59, %v1338_v10  ;;  %v6876_v38 = vmax.f32 %v1245_v63, 0.0 }
 0x1f2   : > { %5447 = vmatpush3.bf16.msra.mxu1 %v6010_v6  ;;  %v6882_v21 = vpack.c.bf16 %v6876_v38, %v1339_v36  ;;  %v6014_v36 = vld [vmem:[%s7852_s3 + $0x1a8] sm:$0xff]  }
 0x1f3   : > { %5448 = vmatprep.subr.bf16.mxu1 %v6011_v18  ;;  %v6887_v51 = vpop.f32.mrb[108].mxu0 }
 0x1f4   : > { %v1251_v26 = vpop.f32.mrb[109].mxu0 }
 0x1f5   : > { %2648 = vmatmul.mubr.bf16.gmra.mrb[48].mxu1 %v6661_v22  ;;  %v6890_v10 = vpop.f32.mrb[110].mxu0 }
 0x1f6   : > { %2655 = vmatprep.mubr.bf16.mxu1 %v6776_v52  ;;  %5449 = vmatpush3.bf16.msra.mxu1 %v6012_v4  ;;  %v1254_v5 = vpop.f32.mrb[111].mxu0  ;;  %v6017_v52 = vld [vmem:[%s7852_s3 + $0x1f8] sm:$0xff]  }
 0x1f7   : > { %5450 = vmatprep.subr.bf16.mxu1 %v6013_v12 }
 0x1fa   : > { %5451 = vmatpush3.bf16.msra.mxu1 %v6014_v36 }
 0x1fb   : > { %5452 = vmatprep.subr.bf16.mxu1 %v6015_v39  ;;  %v1257_v26 = vpop.f32.mrb[112].mxu0 }
 0x1fc   : > { %v1258_v36 = vadd.f32 %v6468_v32, %v1257_v26  ;;  %v1259_v5 = vpop.f32.mrb[113].mxu0 }
 0x1fd   : > { %2656 = vmatmul.mubr.bf16.gmra.mrb[52].mxu1 %v6767_v49  ;;  %v1412_v49 = vpack.c.bf16 %v6791_v54, %v6791_v54  ;;  %v1260_v39 = vpop.f32.mrb[114].mxu0  ;;  %v6071_v5 = vld [vmem:[%s7854_s5 + $0x40] sm:$0xff]  }
 0x1fe   : > { %2663 = vmatprep.mubr.bf16.mxu1 %v1413_v19  ;;  %5453 = vmatpush3.bf16.msra.mxu1 %v6016_v20  ;;  %v1261_v19 = vadd.f32 %v6468_v32, %v1260_v39  ;;  %v1262_v20 = vpop.f32.mrb[115].mxu0 }
 0x1ff   : > { %5454 = vmatprep.subr.bf16.mxu1 %v6017_v52  ;;  %5670 = vmatprep.subr.bf16.mxu0 %v6071_v5 }
 0x200   : > { %v5318_v6 = vpop.f32.mrb[0].mxu1 }
 0x201   : > { %v5319_v63 = vpop.f32.mrb[1].mxu1 }
 0x202   : > { %v6914_v3 = vadd.f32 %v5319_v63, %v5318_v6  ;;  %v5321_v18 = vpop.f32.mrb[2].mxu1  ;;  %5455 = vmatpush3.bf16.msra.mxu1 %v6018_v25  ;;  %v6020_v25 = vld [vmem:[%s7852_s3 + $0x200] sm:$0xff]   ;;  %v1344_v6 = vmax.f32 %v1258_v36, 0.0 }
 0x203   : > { %v5322_v4 = vpop.f32.mrb[3].mxu1  ;;  %5486 = vmatprep.subr.bf16.mxu1 %v6019_v60  ;;  %v1265_v52 = vpop.f32.mrb[116].mxu0  ;;  %v6072_v36 = vld [vmem:[%s7854_s5] sm:$0xff]  }
 0x204   : > { %v6918_v12 = vadd.f32 %v5322_v4, %v5321_v18  ;;  %v1266_v60 = vadd.f32 %v6468_v32, %v1265_v52  ;;  %v1267_v63 = vpop.f32.mrb[117].mxu0  ;;  %v1345_v4 = vmax.f32 %v1261_v19, 0.0  ;;  %v6022_v19 = vld [vmem:[%s7852_s3 + $0x208] sm:$0xff]   ;;  %5671 = vmatpush3.bf16.msra.mxu0 %v6072_v36 }
 0x205   : > { %2664 = vmatmul.mubr.bf16.gmra.mrb[56].mxu1 %v1412_v49  ;;  %v1268_v18 = vpop.f32.mrb[118].mxu0 }
 0x206   : > { %2703 = vmatprep.mubr.bf16.mxu1 %v6570_v48  ;;  %v6021_v48 = vld [vmem:[%s7852_s3 + $0x248] sm:$0xff]   ;;  %v1346_v49 = vmax.f32 %v1266_v60, 0.0  ;;  %v1269_v26 = vadd.f32 %v6468_v32, %v1268_v18  ;;  %v1270_v39 = vpop.f32.mrb[119].mxu0  ;;  %v6023_v60 = vld [vmem:[%s7852_s3 + $0x250] sm:$0xff]  }
 0x207   : > { %v6026_v39 = vld [vmem:[%s7852_s3 + $0x218] sm:$0xff]  }
 0x208   : > { %v6942_v20 = vpack.c.bf16 %v1346_v49, %v1344_v6  ;;  %v1347_v52 = vmax.f32 %v1269_v26, 0.0 }
 0x20b   : > { %v1273_v63 = vpop.f32.mrb[120].mxu0 }
 0x20c   : > { %v1275_v6 = vpop.f32.mrb[121].mxu0 }
 0x20d   : > { %2704 = vmatmul.mubr.bf16.vlgmr.msra.gmra.mrb[60].mxu1 %v6565_v46  ;;  %v6947_v46 = vpack.c.bf16 %v1347_v52, %v1345_v4  ;;  %v1276_v18 = vpop.f32.mrb[122].mxu0  ;;  %v6035_v6 = vld [vmem:[%s7852_s3 + $0x2c0] sm:$0xff]  }
 0x20e   : > { %5487 = vmatpush3.bf16.msra.mxu1 %v6020_v25  ;;  %2711 = vmatprep.mubr.bf16.mxu1 %v6650_v47  ;;  %v6024_v47 = vld [vmem:[%s7852_s3 + $0x210] sm:$0xff]   ;;  %v1274_v25 = vadd.f32 %v6468_v32, %v1273_v63  ;;  %v1277_v4 = vadd.f32 %v6468_v32, %v1276_v18  ;;  %v1278_v5 = vpop.f32.mrb[123].mxu0  ;;  %v6027_v32 = vld [vmem:[%s7852_s3 + $0x260] sm:$0xff]   ;;  %v1415_v63 = vpack.c.bf16 %v6826_v0, %v6826_v0  ;;  %v6085_v18 = vld [vmem:[%s7854_s5 + $0x48] sm:$0xff]  }
 0x20f   : > { %5488 = vmatprep.subr.bf16.mxu1 %v6021_v48  ;;  %v6025_v48 = vld [vmem:[%s7852_s3 + $0x258] sm:$0xff]   ;;  %5672 = vmatprep.subr.bf16.mxu0 %v6085_v18  ;;  %v6036_v5 = vld [vmem:[%s7852_s3 + $0x280] sm:$0xff]  }
 0x210   : > { %v6956_v26 = vmax.f32 %v1274_v25, 0.0  ;;  %v6034_v25 = vld [vmem:[%s7852_s3 + $0x238] sm:$0xff]  }
 0x212   : > { %5489 = vmatpush3.bf16.msra.mxu1 %v6022_v19  ;;  %v6965_v36 = vpack.c.bf16 %v6956_v26, %v1346_v49  ;;  %v6967_v19 = vmax.f32 %v1277_v4, 0.0  ;;  %v6030_v49 = vld [vmem:[%s7852_s3 + $0x228] sm:$0xff]  }
 0x213   : > { %5490 = vmatprep.subr.bf16.mxu1 %v6023_v60  ;;  %v6086_v4 = vld [vmem:[%s7854_s5 + $0x8] sm:$0xff]  }
 0x214   : > { %v6973_v60 = vpack.c.bf16 %v6967_v19, %v1347_v52  ;;  %v6031_v52 = vld [vmem:[%s7852_s3 + $0x270] sm:$0xff]   ;;  %5673 = vmatpush3.bf16.msra.mxu0 %v6086_v4  ;;  %v6046_v4 = vld [vmem:[%s7852_s3 + $0x2a8] sm:$0xff]  }
 0x215   : > { %2712 = vmatmul.mubr.bf16.gmra.mrb[64].mxu1 %v6648_v44  ;;  %v6028_v44 = vld [vmem:[%s7852_s3 + $0x220] sm:$0xff]  }
 0x216   : > { %2719 = vmatprep.mubr.bf16.mxu1 %v6682_v57  ;;  %5491 = vmatpush3.bf16.msra.mxu1 %v6024_v47  ;;  %v6029_v57 = vld [vmem:[%s7852_s3 + $0x268] sm:$0xff]   ;;  %v6033_v47 = vld [vmem:[%s7852_s3 + $0x278] sm:$0xff]  }
 0x217   : > { %5492 = vmatprep.subr.bf16.mxu1 %v6025_v48  ;;  %v1414_v48 = vpack.c.bf16 %v6818_v7, %v6818_v7 }
 0x21a   : > { %5493 = vmatpush3.bf16.msra.mxu1 %v6026_v39  ;;  %v6037_v39 = vld [vmem:[%s7852_s3 + $0x2c8] sm:$0xff]  }
 0x21b   : > { %5494 = vmatprep.subr.bf16.mxu1 %v6027_v32  ;;  %v6039_v32 = vld [vmem:[%s7852_s3 + $0x2d0] sm:$0xff]  }
 0x21d   : > { %2720 = vmatmul.mubr.bf16.gmra.mrb[68].mxu1 %v6676_v53  ;;  %v6032_v53 = vld [vmem:[%s7852_s3 + $0x230] sm:$0xff]  }
 0x21e   : > { %2727 = vmatprep.mubr.bf16.mxu1 %v6808_v37  ;;  %5495 = vmatpush3.bf16.msra.mxu1 %v6028_v44 }
 0x21f   : > { %5496 = vmatprep.subr.bf16.mxu1 %v6029_v57 }
 0x222   : > { %5497 = vmatpush3.bf16.msra.mxu1 %v6030_v49 }
 0x223   : > { %5498 = vmatprep.subr.bf16.mxu1 %v6031_v52 }
 0x225   : > { %2728 = vmatmul.mubr.bf16.gmra.mrb[72].mxu1 %v6800_v41 }
 0x226   : > { %2735 = vmatprep.mubr.bf16.mxu1 %v1415_v63  ;;  %5499 = vmatpush3.bf16.msra.mxu1 %v6032_v53  ;;  %v6041_v63 = vld [vmem:[%s7852_s3 + $0x2d8] sm:$0xff]  }
 0x227   : > { %5500 = vmatprep.subr.bf16.mxu1 %v6033_v47  ;;  %v6042_v47 = vld [vmem:[%s7852_s3 + $0x298] sm:$0xff]  }
 0x22a   : > { %5501 = vmatpush3.bf16.msra.mxu1 %v6034_v25  ;;  %v6043_v25 = vld [vmem:[%s7852_s3 + $0x2e0] sm:$0xff]  }
 0x22b   : > { %5532 = vmatprep.subr.bf16.mxu1 %v6035_v6  ;;  %v6044_v6 = vld [vmem:[%s7852_s3 + $0x2a0] sm:$0xff]  }
 0x22d   : > { %2736 = vmatmul.mubr.bf16.gmra.mrb[76].mxu1 %v1414_v48 }
 0x22e   : > { %2775 = vmatprep.mubr.bf16.mxu1 %v6594_v17  ;;  %v6038_v17 = vld [vmem:[%s7852_s3 + $0x288] sm:$0xff]  }
 0x235   : > { %2776 = vmatmul.mubr.bf16.vlgmr.msra.gmra.mrb[80].mxu1 %v6588_v56  ;;  %v6040_v56 = vld [vmem:[%s7852_s3 + $0x290] sm:$0xff]  }
 0x236   : > { %5533 = vmatpush3.bf16.msra.mxu1 %v6036_v5  ;;  %2783 = vmatprep.mubr.bf16.mxu1 %v6690_v11 }
 0x237   : > { %5534 = vmatprep.subr.bf16.mxu1 %v6037_v39  ;;  %v6047_v39 = vld [vmem:[%s7852_s3 + $0x2f0] sm:$0xff]  }
 0x238   : > { %v5324_v44 = vpop.f32.mrb[4].mxu1 }
 0x239   : > { %v5325_v57 = vpop.f32.mrb[5].mxu1 }
 0x23a   : > { %v7027_v49 = vadd.f32 %v5325_v57, %v5324_v44  ;;  %v5327_v52 = vpop.f32.mrb[6].mxu1  ;;  %5535 = vmatpush3.bf16.msra.mxu1 %v6038_v17 }
 0x23b   : > { %v5328_v11 = vpop.f32.mrb[7].mxu1  ;;  %5536 = vmatprep.subr.bf16.mxu1 %v6039_v32 }
 0x23c   : > { %v7035_v53 = vadd.f32 %v5328_v11, %v5327_v52 }
 0x23d   : > { %2784 = vmatmul.mubr.bf16.gmra.mrb[84].mxu1 %v6687_v9  ;;  %v6045_v9 = vld [vmem:[%s7852_s3 + $0x2e8] sm:$0xff]  }
 0x23e   : > { %2791 = vmatprep.mubr.bf16.mxu1 %v6714_v42  ;;  %5537 = vmatpush3.bf16.msra.mxu1 %v6040_v56  ;;  %v7051_v42 = vpop.f32.mrb[124].mxu0  ;;  %v6049_v56 = vld [vmem:[%s7852_s3 + $0x2f8] sm:$0xff]  }
 0x23f   : > { %5538 = vmatprep.subr.bf16.mxu1 %v6041_v63  ;;  %v1283_v48 = vpop.f32.mrb[125].mxu0  ;;  %v6087_v63 = vld [vmem:[%s7854_s5 + $0x50] sm:$0xff]  }
 0x240   : > { %v7054_v18 = vpop.f32.mrb[126].mxu0  ;;  %5674 = vmatprep.subr.bf16.mxu0 %v6087_v63  ;;  %v6056_v48 = vld [vmem:[%s7852_s3 + $0x310] sm:$0xff]   ;;  %v6068_v63 = vld [vmem:[%s7852_s3 + $0x380] sm:$0xff]  }
 0x241   : > { %v1286_v5 = vpop.f32.mrb[127].mxu0 }
 0x242   : > { %5539 = vmatpush3.bf16.msra.mxu1 %v6042_v47  ;;  %v6088_v47 = vld [vmem:[%s7854_s5 + $0x10] sm:$0xff]   ;;  %v6060_v5 = vld [vmem:[%s7852_s3 + $0x320] sm:$0xff]  }
 0x243   : > { %5540 = vmatprep.subr.bf16.mxu1 %v6043_v25  ;;  %v6051_v25 = vld [vmem:[%s7852_s3 + $0x340] sm:$0xff]   ;;  %5675 = vmatpush3.bf16.msra.mxu0 %v6088_v47 }
 0x245   : > { %2792 = vmatmul.mubr.bf16.gmra.mrb[88].mxu1 %v6709_v35  ;;  %v1417_v35 = vpack.c.bf16 %v6876_v38, %v6876_v38  ;;  %v6050_v38 = vld [vmem:[%s7852_s3 + $0x2b8] sm:$0xff]  }
 0x246   : > { %2799 = vmatprep.mubr.bf16.mxu1 %v6856_v23  ;;  %5541 = vmatpush3.bf16.msra.mxu1 %v6044_v6  ;;  %v6048_v23 = vld [vmem:[%s7852_s3 + $0x2b0] sm:$0xff]   ;;  %v6052_v6 = vld [vmem:[%s7852_s3 + $0x300] sm:$0xff]  }
 0x247   : > { %5542 = vmatprep.subr.bf16.mxu1 %v6045_v9  ;;  %v6053_v9 = vld [vmem:[%s7852_s3 + $0x348] sm:$0xff]  }
 0x248   : > { %v5330_v17 = vpop.f32.mrb[8].mxu1 }
 0x249   : > { %v5331_v32 = vpop.f32.mrb[9].mxu1 }
 0x24a   : > { %v7065_v44 = vadd.f32 %v5331_v32, %v5330_v17  ;;  %v5333_v57 = vpop.f32.mrb[10].mxu1  ;;  %5543 = vmatpush3.bf16.msra.mxu1 %v6046_v4  ;;  %v6059_v4 = vld [vmem:[%s7852_s3 + $0x360] sm:$0xff]   ;;  %v6090_v17 = vld [vmem:[%s7854_s5 + $0x18] sm:$0xff]  }
 0x24b   : > { %v5334_v52 = vpop.f32.mrb[11].mxu1  ;;  %5544 = vmatprep.subr.bf16.mxu1 %v6047_v39  ;;  %v6062_v39 = vld [vmem:[%s7852_s3 + $0x328] sm:$0xff]   ;;  %v6065_v32 = vld [vmem:[%s7852_s3 + $0x378] sm:$0xff]  }
 0x24c   : > { %v7073_v11 = vadd.f32 %v5334_v52, %v5333_v57 }
 0x24d   : > { %2800 = vmatmul.mubr.bf16.gmra.mrb[92].mxu1 %v6851_v34  ;;  %v1416_v34 = vpack.c.bf16 %v6867_v59, %v6867_v59  ;;  %v6054_v59 = vld [vmem:[%s7852_s3 + $0x308] sm:$0xff]  }
 0x24e   : > { %2807 = vmatprep.mubr.bf16.mxu1 %v1417_v35  ;;  %5545 = vmatpush3.bf16.msra.mxu1 %v6048_v23  ;;  %v6066_v35 = vld [vmem:[%s7852_s3 + $0x338] sm:$0xff]   ;;  %v6067_v23 = vld [vmem:[%s7852_s3 + $0x3c0] sm:$0xff]  }
 0x24f   : > { %5546 = vmatprep.subr.bf16.mxu1 %v6049_v56 }
 0x252   : > { %5547 = vmatpush3.bf16.msra.mxu1 %v6050_v38 }
 0x253   : > { %5578 = vmatprep.subr.bf16.mxu1 %v6051_v25  ;;  %v6069_v25 = vld [vmem:[%s7852_s3 + $0x3c8] sm:$0xff]  }
 0x255   : > { %2808 = vmatmul.mubr.bf16.gmra.mrb[96].mxu1 %v1416_v34 }
 0x256   : > { %2847 = vmatprep.mubr.bf16.mxu1 %v6608_v29  ;;  %v6055_v29 = vld [vmem:[%s7852_s3 + $0x350] sm:$0xff]  }
 0x25d   : > { %2848 = vmatmul.mubr.bf16.vlgmr.msra.gmra.mrb[100].mxu1 %v6605_v28  ;;  %v6057_v28 = vld [vmem:[%s7852_s3 + $0x358] sm:$0xff]  }
 0x25e   : > { %5579 = vmatpush3.bf16.msra.mxu1 %v6052_v6  ;;  %2855 = vmatprep.mubr.bf16.mxu1 %v6700_v27  ;;  %v6058_v27 = vld [vmem:[%s7852_s3 + $0x318] sm:$0xff]   ;;  %v6073_v6 = vld [vmem:[%s7852_s3 + $0x3d0] sm:$0xff]  }
 0x25f   : > { %5580 = vmatprep.subr.bf16.mxu1 %v6053_v9 }
 0x262   : > { %5581 = vmatpush3.bf16.msra.mxu1 %v6054_v59 }
 0x263   : > { %5582 = vmatprep.subr.bf16.mxu1 %v6055_v29 }
 0x265   : > { %2856 = vmatmul.mubr.bf16.gmra.mrb[104].mxu1 %v6696_v61  ;;  %v7127_v61 = vld [vmem:[%s7851_s2] ss:$0 sm:$0xff] }
 0x266   : > { %2863 = vmatprep.mubr.bf16.mxu1 %v1391_v13  ;;  %5583 = vmatpush3.bf16.msra.mxu1 %v6056_v48  ;;  %v1253_v31 = vadd.f32 %v7127_v61, %v6890_v10  ;;  %v6089_v10 = vld [vmem:[%s7854_s5 + $0x58] sm:$0xff]  }
 0x267   : > { %5584 = vmatprep.subr.bf16.mxu1 %v6057_v28  ;;  %5676 = vmatprep.subr.bf16.mxu0 %v6089_v10  ;;  %v6075_v28 = vld [vmem:[%s7852_s3 + $0x3d8] sm:$0xff]  }
 0x268   : > { %v1343_v13 = vmax.f32 %v1253_v31, 0.0  ;;  %5677 = vmatpush3.bf16.msra.mxu0 %v6090_v17  ;;  %v7206_v31 = vld [vmem:[%s7853_s4] ss:$0 sm:$0xff] }
 0x269   : > { %v6078_v17 = vld [vmem:[%s7852_s3 + $0x3a0] sm:$0xff]  }
 0x26a   : > { %5585 = vmatpush3.bf16.msra.mxu1 %v6058_v27  ;;  %v1419_v8 = vpack.c.bf16 %v1343_v13, %v1343_v13  ;;  %v6076_v27 = vld [vmem:[%s7852_s3 + $0x398] sm:$0xff]   ;;  %v2490_v13 = vadd.f32 %v6914_v3, %v7206_v31 }
 0x26b   : > { %5586 = vmatprep.subr.bf16.mxu1 %v6059_v4  ;;  %v6091_v4 = vld [vmem:[%s7854_s5 + $0x60] sm:$0xff]  }
 0x26c   : > { %5678 = vmatprep.subr.bf16.mxu0 %v6091_v4 }
 0x26d   : > { %2864 = vmatmul.mubr.bf16.gmra.mrb[108].mxu1 %v1390_v40  ;;  %v6064_v40 = vld [vmem:[%s7852_s3 + $0x330] sm:$0xff]  }
 0x26e   : > { %2871 = vmatprep.mubr.bf16.mxu1 %v6882_v21  ;;  %5587 = vmatpush3.bf16.msra.mxu1 %v6060_v5  ;;  %v1250_v21 = vadd.f32 %v7127_v61, %v6887_v51  ;;  %v6092_v5 = vld [vmem:[%s7854_s5 + $0x20] sm:$0xff]  }
 0x26f   : > { %5588 = vmatprep.subr.bf16.mxu1 %v6061_v43  ;;  %5679 = vmatpush3.bf16.msra.mxu0 %v6092_v5 }
 0x270   : > { %v1342_v57 = vmax.f32 %v1250_v21, 0.0 }
 0x272   : > { %5589 = vmatpush3.bf16.msra.mxu1 %v6062_v39  ;;  %v1418_v51 = vpack.c.bf16 %v1342_v57, %v1342_v57  ;;  %v6081_v57 = vld [vmem:[%s7852_s3 + $0x3f0] sm:$0xff]  }
 0x273   : > { %5590 = vmatprep.subr.bf16.mxu1 %v6063_v33 }
 0x275   : > { %2872 = vmatmul.mubr.bf16.gmra.mrb[112].mxu1 %v6874_v1 }
 0x276   : > { %2879 = vmatprep.mubr.bf16.mxu1 %v1419_v8  ;;  %5591 = vmatpush3.bf16.msra.mxu1 %v6064_v40  ;;  %v6079_v8 = vld [vmem:[%s7852_s3 + $0x3e8] sm:$0xff]   ;;  %v2493_v40 = vadd.f32 %v6918_v12, %v7206_v31 }
 0x277   : > { %5592 = vmatprep.subr.bf16.mxu1 %v6065_v32 }
 0x27a   : > { %5593 = vmatpush3.bf16.msra.mxu1 %v6066_v35  ;;  %v6080_v35 = vld [vmem:[%s7852_s3 + $0x3a8] sm:$0xff]  }
 0x27b   : > { %5624 = vmatprep.subr.bf16.mxu1 %v6067_v23 }
 0x27d   : > { %2880 = vmatmul.mubr.bf16.gmra.mrb[116].mxu1 %v1418_v51  ;;  %v2498_v51 = vadd.f32 %v7027_v49, %v7206_v31 }
 0x27e   : > { %2919 = vmatprep.mubr.bf16.mxu1 %v6652_v14  ;;  %v6070_v14 = vld [vmem:[%s7852_s3 + $0x388] sm:$0xff]  }
 0x280   : > { %v5336_v52 = vpop.f32.mrb[12].mxu1 }
 0x281   : > { %v5337_v1 = vpop.f32.mrb[13].mxu1 }
 0x282   : > { %v7166_v56 = vadd.f32 %v5337_v1, %v5336_v52  ;;  %v5339_v38 = vpop.f32.mrb[14].mxu1  ;;  %v6082_v1 = vld [vmem:[%s7852_s3 + $0x3b0] sm:$0xff]  }
 0x283   : > { %v5340_v47 = vpop.f32.mrb[15].mxu1 }
 0x284   : > { %v7174_v34 = vadd.f32 %v5340_v47, %v5339_v38  ;;  %v2501_v47 = vadd.f32 %v7035_v53, %v7206_v31 }
 0x285   : > { %2920 = vmatmul.mubr.bf16.vlgmr.msra.gmra.mrb[120].mxu1 %v6646_v55  ;;  %v6074_v55 = vld [vmem:[%s7852_s3 + $0x390] sm:$0xff]  }
 0x286   : > { %5625 = vmatpush3.bf16.msra.mxu1 %v6068_v63  ;;  %2927 = vmatprep.mubr.bf16.mxu1 %v6749_v58  ;;  %v6083_v63 = vld [vmem:[%s7852_s3 + $0x3f8] sm:$0xff]  }
 0x287   : > { %5626 = vmatprep.subr.bf16.mxu1 %v6069_v25 }
 0x288   : > { %v5342_v9 = vpop.f32.mrb[16].mxu1 }
 0x289   : > { %v5343_v59 = vpop.f32.mrb[17].mxu1 }
 0x28a   : > { %v7184_v29 = vadd.f32 %v5343_v59, %v5342_v9  ;;  %v5345_v48 = vpop.f32.mrb[18].mxu1  ;;  %5627 = vmatpush3.bf16.msra.mxu1 %v6070_v14  ;;  %v6084_v14 = vld [vmem:[%s7852_s3 + $0x3b8] sm:$0xff]   ;;  %v2506_v59 = vadd.f32 %v7065_v44, %v7206_v31  ;;  %v2514_v44 = vadd.f32 %v7166_v56, %v7206_v31 }
 0x28b   : > { %v5346_v58 = vpop.f32.mrb[19].mxu1  ;;  %5628 = vmatprep.subr.bf16.mxu1 %v6073_v6 }
 0x28c   : > { %v2509_v58 = vadd.f32 %v7073_v11, %v7206_v31  ;;  %v6093_v11 = vld [vmem:[%s7854_s5 + $0x68] sm:$0xff]  }
 0x28d   : > { %2928 = vmatmul.mubr.bf16.gmra.mrb[124].mxu1 %v6746_v50  ;;  %v6077_v50 = vld [vmem:[%s7852_s3 + $0x3e0] sm:$0xff]   ;;  %5680 = vmatprep.subr.bf16.mxu0 %v6093_v11 }
 0x28e   : > { %2935 = vmatprep.mubr.bf16.mxu1 %v6808_v37  ;;  %5629 = vmatpush3.bf16.msra.mxu1 %v6074_v55 }
 0x28f   : > { %5630 = vmatprep.subr.bf16.mxu1 %v6075_v28 }
 0x290   : > { %v5364_v37 = vpop.f32.mrb[20].mxu1 }
 0x291   : > { %v5365_v43 = vpop.f32.mrb[21].mxu1 }
 0x292   : > { %v5366_v39 = vadd.f32 %v5365_v43, %v5364_v37  ;;  %v5367_v10 = vpop.f32.mrb[22].mxu1  ;;  %5631 = vmatpush3.bf16.msra.mxu1 %v6076_v27 }
 0x293   : > { %v5368_v33 = vpop.f32.mrb[23].mxu1  ;;  %5632 = vmatprep.subr.bf16.mxu1 %v6077_v50 }
 0x294   : > { %v7221_v21 = vadd.f32 %v5366_v39, %v2490_v13  ;;  %v5369_v32 = vadd.f32 %v5368_v33, %v5367_v10 }
 0x295   : > { %2936 = vmatmul.mubr.bf16.gmra.mrb[128].mxu1 %v6800_v41  ;;  %v1421_v41 = vpack.c.bf16 %v6967_v19, %v6967_v19 }
 0x296   : > { %v7224_v3 = vadd.f32 %v5369_v32, %v2493_v40  ;;  %2943 = vmatprep.mubr.bf16.mxu1 %v6947_v46  ;;  %5633 = vmatpush3.bf16.msra.mxu1 %v6078_v17 }
 0x297   : > { %5634 = vmatprep.subr.bf16.mxu1 %v6079_v8 }
 0x298   : > { %v5370_v12 = vpop.f32.mrb[24].mxu1 }
 0x299   : > { %v5371_v23 = vpop.f32.mrb[25].mxu1 }
 0x29a   : > { %v5372_v52 = vadd.f32 %v5371_v23, %v5370_v12  ;;  %v5373_v46 = vpop.f32.mrb[26].mxu1  ;;  %5635 = vmatpush3.bf16.msra.mxu1 %v6080_v35  ;;  %v1285_v23 = vadd.f32 %v7127_v61, %v7054_v18 }
 0x29b   : > { %v5374_v38 = vpop.f32.mrb[27].mxu1  ;;  %5636 = vmatprep.subr.bf16.mxu1 %v6081_v57 }
 0x29c   : > { %v7245_v49 = vadd.f32 %v5372_v52, %v2498_v51  ;;  %v5375_v25 = vadd.f32 %v5374_v38, %v5373_v46  ;;  %v1351_v30 = vmax.f32 %v1285_v23, 0.0 }
 0x29d   : > { %2944 = vmatmul.mubr.bf16.gmra.mrb[132].mxu1 %v6942_v20  ;;  %v1420_v20 = vpack.c.bf16 %v6956_v26, %v6956_v26  ;;  %v2517_v26 = vadd.f32 %v7174_v34, %v7206_v31  ;;  %v2522_v34 = vadd.f32 %v7184_v29, %v7206_v31 }
 0x29e   : > { %v7248_v19 = vadd.f32 %v5375_v25, %v2501_v47  ;;  %2951 = vmatprep.mubr.bf16.mxu1 %v1421_v41  ;;  %5637 = vmatpush3.bf16.msra.mxu1 %v6082_v1  ;;  %v1282_v41 = vadd.f32 %v7127_v61, %v7051_v42  ;;  %v1423_v46 = vpack.c.bf16 %v1351_v30, %v1351_v30 }
 0x29f   : > { %5638 = vmatprep.subr.bf16.mxu1 %v6083_v63 }
 0x2a0   : > { %v5376_v6 = vpop.f32.mrb[28].mxu1  ;;  %v1350_v63 = vmax.f32 %v1282_v41, 0.0 }
 0x2a1   : > { %v5377_v9 = vpop.f32.mrb[29].mxu1 }
 0x2a2   : > { %v5378_v53 = vadd.f32 %v5377_v9, %v5376_v6  ;;  %v5379_v48 = vpop.f32.mrb[30].mxu1  ;;  %5639 = vmatpush3.bf16.msra.mxu1 %v6084_v14 }
 0x2a3   : > { %v5380_v55 = vpop.f32.mrb[31].mxu1 }
 0x2a4   : > { %v2578_v28 = vadd.f32 %v5378_v53, %v2506_v59  ;;  %v5381_v27 = vadd.f32 %v5380_v55, %v5379_v48 }
 0x2a5   : > { %2952 = vmatmul.mubr.bf16.gmra.mrb[136].mxu1 %v1420_v20 }
 0x2a6   : > { %v2581_v4 = vadd.f32 %v5381_v27, %v2509_v58  ;;  %2991 = vmatprep.mubr.bf16.mxu1 %v6664_v24  ;;  %v6094_v24 = vld [vmem:[%s7854_s5 + $0x28] sm:$0xff]  }
 0x2a7   : > { %5681 = vmatpush3.bf16.msra.mxu0 %v6094_v24 }
 0x2a8   : > { %v5382_v5 = vpop.f32.mrb[32].mxu1 }
 0x2a9   : > { %v5383_v50 = vpop.f32.mrb[33].mxu1 }
 0x2aa   : > { %v5384_v37 = vadd.f32 %v5383_v50, %v5382_v5  ;;  %v5385_v43 = vpop.f32.mrb[34].mxu1 }
 0x2ab   : > { %v5386_v13 = vpop.f32.mrb[35].mxu1 }
 0x2ac   : > { %v2586_v39 = vadd.f32 %v5384_v37, %v2514_v44  ;;  %v5387_v10 = vadd.f32 %v5386_v13, %v5385_v43 }
 0x2ad   : > { %2992 = vmatmul.mubr.bf16.vlgmr.msra.gmra.mrb[140].mxu1 %v6661_v22 }
 0x2ae   : > { %v2589_v17 = vadd.f32 %v5387_v10, %v2517_v26  ;;  %2999 = vmatprep.mubr.bf16.mxu1 %v6780_v62 }
 0x2b0   : > { %v5388_v56 = vpop.f32.mrb[36].mxu1 }
 0x2b1   : > { %v5389_v33 = vpop.f32.mrb[37].mxu1 }
 0x2b2   : > { %v5390_v8 = vadd.f32 %v5389_v33, %v5388_v56  ;;  %v5391_v40 = vpop.f32.mrb[38].mxu1 }
 0x2b3   : > { %v5392_v32 = vpop.f32.mrb[39].mxu1 }
 0x2b4   : > { %v2594_v35 = vadd.f32 %v5390_v8, %v2522_v34 }
 0x2b5   : > { %3000 = vmatmul.mubr.bf16.gmra.mrb[144].mxu1 %v6771_v16 }
 0x2b6   : > { %3007 = vmatprep.mubr.bf16.mxu1 %v1395_v15 }
 0x2b8   : > { %v5410_v22 = vpop.f32.mrb[40].mxu1 }
 0x2b9   : > { %v5411_v57 = vpop.f32.mrb[41].mxu1 }
 0x2ba   : > { %v5412_v62 = vadd.f32 %v5411_v57, %v5410_v22  ;;  %v5413_v12 = vpop.f32.mrb[42].mxu1  ;;  %v6098_v22 = vld [vmem:[%s7854_s5 + $0x38] sm:$0xff]  }
 0x2bb   : > { %v5414_v51 = vpop.f32.mrb[43].mxu1 }
 0x2bc   : > { %v2634_v29 = vadd.f32 %v5412_v62, %v7221_v21  ;;  %v5415_v31 = vadd.f32 %v5414_v51, %v5413_v12 }
 0x2bd   : > { %3008 = vmatmul.mubr.bf16.gmra.mrb[148].mxu1 %v1394_v45  ;;  %v1422_v45 = vpack.c.bf16 %v1350_v63, %v1350_v63  ;;  %v6101_v63 = vld [vmem:[%s7854_s5 + $0x148] sm:$0xff]  }
 0x2be   : > { %v2637_v16 = vadd.f32 %v5415_v31, %v7224_v3  ;;  %3015 = vmatprep.mubr.bf16.mxu1 %v6973_v60 }
 0x2c0   : > { %v5416_v0 = vpop.f32.mrb[44].mxu1 }
 0x2c1   : > { %v5417_v15 = vpop.f32.mrb[45].mxu1 }
 0x2c2   : > { %v5418_v52 = vadd.f32 %v5417_v15, %v5416_v0  ;;  %v5419_v18 = vpop.f32.mrb[46].mxu1 }
 0x2c3   : > { %v5420_v1 = vpop.f32.mrb[47].mxu1 }
 0x2c4   : > { %v2642_v21 = vadd.f32 %v5418_v52, %v7245_v49  ;;  %v5421_v38 = vadd.f32 %v5420_v1, %v5419_v18  ;;  %v6095_v49 = vld [vmem:[%s7854_s5 + $0x70] sm:$0xff]   ;;  %v6099_v52 = vld [vmem:[%s7854_s5 + $0x140] sm:$0xff]  }
 0x2c5   : > { %3016 = vmatmul.mubr.bf16.gmra.mrb[152].mxu1 %v6965_v36  ;;  %v6096_v36 = vld [vmem:[%s7854_s5 + $0x30] sm:$0xff]   ;;  %5682 = vmatprep.subr.bf16.mxu0 %v6095_v49  ;;  %v6106_v49 = vld [vmem:[%s7854_s5 + $0x118] sm:$0xff]  }
 0x2c6   : > { %v2645_v54 = vadd.f32 %v5421_v38, %v7248_v19  ;;  %3023 = vmatprep.mubr.bf16.mxu1 %v1423_v46  ;;  %5683 = vmatpush3.bf16.msra.mxu0 %v6096_v36  ;;  %v6100_v46 = vld [vmem:[%s7854_s5 + $0x100] sm:$0xff]  }
 0x2c7   : > { %5714 = vmatprep.subr.bf16.mxu1 %v6099_v52 }
 0x2c8   : > { %v5422_v7 = vpop.f32.mrb[48].mxu1  ;;  %5715 = vmatpush3.bf16.msra.mxu1 %v6100_v46 }
 0x2c9   : > { %v5423_v60 = vpop.f32.mrb[49].mxu1  ;;  %5716 = vmatprep.subr.bf16.mxu1 %v6101_v63 }
 0x2ca   : > { %v5424_v3 = vadd.f32 %v5423_v60, %v5422_v7  ;;  %v5425_v47 = vpop.f32.mrb[50].mxu1 }
 0x2cb   : > { %v5426_v25 = vpop.f32.mrb[51].mxu1 }
 0x2cc   : > { %v2650_v42 = vadd.f32 %v5424_v3, %v2578_v28  ;;  %v5427_v61 = vadd.f32 %v5426_v25, %v5425_v47  ;;  %v6103_v47 = vld [vmem:[%s7854_s5 + $0x150] sm:$0xff]  }
 0x2cd   : > { %3024 = vmatmul.mubr.bf16.gmra.mrb[156].mxu1 %v1422_v45 }
 0x2ce   : > { %v2653_v14 = vadd.f32 %v5427_v61, %v2581_v4 }
 0x2d0   : > { %v5428_v19 = vpop.f32.mrb[52].mxu1 }
 0x2d1   : > { %v5429_v6 = vpop.f32.mrb[53].mxu1 }
 0x2d2   : > { %v5430_v9 = vadd.f32 %v5429_v6, %v5428_v19  ;;  %v5431_v59 = vpop.f32.mrb[54].mxu1 }
 0x2d3   : > { %v5432_v53 = vpop.f32.mrb[55].mxu1 }
 0x2d4   : > { %v2658_v48 = vadd.f32 %v5430_v9, %v2586_v39  ;;  %v5433_v20 = vadd.f32 %v5432_v53, %v5431_v59  ;;  %v6107_v59 = vld [vmem:[%s7854_s5 + $0xc0] sm:$0xff]  }
 0x2d5   : > { %v6108_v53 = vld [vmem:[%s7854_s5 + $0x160] sm:$0xff]  }
 0x2d6   : > { %v2661_v55 = vadd.f32 %v5433_v20, %v2589_v17 }
 0x2d8   : > { %v5434_v58 = vpop.f32.mrb[56].mxu1 }
 0x2d9   : > { %v5435_v28 = vpop.f32.mrb[57].mxu1 }
 0x2da   : > { %v5436_v27 = vadd.f32 %v5435_v28, %v5434_v58  ;;  %v5437_v4 = vpop.f32.mrb[58].mxu1  ;;  %v6110_v58 = vld [vmem:[%s7854_s5 + $0x120] sm:$0xff]  }
 0x2db   : > { %v5438_v5 = vpop.f32.mrb[59].mxu1 }
 0x2dc   : > { %v2666_v50 = vadd.f32 %v5436_v27, %v2594_v35  ;;  %v6097_v35 = vld [vmem:[%s7854_s5 + $0x78] sm:$0xff]   ;;  %v6112_v27 = vld [vmem:[%s7854_s5 + $0x168] sm:$0xff]  }
 0x2dd   : > { %5684 = vmatprep.subr.bf16.mxu0 %v6097_v35  ;;  %v6114_v5 = vld [vmem:[%s7854_s5 + $0x128] sm:$0xff]  }
 0x2de   : > { %5685 = vmatpush3.bf16.msra.mxu0 %v6098_v22 }
 0x2df   : > { %5692 = vmatprep.subr.bf16.mxu0 %v6107_v59 }
 0x2e0   : > { %v5456_v44 = vpop.f32.mrb[60].mxu1 }
 0x2e1   : > { %v5457_v37 = vpop.f32.mrb[61].mxu1 }
 0x2e2   : > { %v5458_v43 = vadd.f32 %v5457_v37, %v5456_v44  ;;  %v5459_v13 = vpop.f32.mrb[62].mxu1 }
 0x2e3   : > { %v5460_v26 = vpop.f32.mrb[63].mxu1 }
 0x2e4   : > { %v2706_v10 = vadd.f32 %v5458_v43, %v2634_v29  ;;  %v5461_v11 = vadd.f32 %v5460_v26, %v5459_v13  ;;  %v6116_v13 = vld [vmem:[%s7854_s5 + $0x170] sm:$0xff]  }
 0x2e6   : > { %v7297_v24 = vadd.f32 %v5461_v11, %v2637_v16  ;;  %v6118_v11 = vld [vmem:[%s7854_s5 + $0x130] sm:$0xff]  }
 0x2e8   : > { %v5462_v56 = vpop.f32.mrb[64].mxu1 }
 0x2e9   : > { %v5463_v33 = vpop.f32.mrb[65].mxu1 }
 0x2ea   : > { %v5464_v39 = vadd.f32 %v5463_v33, %v5462_v56  ;;  %v5465_v34 = vpop.f32.mrb[66].mxu1  ;;  %v6120_v56 = vld [vmem:[%s7854_s5 + $0x178] sm:$0xff]  }
 0x2eb   : > { %v5466_v17 = vpop.f32.mrb[67].mxu1 }
 0x2ec   : > { %v7299_v8 = vadd.f32 %v5464_v39, %v2642_v21  ;;  %v5467_v40 = vadd.f32 %v5466_v17, %v5465_v34  ;;  %v6122_v39 = vld [vmem:[%s7854_s5 + $0x138] sm:$0xff]  }
 0x2ee   : > { %v7301_v32 = vadd.f32 %v5467_v40, %v2645_v54  ;;  %v6102_v54 = vld [vmem:[%s7854_s5 + $0x108] sm:$0xff]  }
 0x2ef   : > { %5717 = vmatpush3.bf16.msra.mxu1 %v6102_v54 }
 0x2f0   : > { %v5468_v57 = vpop.f32.mrb[68].mxu1  ;;  %5718 = vmatprep.subr.bf16.mxu1 %v6103_v47 }
 0x2f1   : > { %v5469_v62 = vpop.f32.mrb[69].mxu1 }
 0x2f2   : > { %v5470_v12 = vadd.f32 %v5469_v62, %v5468_v57  ;;  %v5471_v23 = vpop.f32.mrb[70].mxu1 }
 0x2f3   : > { %v5472_v51 = vpop.f32.mrb[71].mxu1 }
 0x2f4   : > { %v7309_v29 = vadd.f32 %v5470_v12, %v2650_v42  ;;  %v5473_v31 = vadd.f32 %v5472_v51, %v5471_v23  ;;  %v6104_v42 = vld [vmem:[%s7854_s5 + $0x110] sm:$0xff]  }
 0x2f5   : > { %5719 = vmatpush3.bf16.msra.mxu1 %v6104_v42 }
 0x2f6   : > { %v7311_v16 = vadd.f32 %v5473_v31, %v2653_v14  ;;  %v6105_v14 = vld [vmem:[%s7854_s5 + $0x158] sm:$0xff]  }
 0x2f7   : > { %5720 = vmatprep.subr.bf16.mxu1 %v6105_v14 }
 0x2f8   : > { %v5474_v30 = vpop.f32.mrb[72].mxu1 }
 0x2f9   : > { %v5475_v0 = vpop.f32.mrb[73].mxu1  ;;  %5721 = vmatpush3.bf16.msra.mxu1 %v6106_v49 }
 0x2fa   : > { %v5476_v15 = vadd.f32 %v5475_v0, %v5474_v30  ;;  %v5477_v41 = vpop.f32.mrb[74].mxu1  ;;  %5722 = vmatprep.subr.bf16.mxu1 %v6108_v53 }
 0x2fb   : > { %v5478_v18 = vpop.f32.mrb[75].mxu1 }
 0x2fc   : > { %v7319_v1 = vadd.f32 %v5476_v15, %v2658_v48  ;;  %v5479_v21 = vadd.f32 %v5478_v18, %v5477_v41 }
 0x2fd   : > { %5723 = vmatpush3.bf16.msra.mxu1 %v6110_v58 }
 0x2fe   : > { %v7321_v38 = vadd.f32 %v5479_v21, %v2661_v55  ;;  %5724 = vmatprep.subr.bf16.mxu1 %v6112_v27 }
 0x300   : > { %v5480_v7 = vpop.f32.mrb[76].mxu1 }
 0x301   : > { %v5481_v45 = vpop.f32.mrb[77].mxu1  ;;  %5725 = vmatpush3.bf16.msra.mxu1 %v6114_v5 }
 0x302   : > { %v5482_v60 = vadd.f32 %v5481_v45, %v5480_v7  ;;  %v5483_v3 = vpop.f32.mrb[78].mxu1  ;;  %5726 = vmatprep.subr.bf16.mxu1 %v6116_v13 }
 0x303   : > { %v5484_v25 = vpop.f32.mrb[79].mxu1 }
 0x304   : > { %v7335_v61 = vadd.f32 %v5482_v60, %v2666_v50 }
 0x305   : > { %5727 = vmatpush3.bf16.msra.mxu1 %v6118_v11 }
 0x306   : > { %5728 = vmatprep.subr.bf16.mxu1 %v6120_v56 }
 0x308   : > { %v5502_v36 = vpop.f32.mrb[80].mxu1 }
 0x309   : > { %v5503_v19 = vpop.f32.mrb[81].mxu1  ;;  %5729 = vmatpush3.bf16.msra.mxu1 %v6122_v39 }
 0x30a   : > { %v5504_v6 = vadd.f32 %v5503_v19, %v5502_v36  ;;  %v5505_v9 = vpop.f32.mrb[82].mxu1 }
 0x30b   : > { %v5506_v48 = vpop.f32.mrb[83].mxu1 }
 0x30c   : > { %v2778_v20 = vadd.f32 %v5504_v6, %v2706_v10  ;;  %v5507_v55 = vadd.f32 %v5506_v48, %v5505_v9 }
 0x30e   : > { %v2781_v28 = vadd.f32 %v5507_v55, %v7297_v24 }
 0x310   : > { %v5508_v4 = vpop.f32.mrb[84].mxu1 }
 0x311   : > { %v5509_v50 = vpop.f32.mrb[85].mxu1 }
 0x312   : > { %v5510_v44 = vadd.f32 %v5509_v50, %v5508_v4  ;;  %v5511_v37 = vpop.f32.mrb[86].mxu1 }
 0x313   : > { %v5512_v43 = vpop.f32.mrb[87].mxu1 }
 0x314   : > { %v2786_v26 = vadd.f32 %v5510_v44, %v7299_v8  ;;  %v5513_v10 = vadd.f32 %v5512_v43, %v5511_v37 }
 0x316   : > { %v2789_v24 = vadd.f32 %v5513_v10, %v7301_v32  ;;  %v6197_v32 = vmov 0.0  }
 0x317   : > { %5811 = vmatprep.subr.bf16.mxu1 %v6197_v32 }
 0x318   : > { %v5514_v33 = vpop.f32.mrb[88].mxu1 }
 0x319   : > { %v5515_v34 = vpop.f32.mrb[89].mxu1 }
 0x31a   : > { %v5516_v17 = vadd.f32 %v5515_v34, %v5514_v33  ;;  %v5517_v8 = vpop.f32.mrb[90].mxu1 }
 0x31b   : > { %v5518_v40 = vpop.f32.mrb[91].mxu1 }
 0x31c   : > { %v2794_v35 = vadd.f32 %v5516_v17, %v7309_v29  ;;  %v5519_v22 = vadd.f32 %v5518_v40, %v5517_v8 }
 0x31e   : > { %v2797_v57 = vadd.f32 %v5519_v22, %v7311_v16 }
 0x320   : > { %v5520_v62 = vpop.f32.mrb[92].mxu1 }
 0x321   : > { %v5521_v12 = vpop.f32.mrb[93].mxu1 }
 0x322   : > { %v5522_v23 = vadd.f32 %v5521_v12, %v5520_v62  ;;  %v5523_v51 = vpop.f32.mrb[94].mxu1 }
 0x323   : > { %v5524_v31 = vpop.f32.mrb[95].mxu1 }
 0x324   : > { %v2802_v30 = vadd.f32 %v5522_v23, %v7319_v1  ;;  %v5525_v0 = vadd.f32 %v5524_v31, %v5523_v51 }
 0x326   : > { %v2805_v15 = vadd.f32 %v5525_v0, %v7321_v38 }
 0x328   : > { %v5526_v41 = vpop.f32.mrb[96].mxu1 }
 0x329   : > { %v5527_v52 = vpop.f32.mrb[97].mxu1 }
 0x32a   : > { %v5528_v18 = vadd.f32 %v5527_v52, %v5526_v41  ;;  %v5529_v29 = vpop.f32.mrb[98].mxu1 }
 0x32b   : > { %v5530_v46 = vpop.f32.mrb[99].mxu1 }
 0x32c   : > { %v2810_v21 = vadd.f32 %v5528_v18, %v7335_v61 }
 0x330   : > { %v5548_v63 = vpop.f32.mrb[100].mxu1 }
 0x331   : > { %v5549_v54 = vpop.f32.mrb[101].mxu1 }
 0x332   : > { %v5550_v16 = vadd.f32 %v5549_v54, %v5548_v63  ;;  %v5551_v7 = vpop.f32.mrb[102].mxu1 }
 0x333   : > { %v5552_v45 = vpop.f32.mrb[103].mxu1 }
 0x334   : > { %v2850_v60 = vadd.f32 %v5550_v16, %v2778_v20  ;;  %v5553_v3 = vadd.f32 %v5552_v45, %v5551_v7 }
 0x336   : > { %v2853_v47 = vadd.f32 %v5553_v3, %v2781_v28 }
 0x338   : > { %v5554_v25 = vpop.f32.mrb[104].mxu1 }
 0x339   : > { %v5555_v1 = vpop.f32.mrb[105].mxu1 }
 0x33a   : > { %v5556_v42 = vadd.f32 %v5555_v1, %v5554_v25  ;;  %v5557_v14 = vpop.f32.mrb[106].mxu1 }
 0x33b   : > { %v5558_v38 = vpop.f32.mrb[107].mxu1 }
 0x33c   : > { %v2858_v49 = vadd.f32 %v5556_v42, %v2786_v26  ;;  %v5559_v36 = vadd.f32 %v5558_v38, %v5557_v14 }
 0x33e   : > { %v2861_v19 = vadd.f32 %v5559_v36, %v2789_v24 }
 0x340   : > { %v5560_v6 = vpop.f32.mrb[108].mxu1 }
 0x341   : > { %v5561_v9 = vpop.f32.mrb[109].mxu1 }
 0x342   : > { %v5562_v59 = vadd.f32 %v5561_v9, %v5560_v6  ;;  %v5563_v61 = vpop.f32.mrb[110].mxu1 }
 0x343   : > { %v5564_v53 = vpop.f32.mrb[111].mxu1 }
 0x344   : > { %v2866_v48 = vadd.f32 %v5562_v59, %v2794_v35  ;;  %v5565_v55 = vadd.f32 %v5564_v53, %v5563_v61 }
 0x346   : > { %v2869_v58 = vadd.f32 %v5565_v55, %v2797_v57 }
 0x348   : > { %v5566_v27 = vpop.f32.mrb[112].mxu1 }
 0x349   : > { %v5567_v20 = vpop.f32.mrb[113].mxu1 }
 0x34a   : > { %v5568_v4 = vadd.f32 %v5567_v20, %v5566_v27  ;;  %v5569_v28 = vpop.f32.mrb[114].mxu1 }
 0x34b   : > { %v5570_v5 = vpop.f32.mrb[115].mxu1 }
 0x34c   : > { %v2874_v50 = vadd.f32 %v5568_v4, %v2802_v30  ;;  %v5571_v44 = vadd.f32 %v5570_v5, %v5569_v28 }
 0x34e   : > { %v2877_v37 = vadd.f32 %v5571_v44, %v2805_v15 }
 0x350   : > { %v5572_v43 = vpop.f32.mrb[116].mxu1 }
 0x351   : > { %v5573_v13 = vpop.f32.mrb[117].mxu1 }
 0x352   : > { %v5574_v26 = vadd.f32 %v5573_v13, %v5572_v43  ;;  %v5575_v10 = vpop.f32.mrb[118].mxu1  ;;  %v6111_v43 = vld [vmem:[%s7854_s5 + $0xc8] sm:$0xff]  }
 0x353   : > { %v5576_v11 = vpop.f32.mrb[119].mxu1 }
 0x354   : > { %v2882_v24 = vadd.f32 %v5574_v26, %v2810_v21  ;;  %v6113_v11 = vld [vmem:[%s7854_s5 + $0x88] sm:$0xff]  }
 0x358   : > { %v5594_v56 = vpop.f32.mrb[120].mxu1 }
 0x359   : > { %v5595_v33 = vpop.f32.mrb[121].mxu1 }
 0x35a   : > { %v5596_v39 = vadd.f32 %v5595_v33, %v5594_v56  ;;  %v5597_v34 = vpop.f32.mrb[122].mxu1 }
 0x35b   : > { %v5598_v17 = vpop.f32.mrb[123].mxu1 }
 0x35c   : > { %v2922_v8 = vadd.f32 %v5596_v39, %v2850_v60  ;;  %v5599_v40 = vadd.f32 %v5598_v17, %v5597_v34 }
 0x35e   : > { %v2925_v35 = vadd.f32 %v5599_v40, %v2853_v47  ;;  %v6117_v40 = vld [vmem:[%s7854_s5 + $0x90] sm:$0xff]  }
 0x360   : > { %v5600_v22 = vpop.f32.mrb[124].mxu1 }
 0x361   : > { %v5601_v57 = vpop.f32.mrb[125].mxu1 }
 0x362   : > { %v5602_v62 = vadd.f32 %v5601_v57, %v5600_v22  ;;  %v5603_v12 = vpop.f32.mrb[126].mxu1  ;;  %v6119_v22 = vld [vmem:[%s7854_s5 + $0xd8] sm:$0xff]  }
 0x363   : > { %v5604_v23 = vpop.f32.mrb[127].mxu1 }
 0x364   : > { %v2930_v51 = vadd.f32 %v5602_v62, %v2858_v49  ;;  %v5605_v31 = vadd.f32 %v5604_v23, %v5603_v12  ;;  %v6121_v23 = vld [vmem:[%s7854_s5 + $0x98] sm:$0xff]  }
 0x366   : > { %v2933_v30 = vadd.f32 %v5605_v31, %v2861_v19  ;;  %v6123_v31 = vld [vmem:[%s7854_s5 + $0xe0] sm:$0xff]  }
 0x368   : > { %v5606_v0 = vpop.f32.mrb[128].mxu1 }
 0x369   : > { %v5607_v15 = vpop.f32.mrb[129].mxu1 }
 0x36a   : > { %v5608_v41 = vadd.f32 %v5607_v15, %v5606_v0  ;;  %v5609_v52 = vpop.f32.mrb[130].mxu1 }
 0x36b   : > { %v5610_v18 = vpop.f32.mrb[131].mxu1 }
 0x36c   : > { %v2938_v29 = vadd.f32 %v5608_v41, %v2866_v48  ;;  %v5611_v46 = vadd.f32 %v5610_v18, %v5609_v52 }
 0x36e   : > { %v2941_v21 = vadd.f32 %v5611_v46, %v2869_v58  ;;  %v6125_v46 = vld [vmem:[%s7854_s5 + $0x200] sm:$0xff]  }
 0x370   : > { %v5612_v63 = vpop.f32.mrb[132].mxu1 }
 0x371   : > { %v5613_v54 = vpop.f32.mrb[133].mxu1 }
 0x372   : > { %v5614_v16 = vadd.f32 %v5613_v54, %v5612_v63  ;;  %v5615_v7 = vpop.f32.mrb[134].mxu1  ;;  %v6126_v54 = vld [vmem:[%s7854_s5 + $0xe8] sm:$0xff]  }
 0x373   : > { %v5616_v45 = vpop.f32.mrb[135].mxu1 }
 0x374   : > { %v7379_v60 = vadd.f32 %v5614_v16, %v2874_v50  ;;  %v5617_v3 = vadd.f32 %v5616_v45, %v5615_v7  ;;  %v6109_v50 = vld [vmem:[%s7854_s5 + $0x80] sm:$0xff]  }
 0x376   : > { %v7381_v47 = vadd.f32 %v5617_v3, %v2877_v37  ;;  %v6127_v3 = vld [vmem:[%s7854_s5 + $0xa8] sm:$0xff]  }
 0x378   : > { %v5618_v25 = vpop.f32.mrb[136].mxu1 }
 0x379   : > { %v5619_v1 = vpop.f32.mrb[137].mxu1 }
 0x37a   : > { %v5620_v42 = vadd.f32 %v5619_v1, %v5618_v25  ;;  %v5621_v14 = vpop.f32.mrb[138].mxu1  ;;  %v6128_v25 = vld [vmem:[%s7854_s5 + $0x208] sm:$0xff]  }
 0x37b   : > { %v5622_v38 = vpop.f32.mrb[139].mxu1  ;;  %v6130_v14 = vld [vmem:[%s7854_s5 + $0xb0] sm:$0xff]  }
 0x37c   : > { %v7383_v49 = vadd.f32 %v5620_v42, %v2882_v24  ;;  %v6115_v24 = vld [vmem:[%s7854_s5 + $0xd0] sm:$0xff]  }
 0x37d   : > { %v6131_v38 = vld [vmem:[%s7854_s5 + $0x210] sm:$0xff]  }
 0x380   : > { %v5640_v36 = vpop.f32.mrb[140].mxu1 }
 0x381   : > { %v5641_v19 = vpop.f32.mrb[141].mxu1 }
 0x382   : > { %v5642_v6 = vadd.f32 %v5641_v19, %v5640_v36  ;;  %v5643_v9 = vpop.f32.mrb[142].mxu1  ;;  %v6132_v19 = vld [vmem:[%s7854_s5 + $0xf8] sm:$0xff]  }
 0x383   : > { %v5644_v59 = vpop.f32.mrb[143].mxu1 }
 0x384   : > { %v2994_v61 = vadd.f32 %v5642_v6, %v2922_v8  ;;  %v5645_v53 = vadd.f32 %v5644_v59, %v5643_v9  ;;  %v6133_v59 = vld [vmem:[%s7854_s5 + $0xb8] sm:$0xff]  }
 0x386   : > { %v2997_v48 = vadd.f32 %v5645_v53, %v2925_v35  ;;  %v3031_v55 = vmax.f32 %v2994_v61, 0.0  ;;  %v6134_v61 = vld [vmem:[%s7854_s5 + $0x218] sm:$0xff]  }
 0x388   : > { %v3032_v58 = vmax.f32 %v2997_v48, 0.0  ;;  %v5646_v27 = vpop.f32.mrb[144].mxu1  ;;  %v3040_v44 = vpack.c.bf16 %v3031_v55, %v3031_v55  ;;  %v6135_v48 = vld [vmem:[%s7854_s5 + $0x1c0] sm:$0xff]  }
 0x389   : > { %v5647_v20 = vpop.f32.mrb[145].mxu1  ;;  %v6136_v55 = vld [vmem:[%s7854_s5 + $0x180] sm:$0xff]  }
 0x38a   : > { %v3041_v4 = vpack.c.bf16 %v3032_v58, %v3032_v58  ;;  %v5648_v28 = vadd.f32 %v5647_v20, %v5646_v27  ;;  %v5649_v5 = vpop.f32.mrb[146].mxu1  ;;  %v6137_v27 = vld [vmem:[%s7854_s5 + $0x220] sm:$0xff]   ;;  %v6138_v20 = vld [vmem:[%s7854_s5 + $0x1c8] sm:$0xff]  }
 0x38b   : > { %v5650_v37 = vpop.f32.mrb[147].mxu1 }
 0x38c   : > { %v7391_v13 = vadd.f32 %v5648_v28, %v2930_v51  ;;  %v5651_v26 = vadd.f32 %v5650_v37, %v5649_v5  ;;  %3664 = vmatprep.mubr.bf16.mxu0 %v3041_v4  ;;  %v6139_v28 = vld [vmem:[%s7854_s5 + $0x188] sm:$0xff]   ;;  %v6143_v37 = vld [vmem:[%s7854_s5 + $0x230] sm:$0xff]  }
 0x38d   : > { %3665 = vmatmul.mubr.bf16.vlgmr.msra.gmra.mrb[128].mxu0 %v3040_v44  ;;  %v6140_v5 = vld [vmem:[%s7854_s5 + $0x228] sm:$0xff]   ;;  %v6142_v44 = vld [vmem:[%s7854_s5 + $0x190] sm:$0xff]  }
 0x38e   : > { %v3005_v10 = vadd.f32 %v5651_v26, %v2933_v30  ;;  %5693 = vmatpush3.bf16.msra.mxu0 %v6109_v50  ;;  %v3033_v53 = vmax.f32 %v7391_v13, 0.0  ;;  %v6141_v50 = vld [vmem:[%s7854_s5 + $0x1d0] sm:$0xff]   ;;  %v6145_v13 = vld [vmem:[%s7854_s5 + $0x198] sm:$0xff]  }
 0x38f   : > { %5694 = vmatprep.subr.bf16.mxu0 %v6111_v43  ;;  %v6144_v43 = vld [vmem:[%s7854_s5 + $0x1d8] sm:$0xff]  }
 0x390   : > { %v3034_v56 = vmax.f32 %v3005_v10, 0.0  ;;  %v5652_v33 = vpop.f32.mrb[148].mxu1  ;;  %v3042_v58 = vpack.c.bf16 %v3033_v53, %v3033_v53  ;;  %v6146_v26 = vld [vmem:[%s7854_s5 + $0x238] sm:$0xff]   ;;  %v6147_v10 = vld [vmem:[%s7854_s5 + $0x1e0] sm:$0xff]   ;;  %v3867_v53 = vld [vmem:[%s7856_s7 + $0x108] sm:$0xff] }
 0x391   : > { %v5653_v39 = vpop.f32.mrb[149].mxu1 }
 0x392   : > { %v3043_v34 = vpack.c.bf16 %v3034_v56, %v3034_v56  ;;  %v5654_v17 = vadd.f32 %v5653_v39, %v5652_v33  ;;  %5695 = vmatpush3.bf16.msra.mxu0 %v6113_v11  ;;  %v5655_v8 = vpop.f32.mrb[150].mxu1  ;;  %v6149_v56 = vld [vmem:[%s7854_s5 + $0x1e8] sm:$0xff]  }
 0x393   : > { %v5656_v35 = vpop.f32.mrb[151].mxu1  ;;  %5696 = vmatprep.subr.bf16.mxu0 %v6115_v24  ;;  %v6148_v24 = vld [vmem:[%s7854_s5 + $0x1a0] sm:$0xff]   ;;  %v6150_v39 = vld [vmem:[%s7854_s5 + $0x1a8] sm:$0xff]  }
 0x394   : > { %v3010_v57 = vadd.f32 %v5654_v17, %v2938_v29  ;;  %v5657_v62 = vadd.f32 %v5656_v35, %v5655_v8  ;;  %3704 = vmatprep.mubr.bf16.mxu0 %v3043_v34  ;;  %v6124_v29 = vld [vmem:[%s7854_s5 + $0xa0] sm:$0xff]   ;;  %v6152_v34 = vld [vmem:[%s7854_s5 + $0x1b0] sm:$0xff]   ;;  %v6153_v17 = vld [vmem:[%s7854_s5 + $0x1f8] sm:$0xff]  }
 0x395   : > { %v6154_v8 = vld [vmem:[%s7854_s5 + $0x1b8] sm:$0xff]  }
 0x396   : > { %v3013_v12 = vadd.f32 %v5657_v62, %v2941_v21  ;;  %5697 = vmatpush3.bf16.msra.mxu0 %v6117_v40  ;;  %v3035_v51 = vmax.f32 %v3010_v57, 0.0  ;;  %v3838_v57 = vld [vmem:[%s7856_s7 + $0x20] sm:$0xff]  ;;  %v3835_v62 = vld [vmem:[%s7856_s7 + $0x8] sm:$0xff] }
 0x397   : > { %5698 = vmatprep.subr.bf16.mxu0 %v6119_v22  ;;  %v3834_v22 = vld [vmem:[%s7856_s7] sm:$0xff] }
 0x398   : > { %v3036_v30 = vmax.f32 %v3013_v12, 0.0  ;;  %v5658_v0 = vpop.f32.mrb[152].mxu1  ;;  %v3044_v21 = vpack.c.bf16 %v3035_v51, %v3035_v51  ;;  %v5201_v12 = vcombine.low %v3834_v22, %v3838_v57  ;;  %v3839_v51 = vld [vmem:[%s7856_s7 + $0x28] sm:$0xff] }
 0x399   : > { %v5659_v15 = vpop.f32.mrb[153].mxu1 }
 0x39a   : > { %v3045_v41 = vpack.c.bf16 %v3036_v30, %v3036_v30  ;;  %v5660_v52 = vadd.f32 %v5659_v15, %v5658_v0  ;;  %5699 = vmatpush3.bf16.msra.mxu0 %v6121_v23  ;;  %v5661_v18 = vpop.f32.mrb[154].mxu1  ;;  %v5202_v23 = vcombine.high %v3834_v22, %v3838_v57  ;;  %v3846_v30 = vld [vmem:[%s7856_s7 + $0x60] sm:$0xff]  ;;  %v5203_v0 = vcombine.low %v3835_v62, %v3839_v51  ;;  %v3836_v57 = vld [vmem:[%s7856_s7 + $0x10] sm:$0xff] }
 0x39b   : > { %v5662_v63 = vpop.f32.mrb[155].mxu1  ;;  %5700 = vmatprep.subr.bf16.mxu0 %v6123_v31  ;;  %v3842_v31 = vld [vmem:[%s7856_s7 + $0x40] sm:$0xff]  ;;  %v5204_v15 = vcombine.high %v3835_v62, %v3839_v51  ;;  %v3840_v62 = vld [vmem:[%s7856_s7 + $0x30] sm:$0xff] }
 0x39c   : > { %v7421_v16 = vadd.f32 %v5660_v52, %v7379_v60  ;;  %v5663_v7 = vadd.f32 %v5662_v63, %v5661_v18  ;;  %3744 = vmatprep.mubr.bf16.mxu1 %v3045_v41  ;;  %v6129_v60 = vld [vmem:[%s7854_s5 + $0xf0] sm:$0xff]   ;;  %v5210_v41 = vcombine.high %v3842_v31, %v3846_v30  ;;  %v3843_v52 = vld [vmem:[%s7856_s7 + $0x48] sm:$0xff]  ;;  %v3850_v63 = vld [vmem:[%s7856_s7 + $0x80] sm:$0xff]  ;;  %v5206_v51 = vcombine.high %v3836_v57, %v3840_v62 }
 0x39d   : > { %3745 = vmatmul.mubr.bf16.vlgmr.msra.gmra.mrb[160].mxu1 %v3044_v21  ;;  %v3847_v18 = vld [vmem:[%s7856_s7 + $0x68] sm:$0xff] }
 0x39e   : > { %v3021_v45 = vadd.f32 %v5663_v7, %v7381_v47  ;;  %5701 = vmatpush3.bf16.msra.mxu0 %v6124_v29  ;;  %5812 = vmatpush3.bf16.msra.mxu1 %v6125_v46  ;;  %v3037_v40 = vmax.f32 %v7421_v16, 0.0  ;;  %v5212_v29 = vcombine.high %v3843_v52, %v3847_v18  ;;  %v5209_v46 = vcombine.low %v3842_v31, %v3846_v30  ;;  %v3851_v16 = vld [vmem:[%s7856_s7 + $0x88] sm:$0xff]  ;;  %v3841_v31 = vld [vmem:[%s7856_s7 + $0x38] sm:$0xff] }
 0x39f   : > { %5702 = vmatprep.subr.bf16.mxu0 %v6126_v54  ;;  %5813 = vmatprep.subr.bf16.mxu1 %v6197_v32  ;;  %v5211_v21 = vcombine.low %v3843_v52, %v3847_v18  ;;  %v3854_v54 = vld [vmem:[%s7856_s7 + $0xa0] sm:$0xff] }
 0x3a0   : > { %v5664_v1 = vpop.f32.mrb[156].mxu1  ;;  %5827 = vmatprep.mubr.msk.bf16.mxu1 %vm6198_vm0, %v6197_v32  ;;  %v3046_v35 = vpack.c.bf16 %v3037_v40, %v3037_v40  ;;  %v5218_v7 = vcombine.high %v3850_v63, %v3854_v54 }
 0x3a1   : > { %v5665_v47 = vpop.f32.mrb[157].mxu1 }
 0x3a2   : > { %v5666_v42 = vadd.f32 %v5665_v47, %v5664_v1  ;;  %5703 = vmatpush3.bf16.msra.mxu0 %v6127_v3  ;;  %5814 = vmatpush3.bf16.msra.mxu1 %v6128_v25  ;;  %v5667_v36 = vpop.f32.mrb[158].mxu1  ;;  %v5217_v3 = vcombine.low %v3850_v63, %v3854_v54  ;;  %v3858_v1 = vld [vmem:[%s7856_s7 + $0xc0] sm:$0xff] }
 0x3a3   : > { %5704 = vmatprep.subr.bf16.mxu0 %v6129_v60  ;;  %5815 = vmatprep.subr.bf16.mxu1 %v6197_v32  ;;  %v5668_v6 = vpop.f32.mrb[159].mxu1  ;;  %v3862_v47 = vld [vmem:[%s7856_s7 + $0xe0] sm:$0xff]  ;;  %v3863_v36 = vld [vmem:[%s7856_s7 + $0xe8] sm:$0xff] }
 0x3a4   : > { %v3026_v9 = vadd.f32 %v5666_v42, %v7383_v49  ;;  %v3038_v49 = vmax.f32 %v3021_v45, 0.0  ;;  %v3855_v45 = vld [vmem:[%s7856_s7 + $0xa8] sm:$0xff]  ;;  %v3870_v6 = vld [vmem:[%s7856_s7 + $0x120] sm:$0xff] }
 0x3a5   : > { %v5219_v25 = vcombine.low %v3851_v16, %v3855_v45  ;;  %v5220_v60 = vcombine.high %v3851_v16, %v3855_v45  ;;  %v3859_v42 = vld [vmem:[%s7856_s7 + $0xc8] sm:$0xff] }
 0x3a6   : > { %5705 = vmatpush3.bf16.msra.mxu0 %v6130_v14  ;;  %5816 = vmatpush3.bf16.msra.mxu1 %v6131_v38  ;;  %v3047_v4 = vpack.c.bf16 %v3038_v49, %v3038_v49  ;;  %v3039_v11 = vmax.f32 %v3026_v9, 0.0  ;;  %v5225_v14 = vcombine.low %v3858_v1, %v3862_v47  ;;  %v5226_v38 = vcombine.high %v3858_v1, %v3862_v47 }
 0x3a7   : > { %5706 = vmatprep.subr.bf16.mxu0 %v6132_v19  ;;  %5817 = vmatprep.subr.bf16.mxu1 %v6197_v32  ;;  %v3866_v19 = vld [vmem:[%s7856_s7 + $0x100] sm:$0xff]  ;;  %v5227_v9 = vcombine.low %v3859_v42, %v3863_v36 }
 0x3a8   : > { %v3048_v33 = vpack.c.bf16 %v3039_v11, %v3039_v11  ;;  %v3887_v11 = vld [vmem:[%s7856_s7 + $0x1a8] sm:$0xff] }
 0x3aa   : > { %5707 = vmatpush3.bf16.msra.mxu0 %v6133_v59  ;;  %5818 = vmatpush3.bf16.msra.mxu1 %v6134_v61  ;;  %v5228_v59 = vcombine.high %v3859_v42, %v3863_v36  ;;  %v5234_v61 = vcombine.high %v3866_v19, %v3870_v6 }
 0x3ab   : > { %5736 = vmatprep.subr.bf16.mxu0 %v6135_v48  ;;  %5819 = vmatprep.subr.bf16.mxu1 %v6197_v32  ;;  %v3871_v48 = vld [vmem:[%s7856_s7 + $0x128] sm:$0xff] }
 0x3ac   : > { %v5236_v49 = vcombine.high %v3867_v53, %v3871_v48 }
 0x3ad   : > { %3705 = vmatmul.mubr.bf16.vlgmr.msra.gmra.mrb[132].mxu0 %v3042_v58  ;;  %v3878_v58 = vld [vmem:[%s7856_s7 + $0x160] sm:$0xff] }
 0x3ae   : > { %5737 = vmatpush3.bf16.msra.mxu0 %v6136_v55  ;;  %3784 = vmatprep.mubr.bf16.mxu0 %v3047_v4  ;;  %v3874_v55 = vld [vmem:[%s7856_s7 + $0x140] sm:$0xff]  ;;  %v5233_v4 = vcombine.low %v3866_v19, %v3870_v6 }
 0x3af   : > { %5820 = vmatpush3.bf16.msra.mxu1 %v6137_v27  ;;  %5738 = vmatprep.subr.bf16.mxu0 %v6138_v20  ;;  %v3875_v27 = vld [vmem:[%s7856_s7 + $0x148] sm:$0xff] }
 0x3b0   : > { %5821 = vmatprep.subr.bf16.mxu1 %v6197_v32  ;;  %v3879_v20 = vld [vmem:[%s7856_s7 + $0x168] sm:$0xff] }
 0x3b2   : > { %5739 = vmatpush3.bf16.msra.mxu0 %v6139_v28  ;;  %v5235_v28 = vcombine.low %v3867_v53, %v3871_v48 }
 0x3b3   : > { %5822 = vmatpush3.bf16.msra.mxu1 %v6140_v5  ;;  %5740 = vmatprep.subr.bf16.mxu0 %v6141_v50  ;;  %v5242_v5 = vcombine.high %v3874_v55, %v3878_v58  ;;  %v5244_v50 = vcombine.high %v3875_v27, %v3879_v20 }
 0x3b4   : > { %5823 = vmatprep.subr.bf16.mxu1 %v6197_v32 }
 0x3b6   : > { %5741 = vmatpush3.bf16.msra.mxu0 %v6142_v44  ;;  %v5241_v44 = vcombine.low %v3874_v55, %v3878_v58  ;;  %v3844_v58 = vld [vmem:[%s7856_s7 + $0x50] sm:$0xff] }
 0x3b7   : > { %5824 = vmatpush3.bf16.msra.mxu1 %v6143_v37  ;;  %5742 = vmatprep.subr.bf16.mxu0 %v6144_v43  ;;  %v5243_v37 = vcombine.low %v3875_v27, %v3879_v20  ;;  %v3882_v43 = vld [vmem:[%s7856_s7 + $0x180] sm:$0xff]  ;;  %v3848_v27 = vld [vmem:[%s7856_s7 + $0x70] sm:$0xff]  ;;  %v3845_v20 = vld [vmem:[%s7856_s7 + $0x58] sm:$0xff] }
 0x3b8   : > { %5825 = vmatprep.subr.bf16.mxu1 %v6197_v32  ;;  %v6151_v32 = vld [vmem:[%s7854_s5 + $0x1f0] sm:$0xff]  }
 0x3ba   : > { %5743 = vmatpush3.bf16.msra.mxu0 %v6145_v13  ;;  %v3886_v13 = vld [vmem:[%s7856_s7 + $0x1a0] sm:$0xff] }
 0x3bb   : > { %5826 = vmatpush3.bf16.msra.mxu1 %v6146_v26  ;;  %5744 = vmatprep.subr.bf16.mxu0 %v6147_v10  ;;  %v3883_v26 = vld [vmem:[%s7856_s7 + $0x188] sm:$0xff]  ;;  %v5250_v10 = vcombine.high %v3882_v43, %v3886_v13 }
 0x3bc   : > { %4301 = vmatprep.subr.bf16.mxu1 %v5204_v15 }
 0x3be   : > { %5828 = vmatmul.mubr.bf16.vlgmr.msra.gmra.mrb[164].mxu1 %v3048_v33  ;;  %5745 = vmatpush3.bf16.msra.mxu0 %v6148_v24  ;;  %v5249_v24 = vcombine.low %v3882_v43, %v3886_v13  ;;  %v5252_v33 = vcombine.high %v3883_v26, %v3887_v11  ;;  %v3856_v43 = vld [vmem:[%s7856_s7 + $0xb0] sm:$0xff]  ;;  %v3853_v13 = vld [vmem:[%s7856_s7 + $0x98] sm:$0xff] }
 0x3bf   : > { %5746 = vmatprep.subr.bf16.mxu0 %v6149_v56  ;;  %4333 = vmatprep.mubr.bf16.mxu1 %v6196_v2  ;;  %v5251_v56 = vcombine.low %v3883_v26, %v3887_v11  ;;  %v3857_v26 = vld [vmem:[%s7856_s7 + $0xb8] sm:$0xff] }
 0x3c0   : > { %4302 = vmatpush1.bf16.msra.mxu1 %v5203_v0 }
 0x3c1   : > { %4303 = vmatprep.subr.bf16.mxu1 %v5212_v29 }
 0x3c2   : > { %5747 = vmatpush3.bf16.msra.mxu0 %v6150_v39  ;;  %v3890_v39 = vld [vmem:[%s7856_s7 + $0x1c0] sm:$0xff] }
 0x3c3   : > { %5748 = vmatprep.subr.bf16.mxu0 %v6151_v32  ;;  %v3894_v32 = vld [vmem:[%s7856_s7 + $0x1e0] sm:$0xff] }
 0x3c4   : > { %4304 = vmatpush1.bf16.msra.mxu1 %v5211_v21  ;;  %v5257_v40 = vcombine.low %v3890_v39, %v3894_v32 }
 0x3c5   : > { %4305 = vmatprep.subr.bf16.mxu1 %v5220_v60 }
 0x3c6   : > { %5749 = vmatpush3.bf16.msra.mxu0 %v6152_v34  ;;  %v3891_v34 = vld [vmem:[%s7856_s7 + $0x1c8] sm:$0xff] }
 0x3c7   : > { %5750 = vmatprep.subr.bf16.mxu0 %v6153_v17  ;;  %v5258_v17 = vcombine.high %v3890_v39, %v3894_v32  ;;  %v3864_v39 = vld [vmem:[%s7856_s7 + $0xf0] sm:$0xff]  ;;  %v3861_v32 = vld [vmem:[%s7856_s7 + $0xd8] sm:$0xff] }
 0x3c8   : > { %4306 = vmatpush1.bf16.msra.mxu1 %v5219_v25 }
 0x3c9   : > { %4307 = vmatprep.subr.bf16.mxu1 %v5228_v59 }
 0x3ca   : > { %5751 = vmatpush3.bf16.msra.mxu0 %v6154_v8  ;;  %v3895_v8 = vld [vmem:[%s7856_s7 + $0x1e8] sm:$0xff] }
 0x3cb   : > { %4260 = vmatprep.subr.bf16.mxu0 %v5202_v23  ;;  %v5260_v22 = vcombine.high %v3891_v34, %v3895_v8  ;;  %v5205_v23 = vcombine.low %v3836_v57, %v3840_v62  ;;  %v3872_v57 = vld [vmem:[%s7856_s7 + $0x130] sm:$0xff]  ;;  %v3873_v62 = vld [vmem:[%s7856_s7 + $0x138] sm:$0xff] }
 0x3cc   : > { %4308 = vmatpush1.bf16.msra.mxu1 %v5227_v9 }
 0x3cd   : > { %3785 = vmatmul.mubr.bf16.vlgmr.msra.gmra.mrb[136].mxu0 %v3046_v35  ;;  %4309 = vmatprep.subr.bf16.mxu1 %v5236_v49  ;;  %v5259_v35 = vcombine.low %v3891_v34, %v3895_v8  ;;  %v3865_v34 = vld [vmem:[%s7856_s7 + $0xf8] sm:$0xff]  ;;  %v5223_v8 = vcombine.low %v3853_v13, %v3857_v26 }
 0x3ce   : > { %4292 = vmatprep.mubr.bf16.mxu0 %v6196_v2  ;;  %4261 = vmatpush1.bf16.msra.mxu0 %v5201_v12  ;;  %v3837_v12 = vld [vmem:[%s7856_s7 + $0x18] sm:$0xff] }
 0x3cf   : > { %4262 = vmatprep.subr.bf16.mxu0 %v5210_v41  ;;  %v5207_v30 = vcombine.low %v3837_v12, %v3841_v31  ;;  %v5208_v0 = vcombine.high %v3837_v12, %v3841_v31 }
 0x3d0   : > { %4310 = vmatpush1.bf16.msra.mxu1 %v5235_v28 }
 0x3d1   : > { %4311 = vmatprep.subr.bf16.mxu1 %v5244_v50  ;;  %v5214_v50 = vcombine.high %v3844_v58, %v3848_v27 }
 0x3d2   : > { %4263 = vmatpush1.bf16.msra.mxu0 %v5209_v46 }
 0x3d3   : > { %4264 = vmatprep.subr.bf16.mxu0 %v5218_v7  ;;  %v5128_v7 = vld [vmem:[%s7855_s6] ss:$0 sm:$0xff] }
 0x3d4   : > { %4312 = vmatpush1.bf16.msra.mxu1 %v5243_v37  ;;  %v3852_v37 = vld [vmem:[%s7856_s7 + $0x90] sm:$0xff] }
 0x3d5   : > { %4313 = vmatprep.subr.bf16.mxu1 %v5252_v33  ;;  %v3860_v33 = vld [vmem:[%s7856_s7 + $0xd0] sm:$0xff] }
 0x3d6   : > { %4265 = vmatpush1.bf16.msra.mxu0 %v5217_v3  ;;  %v5229_v12 = vcombine.low %v3860_v33, %v3864_v39 }
 0x3d7   : > { %4266 = vmatprep.subr.bf16.mxu0 %v5226_v38 }
 0x3d8   : > { %4314 = vmatpush1.bf16.msra.mxu1 %v5251_v56  ;;  %v5224_v56 = vcombine.high %v3853_v13, %v3857_v26  ;;  %v6171_v13 = vld [vmem:[%s7858_s9 + $0x60] sm:$0xff]  }
 0x3d9   : > { %4315 = vmatprep.subr.bf16.mxu1 %v5260_v22  ;;  %v3868_v22 = vld [vmem:[%s7856_s7 + $0x110] sm:$0xff]  ;;  %v6172_v26 = vld [vmem:[%s7858_s9 + $0xe0] sm:$0xff]  }
 0x3da   : > { %4267 = vmatpush1.bf16.msra.mxu0 %v5225_v14 }
 0x3db   : > { %4268 = vmatprep.subr.bf16.mxu0 %v5234_v61 }
 0x3dc   : > { %4316 = vmatpush1.bf16.msra.mxu1 %v5259_v35  ;;  %v5232_v35 = vcombine.high %v3861_v32, %v3865_v34 }
 0x3dd   : > { %4383 = vmatprep.subr.bf16.mxu1 %v5208_v0  ;;  %v3880_v0 = vld [vmem:[%s7856_s7 + $0x170] sm:$0xff] }
 0x3de   : > { %4269 = vmatpush1.bf16.msra.mxu0 %v5233_v4  ;;  %v3849_v4 = vld [vmem:[%s7856_s7 + $0x78] sm:$0xff] }
 0x3df   : > { %4270 = vmatprep.subr.bf16.mxu0 %v5242_v5  ;;  %v5215_v11 = vcombine.low %v3845_v20, %v3849_v4 }
 0x3e2   : > { %4271 = vmatpush1.bf16.msra.mxu0 %v5241_v44  ;;  %v5216_v44 = vcombine.high %v3845_v20, %v3849_v4  ;;  %v6163_v20 = vld [vmem:[%s7858_s9 + $0x50] sm:$0xff]  }
 0x3e3   : > { %4272 = vmatprep.subr.bf16.mxu0 %v5250_v10  ;;  %v5213_v10 = vcombine.low %v3844_v58, %v3848_v27  ;;  %v6161_v58 = vld [vmem:[%s7858_s9 + $0x8] sm:$0xff]   ;;  %v6164_v4 = vld [vmem:[%s7858_s9 + $0xd0] sm:$0xff]  }
 0x3e4   : > { %v6162_v27 = vld [vmem:[%s7858_s9 + $0x88] sm:$0xff]  }
 0x3e6   : > { %4273 = vmatpush1.bf16.msra.mxu0 %v5249_v24  ;;  %v5222_v24 = vcombine.high %v3852_v37, %v3856_v43 }
 0x3e7   : > { %4274 = vmatprep.subr.bf16.mxu0 %v5258_v17  ;;  %v5221_v17 = vcombine.low %v3852_v37, %v3856_v43  ;;  %v6169_v37 = vld [vmem:[%s7858_s9 + $0x18] sm:$0xff]  }
 0x3e8   : > { %v6170_v43 = vld [vmem:[%s7858_s9 + $0x98] sm:$0xff]  }
 0x3ea   : > { %4275 = vmatpush1.bf16.msra.mxu0 %v5257_v40  ;;  %v5230_v40 = vcombine.high %v3860_v33, %v3864_v39  ;;  %v6177_v33 = vld [vmem:[%s7858_s9 + $0x28] sm:$0xff]  }
 0x3eb   : > { %4342 = vmatprep.subr.bf16.mxu0 %v5206_v51  ;;  %v5238_v51 = vcombine.high %v3868_v22, %v3872_v57  ;;  %v6178_v39 = vld [vmem:[%s7858_s9 + $0xa8] sm:$0xff]  }
 0x460   : > { %v5686_v15 = vpop.f32.mrb[128].mxu0 }
 0x461   : > { %v5687_v41 = vpop.f32.mrb[129].mxu0 }
 0x462   : > { %v5688_v52 = vadd.f32 %v5687_v41, %v5686_v15  ;;  %v5689_v18 = vpop.f32.mrb[130].mxu0  ;;  %v3877_v15 = vld [vmem:[%s7856_s7 + $0x158] sm:$0xff] }
 0x463   : > { %v5690_v29 = vpop.f32.mrb[131].mxu0  ;;  %v3881_v41 = vld [vmem:[%s7856_s7 + $0x178] sm:$0xff] }
 0x464   : > { %v3667_v25 = vadd.f32 %v5688_v52, %v5128_v7  ;;  %v5237_v52 = vcombine.low %v3868_v22, %v3872_v57  ;;  %v6185_v22 = vld [vmem:[%s7858_s9 + $0x38] sm:$0xff]  }
 0x465   : > { %v6186_v57 = vld [vmem:[%s7858_s9 + $0xb8] sm:$0xff]  }
 0x470   : > { %v5730_v46 = vpop.f32.mrb[160].mxu1 }
 0x471   : > { %v5731_v21 = vpop.f32.mrb[161].mxu1 }
 0x472   : > { %v5732_v63 = vadd.f32 %v5731_v21, %v5730_v46  ;;  %v5733_v54 = vpop.f32.mrb[162].mxu1  ;;  %v5248_v46 = vcombine.high %v3877_v15, %v3881_v41  ;;  %v3884_v21 = vld [vmem:[%s7856_s7 + $0x190] sm:$0xff] }
 0x473   : > { %v5734_v16 = vpop.f32.mrb[163].mxu1  ;;  %v3885_v54 = vld [vmem:[%s7856_s7 + $0x198] sm:$0xff] }
 0x474   : > { %v3889_v16 = vld [vmem:[%s7856_s7 + $0x1b8] sm:$0xff] }
 0x480   : > { %v5708_v45 = vpop.f32.mrb[132].mxu0 }
 0x481   : > { %v5709_v3 = vpop.f32.mrb[133].mxu0 }
 0x482   : > { %v5710_v60 = vadd.f32 %v5709_v3, %v5708_v45  ;;  %v5711_v1 = vpop.f32.mrb[134].mxu0  ;;  %v5247_v45 = vcombine.low %v3877_v15, %v3881_v41 }
 0x483   : > { %v5712_v47 = vpop.f32.mrb[135].mxu0  ;;  %v3896_v1 = vld [vmem:[%s7856_s7 + $0x1f0] sm:$0xff] }
 0x484   : > { %v3707_v42 = vadd.f32 %v5710_v60, %v3667_v25  ;;  %v5256_v25 = vcombine.high %v3885_v54, %v3889_v16  ;;  %v3892_v60 = vld [vmem:[%s7856_s7 + $0x1d0] sm:$0xff]  ;;  %v3893_v47 = vld [vmem:[%s7856_s7 + $0x1d8] sm:$0xff] }
 0x486   : > { %v3747_v14 = vadd.f32 %v5732_v63, %v3707_v42  ;;  %v3888_v63 = vld [vmem:[%s7856_s7 + $0x1b0] sm:$0xff]  ;;  %v3897_v42 = vld [vmem:[%s7856_s7 + $0x1f8] sm:$0xff] }
 0x487   : > { %v5254_v3 = vcombine.high %v3884_v21, %v3888_v63 }
 0x491   : > { %v3826_v38 = vpop.f32.mrb[164].mxu1 }
 0x492   : > { %v5829_v36 = vpop.f32.mrb[165].mxu1 }
 0x493   : > { %v3829_v19 = vpop.f32.mrb[166].mxu1  ;;  %v5262_v36 = vcombine.high %v3892_v60, %v3896_v1 }
 0x494   : > { %v5830_v6 = vpop.f32.mrb[167].mxu1  ;;  %v5264_v19 = vcombine.high %v3893_v47, %v3897_v42 }
 0x495   : > { %v5261_v6 = vcombine.low %v3892_v60, %v3896_v1 }
 0x4a0   : > { %v5752_v9 = vpop.f32.mrb[136].mxu0 }
 0x4a1   : > { %v5753_v59 = vpop.f32.mrb[137].mxu0 }
 0x4a2   : > { %v5754_v61 = vadd.f32 %v5753_v59, %v5752_v9  ;;  %v5755_v53 = vpop.f32.mrb[138].mxu0  ;;  %v5263_v9 = vcombine.low %v3893_v47, %v3897_v42  ;;  %v6155_v59 = vld [vmem:[%s7858_s9 + $0x40] sm:$0xff]  }
 0x4a3   : > { %v5756_v48 = vpop.f32.mrb[139].mxu0  ;;  %v6157_v53 = vld [vmem:[%s7858_s9] sm:$0xff]  }
 0x4a4   : > { %v3787_v49 = vadd.f32 %v5754_v61, %v3747_v14  ;;  %v5253_v14 = vcombine.low %v3884_v21, %v3888_v63  ;;  %v6156_v61 = vld [vmem:[%s7858_s9 + $0xc0] sm:$0xff]  }
 0x4a5   : > { %v6158_v48 = vld [vmem:[%s7858_s9 + $0x80] sm:$0xff]  }
 0x4a6   : > { %v3827_v55 = vadd.f32 %v3826_v38, %v3787_v49  ;;  %v5255_v38 = vcombine.low %v3885_v54, %v3889_v16  ;;  %v6159_v49 = vld [vmem:[%s7858_s9 + $0x48] sm:$0xff]  }
 0x4a8   : > { %v3832_v28 = vmax.f32 %v3827_v55, 0.0  ;;  %v6160_v55 = vld [vmem:[%s7858_s9 + $0xc8] sm:$0xff]  }
 0x4aa   : > { %v7644_v5 = vpack.c.bf16 %v3832_v28, %v3832_v28  ;;  %v6165_v28 = vld [vmem:[%s7858_s9 + $0x10] sm:$0xff]  }
 0x4ac   : > { %4293 = vmatmul.mubr.bf16.vlgmr.msra.gmra.mrb[140].mxu0 %v7644_v5  ;;  %4334 = vmatmul.mubr.bf16.vlgmr.msra.gmra.mrb[168].mxu1 %v7644_v5 }
 0x4ad   : > { %4343 = vmatpush1.bf16.msra.mxu0 %v5205_v23  ;;  %4384 = vmatpush1.bf16.msra.mxu1 %v5207_v30  ;;  %v5231_v23 = vcombine.low %v3861_v32, %v3865_v34  ;;  %v3876_v30 = vld [vmem:[%s7856_s7 + $0x150] sm:$0xff] }
 0x4ae   : > { %4344 = vmatprep.subr.bf16.mxu0 %v5214_v50  ;;  %4385 = vmatprep.subr.bf16.mxu1 %v5216_v44  ;;  %v5246_v29 = vcombine.high %v3876_v30, %v3880_v0  ;;  %v5245_v7 = vcombine.low %v3876_v30, %v3880_v0  ;;  %v6167_v50 = vld [vmem:[%s7858_s9 + $0x58] sm:$0xff]   ;;  %v6179_v32 = vld [vmem:[%s7858_s9 + $0x70] sm:$0xff]  }
 0x4af   : > { %4374 = vmatprep.mubr.bf16.mxu0 %v6196_v2  ;;  %4415 = vmatprep.mubr.bf16.mxu1 %v6196_v2  ;;  %v3869_v2 = vld [vmem:[%s7856_s7 + $0x118] sm:$0xff]  ;;  %v6180_v34 = vld [vmem:[%s7858_s9 + $0xf0] sm:$0xff]  }
 0x4b0   : > { %v5240_v31 = vcombine.high %v3869_v2, %v3873_v62  ;;  %v5239_v18 = vcombine.low %v3869_v2, %v3873_v62  ;;  %v6168_v44 = vld [vmem:[%s7858_s9 + $0xd8] sm:$0xff]   ;;  %v3900_v2 = vlaneseq }
 0x4b1   : > { %4345 = vmatpush1.bf16.msra.mxu0 %v5213_v10  ;;  %4386 = vmatpush1.bf16.msra.mxu1 %v5215_v11  ;;  %v6173_v10 = vld [vmem:[%s7858_s9 + $0x20] sm:$0xff]  }
 0x4b2   : > { %4346 = vmatprep.subr.bf16.mxu0 %v5222_v24  ;;  %4387 = vmatprep.subr.bf16.mxu1 %v5224_v56  ;;  %v6174_v11 = vld [vmem:[%s7858_s9 + $0xa0] sm:$0xff]   ;;  %v6175_v24 = vld [vmem:[%s7858_s9 + $0x68] sm:$0xff]   ;;  %v7820_v62 = vshrl.u32 %v3900_v2, 7 }
 0x4b3   : > { %v6176_v56 = vld [vmem:[%s7858_s9 + $0xe8] sm:$0xff]  }
 0x4b4   : > { %v3914_v30 = vsub.s32 3, %v7820_v62 }
 0x4b5   : > { %4347 = vmatpush1.bf16.msra.mxu0 %v5221_v17  ;;  %4388 = vmatpush1.bf16.msra.mxu1 %v5223_v8  ;;  %v6181_v17 = vld [vmem:[%s7858_s9 + $0x30] sm:$0xff]  }
 0x4b6   : > { %4348 = vmatprep.subr.bf16.mxu0 %v5230_v40  ;;  %4389 = vmatprep.subr.bf16.mxu1 %v5232_v35  ;;  %v6182_v8 = vld [vmem:[%s7858_s9 + $0xb0] sm:$0xff]   ;;  %v6183_v40 = vld [vmem:[%s7858_s9 + $0x78] sm:$0xff]  }
 0x4b7   : > { %v6184_v35 = vld [vmem:[%s7858_s9 + $0xf8] sm:$0xff]  }
 0x4b9   : > { %4349 = vmatpush1.bf16.msra.mxu0 %v5229_v12  ;;  %4390 = vmatpush1.bf16.msra.mxu1 %v5231_v23  ;;  %v3902_v12 = vsub.s32 0, %v7820_v62  ;;  %v3910_v23 = vsub.s32 2, %v7820_v62 }
 0x4ba   : > { %4350 = vmatprep.subr.bf16.mxu0 %v5238_v51  ;;  %4391 = vmatprep.subr.bf16.mxu1 %v5240_v31  ;;  %v3898_v51 = vld [vmem:[%s7857_s8] sm:$0xff]  ;;  %v3906_v31 = vsub.s32 1, %v7820_v62 }
 0x4bb   : > { %v3903_v0 = vrot.slane %v3898_v51, %v3902_v12  ;;  %v3911_v15 = vrot.slane %v3898_v51, %v3910_v23 }
 0x4bc   : > { %v3907_v41 = vrot.slane %v3898_v51, %v3906_v31 }
 0x4bd   : > { %4351 = vmatpush1.bf16.msra.mxu0 %v5237_v52  ;;  %4392 = vmatpush1.bf16.msra.mxu1 %v5239_v18  ;;  %v3915_v52 = vrot.slane %v3898_v51, %v3914_v30 }
 0x4be   : > { %4352 = vmatprep.subr.bf16.mxu0 %v5246_v29  ;;  %4393 = vmatprep.subr.bf16.mxu1 %v5248_v46 }
 0x4c1   : > { %4353 = vmatpush1.bf16.msra.mxu0 %v5245_v7  ;;  %4394 = vmatpush1.bf16.msra.mxu1 %v5247_v45 }
 0x4c2   : > { %4354 = vmatprep.subr.bf16.mxu0 %v5254_v3  ;;  %4395 = vmatprep.subr.bf16.mxu1 %v5256_v25 }
 0x4c5   : > { %4355 = vmatpush1.bf16.msra.mxu0 %v5253_v14  ;;  %4396 = vmatpush1.bf16.msra.mxu1 %v5255_v38 }
 0x4c6   : > { %4356 = vmatprep.subr.bf16.mxu0 %v5262_v36  ;;  %4397 = vmatprep.subr.bf16.mxu1 %v5264_v19 }
 0x4c9   : > { %4357 = vmatpush1.bf16.msra.mxu0 %v5261_v6  ;;  %4398 = vmatpush1.bf16.msra.mxu1 %v5263_v9  ;;  %v3918_v9 = vsub.s32 4, %v7820_v62 }
 0x4ca   : > { %5767 = vmatprep.subr.bf16.mxu0 %v6155_v59  ;;  %5789 = vmatprep.subr.bf16.mxu1 %v6156_v61  ;;  %v3926_v59 = vsub.s32 6, %v7820_v62  ;;  %v3922_v61 = vsub.s32 5, %v7820_v62 }
 0x4cc   : > { %4375 = vmatmul.mubr.bf16.vlgmr.msra.gmra.mrb[144].mxu0 %v7644_v5  ;;  %4416 = vmatmul.mubr.bf16.vlgmr.msra.gmra.mrb[172].mxu1 %v7644_v5  ;;  %v6166_v5 = vld [vmem:[%s7858_s9 + $0x90] sm:$0xff]  }
 0x4cd   : > { %5768 = vmatpush3.bf16.msra.mxu0 %v6157_v53  ;;  %5790 = vmatpush3.bf16.msra.mxu1 %v6158_v48  ;;  %v3930_v53 = vsub.s32 7, %v7820_v62  ;;  %v3919_v48 = vrot.slane %v3898_v51, %v3918_v9 }
 0x4ce   : > { %5769 = vmatprep.subr.bf16.mxu0 %v6159_v49  ;;  %5791 = vmatprep.subr.bf16.mxu1 %v6160_v55  ;;  %v3927_v49 = vrot.slane %v3898_v51, %v3926_v59  ;;  %v4780_v55 = vld [vmem:[%s7860_s11] sm:$0xf] }
 0x4d1   : > { %5770 = vmatpush3.bf16.msra.mxu0 %v6161_v58  ;;  %5792 = vmatpush3.bf16.msra.mxu1 %v6162_v27  ;;  %v3923_v58 = vrot.slane %v3898_v51, %v3922_v61  ;;  %v3931_v27 = vrot.slane %v3898_v51, %v3930_v53  ;;  %v5298_v51 = vld [vmem:[#allocation2] ss:$0 sm:$0xff] }
 0x4d2   : > { %5771 = vmatprep.subr.bf16.mxu0 %v6163_v20  ;;  %5793 = vmatprep.subr.bf16.mxu1 %v6164_v4 }
 0x4d5   : > { %5772 = vmatpush3.bf16.msra.mxu0 %v6165_v28  ;;  %5794 = vmatpush3.bf16.msra.mxu1 %v6166_v5  ;;  %v4785_v5 = vrot.slane %v4780_v55, %v3902_v12 }
 0x4d6   : > { %5773 = vmatprep.subr.bf16.mxu0 %v6167_v50  ;;  %5795 = vmatprep.subr.bf16.mxu1 %v6168_v44 }
 0x4d9   : > { %5774 = vmatpush3.bf16.msra.mxu0 %v6169_v37  ;;  %5796 = vmatpush3.bf16.msra.mxu1 %v6170_v43 }
 0x4da   : > { %5775 = vmatprep.subr.bf16.mxu0 %v6171_v13  ;;  %5797 = vmatprep.subr.bf16.mxu1 %v6172_v26  ;;  %v4789_v13 = vrot.slane %v4780_v55, %v3906_v31 }
 0x4dd   : > { %5776 = vmatpush3.bf16.msra.mxu0 %v6173_v10  ;;  %5798 = vmatpush3.bf16.msra.mxu1 %v6174_v11 }
 0x4de   : > { %5777 = vmatprep.subr.bf16.mxu0 %v6175_v24  ;;  %5799 = vmatprep.subr.bf16.mxu1 %v6176_v56 }
 0x4e1   : > { %5778 = vmatpush3.bf16.msra.mxu0 %v6177_v33  ;;  %5800 = vmatpush3.bf16.msra.mxu1 %v6178_v39 }
 0x4e2   : > { %5779 = vmatprep.subr.bf16.mxu0 %v6179_v32  ;;  %5801 = vmatprep.subr.bf16.mxu1 %v6180_v34  ;;  %v4793_v32 = vrot.slane %v4780_v55, %v3910_v23  ;;  %v5265_v23 = vld [vmem:[%s7859_s10] ss:$0 sm:$0xff] }
 0x4e5   : > { %5780 = vmatpush3.bf16.msra.mxu0 %v6181_v17  ;;  %5802 = vmatpush3.bf16.msra.mxu1 %v6182_v8 }
 0x4e6   : > { %5781 = vmatprep.subr.bf16.mxu0 %v6183_v40  ;;  %5803 = vmatprep.subr.bf16.mxu1 %v6184_v35  ;;  %v4797_v35 = vrot.slane %v4780_v55, %v3914_v30 }
 0x4e9   : > { %5782 = vmatpush3.bf16.msra.mxu0 %v6185_v22  ;;  %5804 = vmatpush3.bf16.msra.mxu1 %v6186_v57 }
 0x57f   : > { %v4294_v18 = vpop.f32.mrb[140].mxu0  ;;  %v4335_v29 = vpop.f32.mrb[168].mxu1 }
 0x580   : > { %v4295_v46 = vadd.f32 %v4294_v18, %v3903_v0  ;;  %v4336_v21 = vadd.f32 %v4335_v29, %v3911_v15  ;;  %v4296_v63 = vpop.f32.mrb[141].mxu0  ;;  %v4337_v54 = vpop.f32.mrb[169].mxu1 }
 0x581   : > { %v4297_v16 = vadd.f32 %v4296_v63, %v3907_v41  ;;  %v4338_v7 = vadd.f32 %v4337_v54, %v3915_v52  ;;  %v4298_v45 = vpop.f32.mrb[142].mxu0  ;;  %v4339_v3 = vpop.f32.mrb[170].mxu1 }
 0x582   : > { %v4424_v25 = vmax.f32 %v4295_v46, 0.0  ;;  %v4426_v60 = vmax.f32 %v4336_v21, 0.0  ;;  %v4299_v1 = vpop.f32.mrb[143].mxu0  ;;  %v4340_v47 = vpop.f32.mrb[171].mxu1 }
 0x583   : > { %v4425_v42 = vmax.f32 %v4297_v16, 0.0  ;;  %v4427_v14 = vmax.f32 %v4338_v7, 0.0 }
 0x584   : > { %v4432_v19 = vpack.c.bf16 %v4424_v25, %v4424_v25  ;;  %v4434_v6 = vpack.c.bf16 %v4426_v60, %v4426_v60 }
 0x585   : > { %v4433_v38 = vpack.c.bf16 %v4425_v42, %v4425_v42  ;;  %v4435_v36 = vpack.c.bf16 %v4427_v14, %v4427_v14 }
 0x587   : > { %4731 = vmatprep.mubr.bf16.mxu0 %v4433_v38  ;;  %4771 = vmatprep.mubr.bf16.mxu1 %v4435_v36 }
 0x588   : > { %4732 = vmatmul.mubr.bf16.vlgmr.msra.gmra.mrb[148].mxu0 %v4432_v19  ;;  %4772 = vmatmul.mubr.bf16.vlgmr.msra.gmra.mrb[176].mxu1 %v4434_v6 }
 0x59f   : > { %v4376_v20 = vpop.f32.mrb[144].mxu0  ;;  %v4417_v4 = vpop.f32.mrb[172].mxu1 }
 0x5a0   : > { %v4377_v28 = vadd.f32 %v4376_v20, %v3919_v48  ;;  %v4418_v50 = vadd.f32 %v4417_v4, %v3927_v49  ;;  %v4378_v44 = vpop.f32.mrb[145].mxu0  ;;  %v4419_v37 = vpop.f32.mrb[173].mxu1 }
 0x5a1   : > { %v4379_v43 = vadd.f32 %v4378_v44, %v3923_v58  ;;  %v4420_v26 = vadd.f32 %v4419_v37, %v3931_v27  ;;  %v4380_v10 = vpop.f32.mrb[146].mxu0  ;;  %v4421_v11 = vpop.f32.mrb[174].mxu1 }
 0x5a2   : > { %v4428_v24 = vmax.f32 %v4377_v28, 0.0  ;;  %v4381_v56 = vpop.f32.mrb[147].mxu0  ;;  %v4422_v33 = vpop.f32.mrb[175].mxu1  ;;  %v4430_v39 = vmax.f32 %v4418_v50, 0.0 }
 0x5a3   : > { %v4429_v34 = vmax.f32 %v4379_v43, 0.0  ;;  %v4431_v40 = vmax.f32 %v4420_v26, 0.0 }
 0x5a4   : > { %v4802_v17 = vmul.f32 %v4785_v5, %v4428_v24  ;;  %v4804_v22 = vmul.f32 %v4793_v32, %v4430_v39 }
 0x5a5   : > { %v4803_v8 = vmul.f32 %v4789_v13, %v4429_v34  ;;  %v4805_v2 = vmul.f32 %v4797_v35, %v4431_v40 }
 0x5a7   : > { %v4806_v57 = vadd.f32 %v4803_v8, %v4802_v17 }
 0x5a9   : > { %v4807_v62 = vadd.f32 %v4806_v57, %v4804_v22 }
 0x5ab   : > { %v4808_v12 = vadd.f32 %v4807_v62, %v4805_v2 }
 0x5ad   : > { %4809 = vadd.xlane.f32.xlu0 %v4808_v12 }
 0x63a   : > { %v4810_v31 = vpop.xlane.xlu0 %4809 }
 0x63b   : > { %v4818_v0 = vadd.f32 %v5298_v51, %v4810_v31 }
 0x63d   : > { %4821 = vperm.xlu0 %5842, %v4818_v0  }
 0x65b   : > { %v5783_v15 = vpop.f32.mrb[148].mxu0  ;;  %v5805_v41 = vpop.f32.mrb[176].mxu1 }
 0x65c   : > { %v5784_v52 = vpop.f32.mrb[149].mxu0  ;;  %v5806_v18 = vpop.f32.mrb[177].mxu1 }
 0x65d   : > { %v5785_v30 = vadd.f32 %v5784_v52, %v5783_v15  ;;  %v5807_v29 = vadd.f32 %v5806_v18, %v5805_v41  ;;  %v5786_v46 = vpop.f32.mrb[150].mxu0  ;;  %v5808_v21 = vpop.f32.mrb[178].mxu1 }
 0x65e   : > { %v5787_v63 = vpop.f32.mrb[151].mxu0  ;;  %v5809_v54 = vpop.f32.mrb[179].mxu1 }
 0x65f   : > { %v4734_v16 = vadd.f32 %v5785_v30, %v5265_v23 }
 0x661   : > { %v4774_v7 = vadd.f32 %v5807_v29, %v4734_v16 }
 0x663   : > { %4779 = vst [vmem:[%s474_s21] sm:$0xff] %v4774_v7 }
 0x6bc   : > { %v4822_v45 = vpop.permute.xlu0 %4821 }
 0x6bd   : > { %4824 = vst [vmem:[%s478_s24] sm:$0xff] %v4822_v45 }
 0x6be PF: > { %s27_s15 = sadd.s32 1, %s6194_s15  }
 0x6bf   : > { %p24_p4 = scmp.ge.s32.totalorder %s27_s15, 4  }
 0x6c1   :  { %26 = sbr.rel (!%p24_p4) target bundleno = 3 (0x3), region = 114 }

</bundles_post_ra>
